<compile_context>
chip_gen: v6e
topology: v6e:2x2x1
jax: 0.10.0
libtpu: 0.0.40
codegen_flags: <defaults>
</compile_context>

<pallas_src>
import functools

import jax
import jax.numpy as jnp
from jax.experimental import pallas as pl
from jax.experimental.pallas import tpu as pltpu

EPS = 1e-5
F_IN = 256 * 4 * 4   # 4096, fixed by the module
F_HID = 1024
F_OUT = 4
N_PAD = 128          # lane-dense padded width for the classifier head
TK = 2048            # contraction tile for the first matmul -> 2 grid steps


def rot_classifier_kernel(x_ref, w1_ref, gamma_ref, beta_ref, w2_ref,
                          o_ref, acc_ref):
    k = pl.program_id(1)

    # ---- Linear 1 (partial): (B, tk) bf16 @ (tk, hid_c) bf16 -> f32 ----
    part = jnp.dot(x_ref[...].astype(jnp.bfloat16), w1_ref[...],
                   preferred_element_type=jnp.float32)

    @pl.when(k == 0)
    def _first():
        acc_ref[...] = part          # fold init into the first dot

    @pl.when(k > 0)
    def _accum():
        acc_ref[...] += part

    @pl.when(k == pl.num_programs(1) - 1)
    def _epilogue():
        h = acc_ref[...]

        # ---- BatchNorm1d (batch statistics, biased variance), single pass.
        # b1 is omitted: a pre-BN bias is exactly cancelled by the
        # shift-invariant batch statistics.
        inv_b = 1.0 / h.shape[0]
        mean = jnp.sum(h, axis=0, keepdims=True) * inv_b
        mean_sq = jnp.sum(h * h, axis=0, keepdims=True) * inv_b
        var = mean_sq - mean * mean
        h = (h - mean) * jax.lax.rsqrt(var + EPS)
        h = h * gamma_ref[...] + beta_ref[...]

        # ---- ReLU ----
        h = jnp.maximum(h, 0.0)

        # ---- Linear 2 (partial over this core's hidden slice):
        #      (B, hid_c) bf16 @ (hid_c, 128-padded) bf16 -> f32
        o_ref[...] = jnp.dot(h.astype(jnp.bfloat16), w2_ref[...],
                             preferred_element_type=jnp.float32)


def prepare_params(w1, b1, gamma, beta, w2, b2):
    """One-time weight preprocessing, hoisted out of the per-call hot path."""
    del b1  # exactly cancelled by BatchNorm batch statistics
    w2_p = (jnp.zeros((F_HID, N_PAD), jnp.bfloat16)
            .at[:, :F_OUT].set(w2.astype(jnp.bfloat16)))
    return dict(
        w1=w1.astype(jnp.bfloat16),                       # (F_IN, F_HID) bf16
        gamma=gamma.reshape(1, F_HID).astype(jnp.float32),
        beta=beta.reshape(1, F_HID).astype(jnp.float32),
        w2=w2_p,                                          # (F_HID, 128) bf16
        b2=b2.reshape(1, F_OUT).astype(jnp.float32),
    )


def num_tensorcores():
    """Best-effort TensorCores-per-chip detection (2 on v7x, else 1)."""
    try:
        kind = jax.devices()[0].device_kind.lower()
    except Exception:
        return 1
    return 2 if "v7" in kind else 1


@functools.partial(jax.jit, static_argnames=("hid_split",))
def rot_classifier(x, params, *, hid_split=1):
    B, K = x.shape
    assert K == F_IN and K % TK == 0
    assert F_HID % hid_split == 0
    hid_c = F_HID // hid_split

    partials = pl.pallas_call(
        rot_classifier_kernel,
        out_shape=jax.ShapeDtypeStruct((hid_split, B, N_PAD), jnp.float32),
        grid_spec=pltpu.PrefetchScalarGridSpec(
            num_scalar_prefetch=0,
            grid=(hid_split, K // TK),
            in_specs=[
                pl.BlockSpec((B, TK), lambda c, k: (0, k)),         # x (f32)
                pl.BlockSpec((TK, hid_c), lambda c, k: (k, c)),     # w1 (bf16)
                pl.BlockSpec((1, hid_c), lambda c, k: (0, c)),      # gamma
                pl.BlockSpec((1, hid_c), lambda c, k: (0, c)),      # beta
                pl.BlockSpec((hid_c, N_PAD), lambda c, k: (c, 0)),  # w2 (bf16)
            ],
            out_specs=pl.BlockSpec((None, B, N_PAD), lambda c, k: (c, 0, 0)),
            scratch_shapes=[pltpu.VMEM((B, hid_c), jnp.float32)],
        ),
        compiler_params=pltpu.CompilerParams(
            dimension_semantics=("parallel", "arbitrary"),
            vmem_limit_bytes=16 * 1024 * 1024,
        ),
    )(x, params["w1"], params["gamma"], params["beta"], params["w2"])

    # Sum per-core partial head outputs (exact split of the hidden
    # contraction), un-pad to 4 classes and add the head bias.
    return jnp.sum(partials, axis=0)[:, :F_OUT] + params["b2"]


def reference(x, w1, b1, gamma, beta, w2, b2, bf16=False):
    if bf16:
        h = jnp.dot(x.astype(jnp.bfloat16), w1.astype(jnp.bfloat16),
                    preferred_element_type=jnp.float32) + b1
    else:
        h = x @ w1 + b1
    mean = h.mean(0, keepdims=True)
    var = ((h - mean) ** 2).mean(0, keepdims=True)
    h = (h - mean) / jnp.sqrt(var + EPS) * gamma + beta
    h = jnp.maximum(h, 0.0)
    if bf16:
        return jnp.dot(h.astype(jnp.bfloat16), w2.astype(jnp.bfloat16),
                       preferred_element_type=jnp.float32) + b2
    return h @ w2 + b2


if __name__ == "__main__":
    key = jax.random.PRNGKey(0)
    k_x, k_w1, k_b1, k_w2, k_b2 = jax.random.split(key, 5)

    B = 8  # small batch; BatchNorm1d needs B > 1

    # Deterministic synthetic parameters (PyTorch-style uniform scaling).
    x = jax.random.normal(k_x, (B, F_IN), dtype=jnp.float32)
    lim1 = 1.0 / jnp.sqrt(F_IN)
    w1 = jax.random.uniform(k_w1, (F_IN, F_HID), jnp.float32, -lim1, lim1)
    b1 = jax.random.uniform(k_b1, (1, F_HID), jnp.float32, -lim1, lim1)
    gamma = jnp.ones((1, F_HID), jnp.float32)   # BatchNorm1d default init
    beta = jnp.zeros((1, F_HID), jnp.float32)
    lim2 = 1.0 / jnp.sqrt(F_HID)
    w2 = jax.random.uniform(k_w2, (F_HID, F_OUT), jnp.float32, -lim2, lim2)
    b2 = jax.random.uniform(k_b2, (1, F_OUT), jnp.float32, -lim2, lim2)

    params = prepare_params(w1, b1, gamma, beta, w2, b2)   # one-time
    hid_split = num_tensorcores()                          # 2 on v7x, else 1

    out = jax.block_until_ready(rot_classifier(x, params, hid_split=hid_split))
    assert out.shape == (B, F_OUT)

    # Tight check against a bf16-matmul reference (mirrors kernel numerics).
    ref16 = reference(x, w1, b1, gamma, beta, w2, b2, bf16=True)
    assert jnp.allclose(out, ref16, atol=5e-3, rtol=5e-3), \
        float(jnp.max(jnp.abs(out - ref16)))

    # Looser check against the full-f32 PyTorch-equivalent reference
    # (tolerance relaxed because x/w1/h/w2 travel through bf16 on the MXU).
    ref32 = reference(x, w1, b1, gamma, beta, w2, b2, bf16=False)
    assert jnp.allclose(out, ref32, atol=5e-2, rtol=5e-2), \
        float(jnp.max(jnp.abs(out - ref32)))

    print("KERNEL_OK")
</pallas_src>

<mosaic_0001>
module attributes {stable_mosaic.version = 11 : i64} {
  func.func @rot_classifier_kernel(%arg0: i32, %arg1: i32, %arg2: memref<8x2048xf32, #tpu.memory_space<vmem>>, %arg3: memref<2048x1024xbf16, #tpu.memory_space<vmem>>, %arg4: memref<1x1024xf32, #tpu.memory_space<vmem>>, %arg5: memref<1x1024xf32, #tpu.memory_space<vmem>>, %arg6: memref<1024x128xbf16, #tpu.memory_space<vmem>>, %arg7: memref<1x8x128xf32, #tpu.memory_space<vmem>>, %arg8: memref<8x1024xf32, #tpu.memory_space<vmem>>) attributes {dimension_semantics = [#tpu.dimension_semantics<parallel>, #tpu.dimension_semantics<arbitrary>], iteration_bounds = array<i64: 1, 2>, scalar_prefetch = 0 : i64, scratch_operands = 1 : i64, tpu.core_type = #tpu.core_type<tc>, window_params = [{transform_indices = @transform_0, window_bounds = array<i64: 8, 2048>}, {transform_indices = @transform_1, window_bounds = array<i64: 2048, 1024>}, {transform_indices = @transform_2, window_bounds = array<i64: 1, 1024>}, {transform_indices = @transform_3, window_bounds = array<i64: 1, 1024>}, {transform_indices = @transform_4, window_bounds = array<i64: 1024, 128>}, {transform_indices = @transform_5, window_bounds = array<i64: 1, 8, 128>}]} {
    %c0 = arith.constant 0 : index
    %c0_0 = arith.constant 0 : index
    %0 = vector.load %arg2[%c0, %c0_0] : memref<8x2048xf32, #tpu.memory_space<vmem>>, vector<8x2048xf32>
    %1 = arith.truncf %0 : vector<8x2048xf32> to vector<8x2048xbf16>
    %c0_1 = arith.constant 0 : index
    %c0_2 = arith.constant 0 : index
    %2 = vector.load %arg3[%c0_1, %c0_2] : memref<2048x1024xbf16, #tpu.memory_space<vmem>>, vector<2048x1024xbf16>
    %cst = arith.constant dense<0.000000e+00> : vector<8x1024xf32>
    %3 = tpu.matmul %1, %2, %cst {dimension_numbers = #tpu.dot_dimension_numbers<[1], [0], [0], [1], [0, 0, 1, 1], [], []>} : vector<8x2048xbf16>, vector<2048x1024xbf16>, vector<8x1024xf32> -> vector<8x1024xf32>
    %c0_i32 = arith.constant 0 : i32
    %4 = arith.cmpi eq, %arg1, %c0_i32 : i32
    %5 = arith.extui %4 : i1 to i32
    %c0_i32_3 = arith.constant 0 : i32
    %6 = arith.cmpi ne, %5, %c0_i32_3 : i32
    scf.if %6 {
      %c0_7 = arith.constant 0 : index
      %c0_8 = arith.constant 0 : index
      %13 = vector.load %arg8[%c0_7, %c0_8] : memref<8x1024xf32, #tpu.memory_space<vmem>>, vector<8x1024xf32>
      tpu.vector_store %arg8[%c0_7, %c0_8], %3 {strides = array<i32>} : memref<8x1024xf32, #tpu.memory_space<vmem>>, vector<8x1024xf32>,
    } else {
    }
    %c0_i32_4 = arith.constant 0 : i32
    %7 = arith.cmpi sgt, %arg1, %c0_i32_4 : i32
    %8 = arith.extui %7 : i1 to i32
    %c0_i32_5 = arith.constant 0 : i32
    %9 = arith.cmpi ne, %8, %c0_i32_5 : i32
    scf.if %9 {
      %c0_7 = arith.constant 0 : index
      %c0_8 = arith.constant 0 : index
      %13 = vector.load %arg8[%c0_7, %c0_8] : memref<8x1024xf32, #tpu.memory_space<vmem>>, vector<8x1024xf32>
      %14 = arith.addf %13, %3 : vector<8x1024xf32>
      %c0_9 = arith.constant 0 : index
      %c0_10 = arith.constant 0 : index
      %15 = vector.load %arg8[%c0_9, %c0_10] : memref<8x1024xf32, #tpu.memory_space<vmem>>, vector<8x1024xf32>
      tpu.vector_store %arg8[%c0_9, %c0_10], %14 {strides = array<i32>} : memref<8x1024xf32, #tpu.memory_space<vmem>>, vector<8x1024xf32>,
    } else {
    }
    %c1_i32 = arith.constant 1 : i32
    %10 = arith.cmpi eq, %arg1, %c1_i32 : i32
    %11 = arith.extui %10 : i1 to i32
    %c0_i32_6 = arith.constant 0 : i32
    %12 = arith.cmpi ne, %11, %c0_i32_6 : i32
    scf.if %12 {
      %c0_7 = arith.constant 0 : index
      %c0_8 = arith.constant 0 : index
      %13 = vector.load %arg8[%c0_7, %c0_8] : memref<8x1024xf32, #tpu.memory_space<vmem>>, vector<8x1024xf32>
      %cst_9 = arith.constant dense<0.000000e+00> : vector<1024xf32>
      %14 = vector.multi_reduction <add>, %13, %cst_9 [0] : vector<8x1024xf32> to vector<1024xf32>
      %15 = vector.shape_cast %14 : vector<1024xf32> to vector<1x1024xf32>
      %cst_10 = arith.constant 1.250000e-01 : f32
      %16 = vector.broadcast %cst_10 : f32 to vector<1x1024xf32>
      %17 = arith.mulf %15, %16 : vector<1x1024xf32>
      %18 = arith.mulf %13, %13 : vector<8x1024xf32>
      %cst_11 = arith.constant dense<0.000000e+00> : vector<1024xf32>
      %19 = vector.multi_reduction <add>, %18, %cst_11 [0] : vector<8x1024xf32> to vector<1024xf32>
      %20 = vector.shape_cast %19 : vector<1024xf32> to vector<1x1024xf32>
      %cst_12 = arith.constant 1.250000e-01 : f32
      %21 = vector.broadcast %cst_12 : f32 to vector<1x1024xf32>
      %22 = arith.mulf %20, %21 : vector<1x1024xf32>
      %23 = arith.mulf %17, %17 : vector<1x1024xf32>
      %24 = arith.subf %22, %23 : vector<1x1024xf32>
      %25 = vector.broadcast %17 : vector<1x1024xf32> to vector<8x1024xf32>
      %26 = arith.subf %13, %25 : vector<8x1024xf32>
      %cst_13 = arith.constant 9.99999974E-6 : f32
      %27 = vector.broadcast %cst_13 : f32 to vector<1x1024xf32>
      %28 = arith.addf %24, %27 : vector<1x1024xf32>
      %29 = math.rsqrt %28 : vector<1x1024xf32>
      %30 = vector.broadcast %29 : vector<1x1024xf32> to vector<8x1024xf32>
      %31 = arith.mulf %26, %30 : vector<8x1024xf32>
      %c0_14 = arith.constant 0 : index
      %c0_15 = arith.constant 0 : index
      %32 = vector.load %arg4[%c0_14, %c0_15] : memref<1x1024xf32, #tpu.memory_space<vmem>>, vector<1x1024xf32>
      %33 = vector.broadcast %32 : vector<1x1024xf32> to vector<8x1024xf32>
      %34 = arith.mulf %31, %33 : vector<8x1024xf32>
      %c0_16 = arith.constant 0 : index
      %c0_17 = arith.constant 0 : index
      %35 = vector.load %arg5[%c0_16, %c0_17] : memref<1x1024xf32, #tpu.memory_space<vmem>>, vector<1x1024xf32>
      %36 = vector.broadcast %35 : vector<1x1024xf32> to vector<8x1024xf32>
      %37 = arith.addf %34, %36 : vector<8x1024xf32>
      %cst_18 = arith.constant 0.000000e+00 : f32
      %38 = vector.broadcast %cst_18 : f32 to vector<8x1024xf32>
      %39 = arith.maximumf %37, %38 : vector<8x1024xf32>
      %40 = arith.truncf %39 : vector<8x1024xf32> to vector<8x1024xbf16>
      %c0_19 = arith.constant 0 : index
      %c0_20 = arith.constant 0 : index
      %41 = vector.load %arg6[%c0_19, %c0_20] : memref<1024x128xbf16, #tpu.memory_space<vmem>>, vector<1024x128xbf16>
      %cst_21 = arith.constant dense<0.000000e+00> : vector<8x128xf32>
      %42 = tpu.matmul %40, %41, %cst_21 {dimension_numbers = #tpu.dot_dimension_numbers<[1], [0], [0], [1], [0, 0, 1, 1], [], []>} : vector<8x1024xbf16>, vector<1024x128xbf16>, vector<8x128xf32> -> vector<8x128xf32>
      %c0_22 = arith.constant 0 : index
      %c0_23 = arith.constant 0 : index
      %c0_24 = arith.constant 0 : index
      %43 = vector.load %arg7[%c0_22, %c0_23, %c0_24] : memref<1x8x128xf32, #tpu.memory_space<vmem>>, vector<1x8x128xf32>
      %44 = vector.shape_cast %43 : vector<1x8x128xf32> to vector<8x128xf32>
      %45 = vector.shape_cast %42 : vector<8x128xf32> to vector<1x8x128xf32>
      tpu.vector_store %arg7[%c0_22, %c0_23, %c0_24], %45 {strides = array<i32>} : memref<1x8x128xf32, #tpu.memory_space<vmem>>, vector<1x8x128xf32>,
    } else {
    }
    return
  }
  func.func @transform_0(%arg0: i32, %arg1: i32) -> (i32, i32) {
    %c0_i32 = arith.constant 0 : i32
    %c0_i32_0 = arith.constant 0 : i32
    return %c0_i32, %arg1 : i32, i32
  }
  func.func @transform_1(%arg0: i32, %arg1: i32) -> (i32, i32) {
    %c0_i32 = arith.constant 0 : i32
    return %arg1, %arg0 : i32, i32
  }
  func.func @transform_2(%arg0: i32, %arg1: i32) -> (i32, i32) {
    %c0_i32 = arith.constant 0 : i32
    %c0_i32_0 = arith.constant 0 : i32
    return %c0_i32, %arg0 : i32, i32
  }
  func.func @transform_3(%arg0: i32, %arg1: i32) -> (i32, i32) {
    %c0_i32 = arith.constant 0 : i32
    %c0_i32_0 = arith.constant 0 : i32
    return %c0_i32, %arg0 : i32, i32
  }
  func.func @transform_4(%arg0: i32, %arg1: i32) -> (i32, i32) {
    %c0_i32 = arith.constant 0 : i32
    %c0_i32_0 = arith.constant 0 : i32
    return %arg0, %c0_i32 : i32, i32
  }
  func.func @transform_5(%arg0: i32, %arg1: i32) -> (i32, i32, i32) {
    %c0_i32 = arith.constant 0 : i32
    %c0_i32_0 = arith.constant 0 : i32
    %c0_i32_1 = arith.constant 0 : i32
    return %arg0, %c0_i32, %c0_i32_0 : i32, i32, i32
  }
}

</mosaic_0001>

<bundles_post_ra>
// kernel: rot_classifier.1
= control target key start
LH: loop header
LB: loop body
LE: loop exit
PB: predicated region body
PF: predicated region fallthrough
CT: control target
= control target key end

     0   :  { %10 = vsyncpa [#allocation4], 0  ;;  %s12120_s0 = inlined_call_operand.hbm [shape: f32[8,4096], index: 0, kind: input, shape index: {}]   ;;  %s12121_s1 = inlined_call_operand.hbm [shape: bf16[4096,1024], index: 1, kind: input, shape index: {}]   ;;  %s12122_s2 = inlined_call_operand.hbm [shape: f32[1,1024], index: 2, kind: input, shape index: {}]   ;;  %s12123_s3 = inlined_call_operand.hbm [shape: f32[1,1024], index: 3, kind: input, shape index: {}]   ;;  %s12124_s4 = inlined_call_operand.hbm [shape: bf16[1024,128], index: 4, kind: input, shape index: {}]   ;;  %s12125_s5 = inlined_call_operand.vmem [shape: f32[1,8,128], index: 5, kind: output, shape index: {}]  }
   0x1   :  { %12 = vsyncpa [#allocation4 + $0x1], 0 }
   0x2   :  { %13 = vsyncpa [#allocation6], 0 }
   0x3   :  { %15 = vsyncpa [#allocation6 + $0x1], 0 }
   0x4   :  { %16 = vsyncpa [#allocation9], 0  ;;  %s10611_s18 = smov 0   ;;  %s10613_s19 = smov 0  }
   0x5   :  { %s10615_s20 = smov 0   ;;  %s10617_s21 = smov 0  }
   0x6   :  { %s10619_s22 = smov 0   ;;  %s10621_s23 = smov 0  }
   0x7 LB: > { %s12130_s24 = sadd.s32 4294967295, %s10570_s23   ;;  %p54_p0 = scmp.ne.s32.totalorder %s10554_s19, %s10550_s18  ;;  %s10570_s23 = sphi %s10621_s23, %s22_s23   ;;  %s10566_s22 = sphi %s10619_s22, %s12144_s22   ;;  %s10562_s21 = sphi %s10617_s21, %s12143_s21   ;;  %s10558_s20 = sphi %s10615_s20, %s12142_s20   ;;  %s10554_s19 = sphi %s10613_s19, %s12141_s19   ;;  %s10550_s18 = sphi %s10611_s18, %s12140_s18  }
   0x8   : > { %p10643_p1 = scmp.eq.s32.totalorder %s12130_s24, 0  ;;  %p8996_p2 = scmp.ge.s32.totalorder %s10570_s23, 1 }
   0x9   : > { %p197_p3 = scmp.lt.s32.totalorder %s10570_s23, 3  ;;  %s10572_s28 = smov [#allocation7]  }
   0xa   : > { %s12131_s25 = scalar_select %p10643_p1, 1, 0 }
   0xb   : > { %p10651_p4 = por %p10643_p1, %p54_p0  ;;  %p10655_p5 = pnand %p8996_p2, %p197_p3 }
   0xc   : > { %s213_s29 = sshll.u32 %s10572_s28, 4  ;;  %s10573_s30 = smov [#allocation8]   ;;  %s214_s29 = int_to_ptr.vmem [resolvable:$true] %s213_s29 }
   0xd   : > { %s12132_s26 = scalar_select %p10651_p4, 1, 0 }
   0xe   : > { %s12133_s27 = scalar_select %p10655_p5, 1, 0 }
   0xf   : > { %p10215_p6 = pneg %p10655_p5  ;;  %s227_s6 = sshll.u32 %s10573_s30, 4  ;;  %s228_s6 = int_to_ptr.vmem [resolvable:$true] %s227_s6 }
  0x10   : > { %s10574_s8 = smov [#allocation10]   ;;  %s10385_s10 = scalar_lea.vmem %s214_s29, 128 }
  0x11   : > { %p10663_p7 = pnand %p10215_p6, %p10643_p1  ;;  %s240_s9 = sshll.u32 %s10574_s8, 4  ;;  %s10667_s9 = int_to_ptr.vmem [resolvable:$true] %s240_s9 }
  0x12   : > { %p10386_p9 = scmp.ne.s32.totalorder %s214_s29, %s10385_s10  ;;  %p10393_p12 = scmp.lt.s32.totalorder %s214_s29, %s214_s29 }
  0x13   : > { %p10376_p8 = pneg %p10663_p7  ;;  %p10394_p13 = scmp.lt.s32.totalorder %s10385_s10, %s10385_s10 }
  0x15   : > { %p10388_p10 = pnand %p10386_p9, %p10376_p8  ;;  %p10395_p0 = por %p10394_p13, %p10393_p12 }
  0x17   : > { %p10389_p11 = pneg %p10388_p10 }
  0x19   : > { %p10396_p2 = pnand %p10395_p0, %p10389_p11 }
  0x1b   : > { %10399 = shalt.err (!%p10396_p2)
}
  0x1c   : > { %10218 = dma.hbm_to_vmem [thread:$0]  (!%p10663_p7), %s12122_s2, 128, %s214_s29, [#allocation6]  }
  0x1d   : > { %s10411_s13 = scalar_lea.vmem %s228_s6, 128  ;;  %p10419_p9 = scmp.lt.s32.totalorder %s228_s6, %s228_s6 }
  0x1e   : > { %p10412_p3 = scmp.ne.s32.totalorder %s228_s6, %s10411_s13  ;;  %p10420_p10 = scmp.lt.s32.totalorder %s10411_s13, %s10411_s13 }
  0x20   : > { %p10414_p6 = pnand %p10412_p3, %p10376_p8  ;;  %p10421_p4 = por %p10420_p10, %p10419_p9 }
  0x22   : > { %p10415_p1 = pneg %p10414_p6 }
  0x24   : > { %p10422_p5 = pnand %p10421_p4, %p10415_p1 }
  0x26   : > { %10425 = shalt.err (!%p10422_p5)
}
  0x27   : > { %10221 = dma.hbm_to_vmem [thread:$0]  (!%p10663_p7), %s12123_s3, 128, %s228_s6, [#allocation9]  }
  0x28   : > { %s10437_s16 = scalar_lea.vmem %s10667_s9, 8192  ;;  %p10445_p0 = scmp.lt.s32.totalorder %s10667_s9, %s10667_s9 }
  0x29   : > { %p10438_p11 = scmp.ne.s32.totalorder %s10667_s9, %s10437_s16  ;;  %p10446_p1 = scmp.lt.s32.totalorder %s10437_s16, %s10437_s16 }
  0x2b   : > { %p10440_p12 = pnand %p10438_p11, %p10376_p8  ;;  %p10447_p4 = por %p10446_p1, %p10445_p0 }
  0x2d   : > { %p10441_p13 = pneg %p10440_p12 }
  0x2f   : > { %p10448_p5 = pnand %p10447_p4, %p10441_p13 }
  0x31   : > { %10451 = shalt.err (!%p10448_p5)
}
  0x32   : > { %s10575_s17 = smov 64   ;;  %s10576_s18 = smov 4  }
  0x33   : > { %10224 = dma.hbm_to_vmem [thread:$0]  (!%p10663_p7), %s12124_s4, 8192, %s10667_s9, [#allocation9], %s10575_s17, %s10575_s17, %s10576_s18  }
  0x34   : > { %s41_s30 = sadd.s32 1, %s10558_s20  ;;  %s31_s6 = sadd.s32 1, %s10566_s22 }
  0x35   : > { %p48_p8 = scmp.ne.s32.totalorder %s10558_s20, %s10554_s19  ;;  %p32_p2 = scmp.ge.s32.totalorder %s31_s6, 2 }
  0x36   : > { %p49_p3 = scmp.eq.s32.totalorder %s10570_s23, 0  ;;  %p10235_p6 = scmp.lt.s32.totalorder %s10570_s23, 2 }
  0x37   : > { %s10707_s8 = sand.u32 1, %s10558_s20   ;;  %s12146_s6 = smov (%p32_p2, %s31_s6), 0 }
  0x38   : > { %p50_p9 = por %p49_p3, %p48_p8  ;;  %s38_s7 = ssub.s32 %s10566_s22, %s12146_s6 }
  0x39   : > { %s9001_s9 = sshll.u32 %s10707_s8, 7  ;;  %p39_p7 = scmp.eq.s32.totalorder %s38_s7, 0 }
  0x3a   : > { %s10108_s10 = sshll.u32 %s10566_s22, 11  ;;  %s258_s11 = scalar_lea.vmem [#allocation3], %s9001_s9 }
  0x3b   : > { %s266_s12 = sshll.u32 %s258_s11, 4  ;;  %s264_s16 = scalar_lea.hbm %s12120_s0, %s10108_s10  ;;  %s267_s12 = int_to_ptr.vmem [resolvable:$true] %s266_s12 }
  0x3c   : > { %s10716_s13 = scalar_select %p39_p7, %s10558_s20, %s41_s30  }
  0x3d   : > { %p10723_p10 = pnand %p10235_p6, %p50_p9  ;;  %s9004_s18 = sshll.u32 %s10707_s8, 13 }
  0x3e   : > { %s10110_s28 = sshll.u32 %s10566_s22, 17  ;;  %s277_s29 = scalar_lea.vmem [#allocation5], %s9004_s18 }
  0x3f   : > { %s287_s7 = sshll.u32 %s277_s29, 4  ;;  %s255_s9 = scalar_lea.sflag [#allocation4], %s10707_s8  ;;  %s288_s7 = int_to_ptr.vmem [resolvable:$true] %s287_s7 }
  0x40   : > { %p10454_p11 = pneg %p10723_p10  ;;  %s10465_s30 = scalar_lea.vmem %s267_s12, 2048 }
  0x41   : > { %p10466_p12 = scmp.ne.s32.totalorder %s267_s12, %s10465_s30  ;;  %s10577_s10 = smov [#allocation3]  }
  0x42   : > { %s10470_s11 = sshll.u32 %s10577_s10, 4  ;;  %s10471_s11 = int_to_ptr.vmem [resolvable:$false] %s10470_s11 }
  0x43   : > { %p10468_p13 = pnand %p10466_p12, %p10454_p11  ;;  %s10472_s14 = scalar_lea.vmem %s10471_s11, 4096 }
  0x44   : > { %p10473_p1 = scmp.lt.s32.totalorder %s267_s12, %s10471_s11  ;;  %p10474_p4 = scmp.lt.s32.totalorder %s10472_s14, %s10465_s30 }
  0x45   : > { %p10469_p0 = pneg %p10468_p13 }
  0x46   : > { %p10475_p5 = por %p10474_p4, %p10473_p1 }
  0x48   : > { %p10476_p8 = pnand %p10475_p5, %p10469_p0 }
  0x4a   : > { %10479 = shalt.err (!%p10476_p8)
}
  0x4b   : > { %10228 = dma.hbm_to_vmem [thread:$0]  (!%p10723_p10), %s264_s16, 2048, %s267_s12, %s255_s9  }
  0x4c   : > { %s273_s8 = sand.u32 1, %s10570_s23   ;;  %s286_s29 = scalar_lea.hbm %s12121_s1, %s10110_s28 }
  0x4d   : > { %s274_s24 = scalar_lea.sflag [#allocation6], %s273_s8  ;;  %s10493_s10 = scalar_lea.vmem %s288_s7, 131072 }
  0x4e   : > { %p10494_p2 = scmp.ne.s32.totalorder %s288_s7, %s10493_s10  ;;  %s10578_s30 = smov [#allocation5]  }
  0x4f   : > { %s10498_s11 = sshll.u32 %s10578_s30, 4  ;;  %s10499_s11 = int_to_ptr.vmem [resolvable:$false] %s10498_s11 }
  0x50   : > { %p10496_p3 = pnand %p10494_p2, %p10454_p11  ;;  %s10500_s14 = scalar_lea.vmem %s10499_s11, 262144 }
  0x51   : > { %p10501_p9 = scmp.lt.s32.totalorder %s288_s7, %s10499_s11  ;;  %p10502_p7 = scmp.lt.s32.totalorder %s10500_s14, %s10493_s10 }
  0x52   : > { %p10497_p6 = pneg %p10496_p3 }
  0x53   : > { %p10503_p12 = por %p10502_p7, %p10501_p9 }
  0x55   : > { %p10504_p13 = pnand %p10503_p12, %p10497_p6 }
  0x57   : > { %10507 = shalt.err (!%p10504_p13)
}
  0x58   : > { %s10579_s12 = smov 512   ;;  %s10580_s16 = smov 32  }
  0x59   : > { %10231 = dma.hbm_to_vmem [thread:$0]  (!%p10723_p10), %s286_s29, 131072, %s288_s7, %s274_s24, %s10579_s12, %s10579_s12, %s10580_s16  }
  0x5a   : > { %p12136_p0 = scmp.ne.s32.totalorder %s12133_s27, 0 }
  0x5b   : > { %s301_s28 = sand.u32 (!%p12136_p0), 1, %s10554_s19   ;;  %p12137_p11 = scmp.ne.s32.totalorder (!%p12136_p0), %s12132_s26, 0 }
  0x5c   : > { %299 = sbr.rel (%p12136_p0) target bundleno = 1667 (0x683), region = 40  ;;  %s9009_s9 = sshll.u32 (!%p12136_p0), %s301_s28, 7 }
  0x5d   : > { %s302_s8 = scalar_lea.sflag (!%p12136_p0), [#allocation4], %s301_s28  ;;  %s10749_s15 = scalar_lea.vmem (!%p12136_p0), [#allocation3], %s9009_s9 }
  0x61   : > { %10533 = dma.done.wait (%p12137_p11), %s302_s8, 2048  }
  0x62   : > { %10535 = vsyncadd (%p12137_p11), %s302_s8, 4294965248  ;;  %s12138_s18 = sadd.s32 4294967295, %s10570_s23   ;;  %s9010_s24 = sshll.u32 %s301_s28, 13 }
  0x63   : > { %s310_s17 = sand.u32 1, %s12138_s18   ;;  %s10757_s27 = scalar_lea.vmem [#allocation5], %s9010_s24 }
  0x64   : > { %s311_s7 = scalar_lea.sflag [#allocation6], %s310_s17 }
  0x65   : > { %10537 = dma.done.wait (%p12137_p11), %s311_s7, 131072  }
  0x66   : > { %10539 = vsyncadd (%p12137_p11), %s311_s7, 4294836224  ;;  %p12139_p10 = scmp.ne.s32.totalorder %s12131_s25, 0 }
  0x68   : > { %10541 = dma.done.wait (%p12139_p10), [#allocation6], 128  }
  0x69   : > { %10543 = vsyncadd (%p12139_p10), [#allocation6], 4294967168 }
  0x6a   : > { %10545 = dma.done.wait (%p12139_p10), [#allocation9], 8320  }
  0x6b   : > { %10547 = vsyncadd (%p12139_p10), [#allocation9], 4294958976  ;;  %v456_v0 = vld [vmem:[%s10757_s27 + $0x1c0] sm:$0xff]  ;;  %v369_v53 = vld [vmem:[%s10749_s15 + $0x8] sm:$0xff]  ;;  %p10038_p1 = scmp.ne.s32.totalorder %s10562_s21, 0 }
  0x6c   : > { %v460_v1 = vld [vmem:[%s10757_s27 + $0x1e0] sm:$0xff]  ;;  %v371_v54 = vld [vmem:[%s10749_s15 + $0x18] sm:$0xff]  ;;  %v10803_v58 = vpack.c.bf16 %v369_v53, %v369_v53 }
  0x6d   : > { %v584_v2 = vld [vmem:[%s10757_s27 + $0x5c0] sm:$0xff]  ;;  %v9071_v3 = vcombine.high %v456_v0, %v460_v1  ;;  %v9070_v5 = vcombine.low %v456_v0, %v460_v1  ;;  %v10805_v59 = vpack.c.bf16 %v371_v54, %v371_v54 }
  0x6e   : > { %v588_v4 = vld [vmem:[%s10757_s27 + $0x5e0] sm:$0xff]  ;;  %6576 = vmatprep.mubr.bf16.mxu0 %v10803_v58 }
  0x6f   : > { %v448_v6 = vld [vmem:[%s10757_s27 + $0x180] sm:$0xff]  ;;  %v9199_v8 = vcombine.high %v584_v2, %v588_v4  ;;  %v9198_v9 = vcombine.low %v584_v2, %v588_v4  ;;  %6544 = vmatprep.subr.bf16.mxu0 %v9071_v3  ;;  %6617 = vmatprep.mubr.bf16.mxu1 %v10805_v59 }
  0x70   : > { %v452_v7 = vld [vmem:[%s10757_s27 + $0x1a0] sm:$0xff]  ;;  %6545 = vmatpush1.bf16.msra.mxu0 %v9070_v5 }
  0x71   : > { %v9063_v10 = vcombine.high %v448_v6, %v452_v7  ;;  %v576_v11 = vld [vmem:[%s10757_s27 + $0x580] sm:$0xff]  ;;  %6585 = vmatprep.subr.bf16.mxu1 %v9199_v8  ;;  %v9062_v18 = vcombine.low %v448_v6, %v452_v7 }
  0x72   : > { %v580_v12 = vld [vmem:[%s10757_s27 + $0x5a0] sm:$0xff]  ;;  %6586 = vmatpush1.bf16.msra.mxu1 %v9198_v9 }
  0x73   : > { %v440_v13 = vld [vmem:[%s10757_s27 + $0x140] sm:$0xff]  ;;  %v9191_v14 = vcombine.high %v576_v11, %v580_v12  ;;  %6546 = vmatprep.subr.bf16.mxu0 %v9063_v10  ;;  %v9190_v19 = vcombine.low %v576_v11, %v580_v12 }
  0x74   : > { %v444_v15 = vld [vmem:[%s10757_s27 + $0x160] sm:$0xff]  ;;  %6547 = vmatpush1.bf16.msra.mxu0 %v9062_v18 }
  0x75   : > { %v568_v16 = vld [vmem:[%s10757_s27 + $0x540] sm:$0xff]  ;;  %v9055_v20 = vcombine.high %v440_v13, %v444_v15  ;;  %6587 = vmatprep.subr.bf16.mxu1 %v9191_v14  ;;  %v9054_v26 = vcombine.low %v440_v13, %v444_v15 }
  0x76   : > { %v572_v17 = vld [vmem:[%s10757_s27 + $0x560] sm:$0xff]  ;;  %6588 = vmatpush1.bf16.msra.mxu1 %v9190_v19 }
  0x77   : > { %v9183_v21 = vcombine.high %v568_v16, %v572_v17  ;;  %v432_v22 = vld [vmem:[%s10757_s27 + $0x100] sm:$0xff]  ;;  %6548 = vmatprep.subr.bf16.mxu0 %v9055_v20  ;;  %v9182_v27 = vcombine.low %v568_v16, %v572_v17 }
  0x78   : > { %v436_v23 = vld [vmem:[%s10757_s27 + $0x120] sm:$0xff]  ;;  %6549 = vmatpush1.bf16.msra.mxu0 %v9054_v26 }
  0x79   : > { %v560_v24 = vld [vmem:[%s10757_s27 + $0x500] sm:$0xff]  ;;  %v9047_v28 = vcombine.high %v432_v22, %v436_v23  ;;  %6589 = vmatprep.subr.bf16.mxu1 %v9183_v21  ;;  %v9046_v34 = vcombine.low %v432_v22, %v436_v23 }
  0x7a   : > { %v564_v25 = vld [vmem:[%s10757_s27 + $0x520] sm:$0xff]  ;;  %6590 = vmatpush1.bf16.msra.mxu1 %v9182_v27 }
  0x7b   : > { %v9175_v29 = vcombine.high %v560_v24, %v564_v25  ;;  %v424_v30 = vld [vmem:[%s10757_s27 + $0xc0] sm:$0xff]  ;;  %6550 = vmatprep.subr.bf16.mxu0 %v9047_v28  ;;  %v9174_v35 = vcombine.low %v560_v24, %v564_v25 }
  0x7c   : > { %v428_v31 = vld [vmem:[%s10757_s27 + $0xe0] sm:$0xff]  ;;  %6551 = vmatpush1.bf16.msra.mxu0 %v9046_v34 }
  0x7d   : > { %v552_v32 = vld [vmem:[%s10757_s27 + $0x4c0] sm:$0xff]  ;;  %v9039_v36 = vcombine.high %v424_v30, %v428_v31  ;;  %6591 = vmatprep.subr.bf16.mxu1 %v9175_v29  ;;  %v9038_v42 = vcombine.low %v424_v30, %v428_v31 }
  0x7e   : > { %v556_v33 = vld [vmem:[%s10757_s27 + $0x4e0] sm:$0xff]  ;;  %6592 = vmatpush1.bf16.msra.mxu1 %v9174_v35 }
  0x7f   : > { %v9167_v37 = vcombine.high %v552_v32, %v556_v33  ;;  %v416_v38 = vld [vmem:[%s10757_s27 + $0x80] sm:$0xff]  ;;  %6552 = vmatprep.subr.bf16.mxu0 %v9039_v36  ;;  %v9166_v43 = vcombine.low %v552_v32, %v556_v33 }
  0x80   : > { %v420_v39 = vld [vmem:[%s10757_s27 + $0xa0] sm:$0xff]  ;;  %6553 = vmatpush1.bf16.msra.mxu0 %v9038_v42 }
  0x81   : > { %v544_v40 = vld [vmem:[%s10757_s27 + $0x480] sm:$0xff]  ;;  %v9031_v44 = vcombine.high %v416_v38, %v420_v39  ;;  %6593 = vmatprep.subr.bf16.mxu1 %v9167_v37  ;;  %v9030_v50 = vcombine.low %v416_v38, %v420_v39 }
  0x82   : > { %v548_v41 = vld [vmem:[%s10757_s27 + $0x4a0] sm:$0xff]  ;;  %6594 = vmatpush1.bf16.msra.mxu1 %v9166_v43 }
  0x83   : > { %v9159_v45 = vcombine.high %v544_v40, %v548_v41  ;;  %v408_v46 = vld [vmem:[%s10757_s27 + $0x40] sm:$0xff]  ;;  %6554 = vmatprep.subr.bf16.mxu0 %v9031_v44  ;;  %v9158_v51 = vcombine.low %v544_v40, %v548_v41 }
  0x84   : > { %v412_v47 = vld [vmem:[%s10757_s27 + $0x60] sm:$0xff]  ;;  %6555 = vmatpush1.bf16.msra.mxu0 %v9030_v50 }
  0x85   : > { %v536_v48 = vld [vmem:[%s10757_s27 + $0x440] sm:$0xff]  ;;  %v9023_v52 = vcombine.high %v408_v46, %v412_v47  ;;  %6595 = vmatprep.subr.bf16.mxu1 %v9159_v45  ;;  %v9022_v62 = vcombine.low %v408_v46, %v412_v47 }
  0x86   : > { %v540_v49 = vld [vmem:[%s10757_s27 + $0x460] sm:$0xff]  ;;  %6596 = vmatpush1.bf16.msra.mxu1 %v9158_v51 }
  0x87   : > { %v9151_v55 = vcombine.high %v536_v48, %v540_v49  ;;  %v400_v56 = vld [vmem:[%s10757_s27] sm:$0xff]  ;;  %6556 = vmatprep.subr.bf16.mxu0 %v9023_v52  ;;  %v9150_v63 = vcombine.low %v536_v48, %v540_v49 }
  0x88   : > { %v404_v57 = vld [vmem:[%s10757_s27 + $0x20] sm:$0xff]  ;;  %6557 = vmatpush1.bf16.msra.mxu0 %v9022_v62 }
  0x89   : > { %v528_v60 = vld [vmem:[%s10757_s27 + $0x400] sm:$0xff]  ;;  %v9015_v0 = vcombine.high %v400_v56, %v404_v57  ;;  %6597 = vmatprep.subr.bf16.mxu1 %v9151_v55  ;;  %v9014_v6 = vcombine.low %v400_v56, %v404_v57 }
  0x8a   : > { %v532_v61 = vld [vmem:[%s10757_s27 + $0x420] sm:$0xff]  ;;  %6598 = vmatpush1.bf16.msra.mxu1 %v9150_v63 }
  0x8b   : > { %v9143_v1 = vcombine.high %v528_v60, %v532_v61  ;;  %v520_v2 = vld [vmem:[%s10757_s27 + $0x3c0] sm:$0xff]  ;;  %6558 = vmatprep.subr.bf16.mxu0 %v9015_v0  ;;  %v9142_v7 = vcombine.low %v528_v60, %v532_v61 }
  0x8c   : > { %v524_v3 = vld [vmem:[%s10757_s27 + $0x3e0] sm:$0xff]  ;;  %6559 = vmatpush1.bf16.msra.mxu0 %v9014_v6 }
  0x8d   : > { %v648_v4 = vld [vmem:[%s10757_s27 + $0x7c0] sm:$0xff]  ;;  %v9135_v8 = vcombine.high %v520_v2, %v524_v3  ;;  %6599 = vmatprep.subr.bf16.mxu1 %v9143_v1  ;;  %v9134_v14 = vcombine.low %v520_v2, %v524_v3 }
  0x8e   : > { %v652_v5 = vld [vmem:[%s10757_s27 + $0x7e0] sm:$0xff]  ;;  %6600 = vmatpush1.bf16.msra.mxu1 %v9142_v7 }
  0x8f   : > { %v9263_v9 = vcombine.high %v648_v4, %v652_v5  ;;  %v512_v10 = vld [vmem:[%s10757_s27 + $0x380] sm:$0xff]  ;;  %6560 = vmatprep.subr.bf16.mxu0 %v9135_v8  ;;  %v9262_v15 = vcombine.low %v648_v4, %v652_v5 }
  0x90   : > { %v516_v11 = vld [vmem:[%s10757_s27 + $0x3a0] sm:$0xff]  ;;  %6561 = vmatpush2.bf16.msra.mxu0 %v9134_v14 }
  0x91   : > { %v640_v12 = vld [vmem:[%s10757_s27 + $0x780] sm:$0xff]  ;;  %v9127_v16 = vcombine.high %v512_v10, %v516_v11  ;;  %6601 = vmatprep.subr.bf16.mxu1 %v9263_v9  ;;  %v9126_v22 = vcombine.low %v512_v10, %v516_v11  ;;  %v370_v11 = vld [vmem:[%s10749_s15 + $0x10] sm:$0xff] }
  0x92   : > { %v644_v13 = vld [vmem:[%s10757_s27 + $0x7a0] sm:$0xff]  ;;  %6602 = vmatpush2.bf16.msra.mxu1 %v9262_v15 }
  0x93   : > { %v9255_v17 = vcombine.high %v640_v12, %v644_v13  ;;  %v504_v18 = vld [vmem:[%s10757_s27 + $0x340] sm:$0xff]  ;;  %6562 = vmatprep.subr.bf16.mxu0 %v9127_v16  ;;  %v9254_v23 = vcombine.low %v640_v12, %v644_v13 }
  0x94   : > { %v508_v19 = vld [vmem:[%s10757_s27 + $0x360] sm:$0xff]  ;;  %6563 = vmatpush2.bf16.msra.mxu0 %v9126_v22  ;;  %v375_v22 = vld [vmem:[%s10749_s15 + $0x38] sm:$0xff] }
  0x95   : > { %v632_v20 = vld [vmem:[%s10757_s27 + $0x740] sm:$0xff]  ;;  %v9119_v24 = vcombine.high %v504_v18, %v508_v19  ;;  %6603 = vmatprep.subr.bf16.mxu1 %v9255_v17  ;;  %v9118_v30 = vcombine.low %v504_v18, %v508_v19  ;;  %v373_v19 = vld [vmem:[%s10749_s15 + $0x28] sm:$0xff] }
  0x96   : > { %v636_v21 = vld [vmem:[%s10757_s27 + $0x760] sm:$0xff]  ;;  %6604 = vmatpush2.bf16.msra.mxu1 %v9254_v23 }
  0x97   : > { %v9247_v25 = vcombine.high %v632_v20, %v636_v21  ;;  %v496_v26 = vld [vmem:[%s10757_s27 + $0x300] sm:$0xff]  ;;  %6564 = vmatprep.subr.bf16.mxu0 %v9119_v24  ;;  %v9246_v31 = vcombine.low %v632_v20, %v636_v21  ;;  %v10856_v20 = vpack.c.bf16 %v370_v11, %v370_v11 }
  0x98   : > { %v500_v27 = vld [vmem:[%s10757_s27 + $0x320] sm:$0xff]  ;;  %6565 = vmatpush2.bf16.msra.mxu0 %v9118_v30 }
  0x99   : > { %v624_v28 = vld [vmem:[%s10757_s27 + $0x700] sm:$0xff]  ;;  %v9111_v32 = vcombine.high %v496_v26, %v500_v27  ;;  %6605 = vmatprep.subr.bf16.mxu1 %v9247_v25  ;;  %v9110_v38 = vcombine.low %v496_v26, %v500_v27 }
  0x9a   : > { %v628_v29 = vld [vmem:[%s10757_s27 + $0x720] sm:$0xff]  ;;  %6606 = vmatpush2.bf16.msra.mxu1 %v9246_v31  ;;  %v10866_v31 = vpack.c.bf16 %v375_v22, %v375_v22 }
  0x9b   : > { %v9239_v33 = vcombine.high %v624_v28, %v628_v29  ;;  %v488_v34 = vld [vmem:[%s10757_s27 + $0x2c0] sm:$0xff]  ;;  %6566 = vmatprep.subr.bf16.mxu0 %v9111_v32  ;;  %v9238_v39 = vcombine.low %v624_v28, %v628_v29  ;;  %v10861_v28 = vpack.c.bf16 %v373_v19, %v373_v19 }
  0x9c   : > { %v492_v35 = vld [vmem:[%s10757_s27 + $0x2e0] sm:$0xff]  ;;  %6567 = vmatpush2.bf16.msra.mxu0 %v9110_v38 }
  0x9d   : > { %v616_v36 = vld [vmem:[%s10757_s27 + $0x6c0] sm:$0xff]  ;;  %v9103_v40 = vcombine.high %v488_v34, %v492_v35  ;;  %6607 = vmatprep.subr.bf16.mxu1 %v9239_v33  ;;  %v9102_v46 = vcombine.low %v488_v34, %v492_v35 }
  0x9e   : > { %v620_v37 = vld [vmem:[%s10757_s27 + $0x6e0] sm:$0xff]  ;;  %6608 = vmatpush2.bf16.msra.mxu1 %v9238_v39 }
  0x9f   : > { %v9231_v41 = vcombine.high %v616_v36, %v620_v37  ;;  %v480_v42 = vld [vmem:[%s10757_s27 + $0x280] sm:$0xff]  ;;  %6568 = vmatprep.subr.bf16.mxu0 %v9103_v40  ;;  %v9230_v47 = vcombine.low %v616_v36, %v620_v37 }
  0xa0   : > { %v484_v43 = vld [vmem:[%s10757_s27 + $0x2a0] sm:$0xff]  ;;  %6569 = vmatpush2.bf16.msra.mxu0 %v9102_v46 }
  0xa1   : > { %v608_v44 = vld [vmem:[%s10757_s27 + $0x680] sm:$0xff]  ;;  %v9095_v48 = vcombine.high %v480_v42, %v484_v43  ;;  %6609 = vmatprep.subr.bf16.mxu1 %v9231_v41  ;;  %v9094_v54 = vcombine.low %v480_v42, %v484_v43 }
  0xa2   : > { %v612_v45 = vld [vmem:[%s10757_s27 + $0x6a0] sm:$0xff]  ;;  %6610 = vmatpush2.bf16.msra.mxu1 %v9230_v47 }
  0xa3   : > { %v9223_v49 = vcombine.high %v608_v44, %v612_v45  ;;  %v472_v50 = vld [vmem:[%s10757_s27 + $0x240] sm:$0xff]  ;;  %6570 = vmatprep.subr.bf16.mxu0 %v9095_v48  ;;  %v9222_v55 = vcombine.low %v608_v44, %v612_v45 }
  0xa4   : > { %v476_v51 = vld [vmem:[%s10757_s27 + $0x260] sm:$0xff]  ;;  %6571 = vmatpush2.bf16.msra.mxu0 %v9094_v54 }
  0xa5   : > { %v600_v52 = vld [vmem:[%s10757_s27 + $0x640] sm:$0xff]  ;;  %v9087_v56 = vcombine.high %v472_v50, %v476_v51  ;;  %6611 = vmatprep.subr.bf16.mxu1 %v9223_v49  ;;  %v9086_v0 = vcombine.low %v472_v50, %v476_v51 }
  0xa6   : > { %v604_v53 = vld [vmem:[%s10757_s27 + $0x660] sm:$0xff]  ;;  %6612 = vmatpush2.bf16.msra.mxu1 %v9222_v55 }
  0xa7   : > { %v9215_v57 = vcombine.high %v600_v52, %v604_v53  ;;  %v464_v60 = vld [vmem:[%s10757_s27 + $0x200] sm:$0xff]  ;;  %6572 = vmatprep.subr.bf16.mxu0 %v9087_v56  ;;  %v9214_v1 = vcombine.low %v600_v52, %v604_v53 }
  0xa8   : > { %v468_v61 = vld [vmem:[%s10757_s27 + $0x220] sm:$0xff]  ;;  %6573 = vmatpush2.bf16.msra.mxu0 %v9086_v0 }
  0xa9   : > { %v592_v62 = vld [vmem:[%s10757_s27 + $0x600] sm:$0xff]  ;;  %v9079_v2 = vcombine.high %v464_v60, %v468_v61  ;;  %6613 = vmatprep.subr.bf16.mxu1 %v9215_v57  ;;  %v9078_v8 = vcombine.low %v464_v60, %v468_v61 }
  0xaa   : > { %v596_v63 = vld [vmem:[%s10757_s27 + $0x620] sm:$0xff]  ;;  %6614 = vmatpush2.bf16.msra.mxu1 %v9214_v1 }
  0xab   : > { %v9207_v3 = vcombine.high %v592_v62, %v596_v63  ;;  %v712_v4 = vld [vmem:[%s10757_s27 + $0x9c0] sm:$0xff]  ;;  %6574 = vmatprep.subr.bf16.mxu0 %v9079_v2  ;;  %v9206_v10 = vcombine.low %v592_v62, %v596_v63 }
  0xac   : > { %v716_v5 = vld [vmem:[%s10757_s27 + $0x9e0] sm:$0xff]  ;;  %6575 = vmatpush2.bf16.msra.mxu0 %v9078_v8 }
  0xad   : > { %v840_v6 = vld [vmem:[%s10757_s27 + $0xdc0] sm:$0xff]  ;;  %v9327_v12 = vcombine.high %v712_v4, %v716_v5  ;;  %6615 = vmatprep.subr.bf16.mxu1 %v9207_v3  ;;  %v9326_v21 = vcombine.low %v712_v4, %v716_v5 }
  0xae   : > { %v844_v7 = vld [vmem:[%s10757_s27 + $0xde0] sm:$0xff]  ;;  %6616 = vmatpush2.bf16.msra.mxu1 %v9206_v10 }
  0xaf   : > { %v368_v9 = vld [vmem:[%s10749_s15] sm:$0xff]  ;;  %v9455_v13 = vcombine.high %v840_v6, %v844_v7  ;;  %6626 = vmatprep.subr.bf16.mxu0 %v9327_v12  ;;  %v9454_v23 = vcombine.low %v840_v6, %v844_v7 }
  0xb0   : > { %v704_v14 = vld [vmem:[%s10757_s27 + $0x980] sm:$0xff]  ;;  %v10851_v16 = vpack.c.bf16 %v368_v9, %v368_v9 }
  0xb1   : > { %v708_v15 = vld [vmem:[%s10757_s27 + $0x9a0] sm:$0xff]  ;;  %6667 = vmatprep.subr.bf16.mxu1 %v9455_v13  ;;  %6618 = vmatmul.mubr.bf16.vlgmr.msra.gmra.mxu1 %v10856_v20 }
  0xb2   : > { %v832_v17 = vld [vmem:[%s10757_s27 + $0xd80] sm:$0xff]  ;;  %v9319_v24 = vcombine.high %v704_v14, %v708_v15  ;;  %6577 = vmatmul.mubr.bf16.vlgmr.msra.gmra.mxu0 %v10851_v16  ;;  %v9318_v32 = vcombine.low %v704_v14, %v708_v15  ;;  %6668 = vmatpush1.bf16.msra.mxu1 %v9454_v23 }
  0xb3   : > { %v836_v18 = vld [vmem:[%s10757_s27 + $0xda0] sm:$0xff]  ;;  %6627 = vmatpush1.bf16.msra.mxu0 %v9326_v21  ;;  %6658 = vmatprep.mubr.bf16.mxu0 %v10861_v28 }
  0xb4   : > { %v9447_v25 = vcombine.high %v832_v17, %v836_v18  ;;  %v696_v26 = vld [vmem:[%s10757_s27 + $0x940] sm:$0xff]  ;;  %6628 = vmatprep.subr.bf16.mxu0 %v9319_v24  ;;  %v9446_v33 = vcombine.low %v832_v17, %v836_v18  ;;  %6699 = vmatprep.mubr.bf16.mxu1 %v10866_v31 }
  0xb5   : > { %v700_v27 = vld [vmem:[%s10757_s27 + $0x960] sm:$0xff] }
  0xb6   : > { %v824_v29 = vld [vmem:[%s10757_s27 + $0xd40] sm:$0xff]  ;;  %v9311_v34 = vcombine.high %v696_v26, %v700_v27  ;;  %6669 = vmatprep.subr.bf16.mxu1 %v9447_v25  ;;  %v9310_v40 = vcombine.low %v696_v26, %v700_v27 }
  0xb7   : > { %v828_v30 = vld [vmem:[%s10757_s27 + $0xd60] sm:$0xff]  ;;  %6629 = vmatpush1.bf16.msra.mxu0 %v9318_v32  ;;  %6670 = vmatpush1.bf16.msra.mxu1 %v9446_v33 }
  0xb8   : > { %v9439_v35 = vcombine.high %v824_v29, %v828_v30  ;;  %v688_v36 = vld [vmem:[%s10757_s27 + $0x900] sm:$0xff]  ;;  %6630 = vmatprep.subr.bf16.mxu0 %v9311_v34  ;;  %v9438_v41 = vcombine.low %v824_v29, %v828_v30 }
  0xb9   : > { %v692_v37 = vld [vmem:[%s10757_s27 + $0x920] sm:$0xff] }
  0xba   : > { %v816_v38 = vld [vmem:[%s10757_s27 + $0xd00] sm:$0xff]  ;;  %v9303_v42 = vcombine.high %v688_v36, %v692_v37  ;;  %6671 = vmatprep.subr.bf16.mxu1 %v9439_v35  ;;  %v9302_v48 = vcombine.low %v688_v36, %v692_v37 }
  0xbb   : > { %v820_v39 = vld [vmem:[%s10757_s27 + $0xd20] sm:$0xff]  ;;  %6631 = vmatpush1.bf16.msra.mxu0 %v9310_v40  ;;  %6672 = vmatpush1.bf16.msra.mxu1 %v9438_v41 }
  0xbc   : > { %v9431_v43 = vcombine.high %v816_v38, %v820_v39  ;;  %v680_v44 = vld [vmem:[%s10757_s27 + $0x8c0] sm:$0xff]  ;;  %6632 = vmatprep.subr.bf16.mxu0 %v9303_v42  ;;  %v9430_v49 = vcombine.low %v816_v38, %v820_v39 }
  0xbd   : > { %v684_v45 = vld [vmem:[%s10757_s27 + $0x8e0] sm:$0xff] }
  0xbe   : > { %v808_v46 = vld [vmem:[%s10757_s27 + $0xcc0] sm:$0xff]  ;;  %v9295_v50 = vcombine.high %v680_v44, %v684_v45  ;;  %6673 = vmatprep.subr.bf16.mxu1 %v9431_v43  ;;  %v9294_v56 = vcombine.low %v680_v44, %v684_v45 }
  0xbf   : > { %v812_v47 = vld [vmem:[%s10757_s27 + $0xce0] sm:$0xff]  ;;  %6633 = vmatpush1.bf16.msra.mxu0 %v9302_v48  ;;  %6674 = vmatpush1.bf16.msra.mxu1 %v9430_v49 }
  0xc0   : > { %v9423_v51 = vcombine.high %v808_v46, %v812_v47  ;;  %v672_v52 = vld [vmem:[%s10757_s27 + $0x880] sm:$0xff]  ;;  %6634 = vmatprep.subr.bf16.mxu0 %v9295_v50  ;;  %v9422_v57 = vcombine.low %v808_v46, %v812_v47 }
  0xc1   : > { %v676_v53 = vld [vmem:[%s10757_s27 + $0x8a0] sm:$0xff] }
  0xc2   : > { %v800_v54 = vld [vmem:[%s10757_s27 + $0xc80] sm:$0xff]  ;;  %v9287_v60 = vcombine.high %v672_v52, %v676_v53  ;;  %6675 = vmatprep.subr.bf16.mxu1 %v9423_v51  ;;  %v9286_v2 = vcombine.low %v672_v52, %v676_v53 }
  0xc3   : > { %v804_v55 = vld [vmem:[%s10757_s27 + $0xca0] sm:$0xff]  ;;  %6635 = vmatpush1.bf16.msra.mxu0 %v9294_v56  ;;  %6676 = vmatpush1.bf16.msra.mxu1 %v9422_v57 }
  0xc4   : > { %v9415_v61 = vcombine.high %v800_v54, %v804_v55  ;;  %v664_v62 = vld [vmem:[%s10757_s27 + $0x840] sm:$0xff]  ;;  %6636 = vmatprep.subr.bf16.mxu0 %v9287_v60  ;;  %v9414_v3 = vcombine.low %v800_v54, %v804_v55 }
  0xc5   : > { %v668_v63 = vld [vmem:[%s10757_s27 + $0x860] sm:$0xff] }
  0xc6   : > { %v792_v0 = vld [vmem:[%s10757_s27 + $0xc40] sm:$0xff]  ;;  %v9279_v4 = vcombine.high %v664_v62, %v668_v63  ;;  %6677 = vmatprep.subr.bf16.mxu1 %v9415_v61  ;;  %v9278_v10 = vcombine.low %v664_v62, %v668_v63 }
  0xc7   : > { %v796_v1 = vld [vmem:[%s10757_s27 + $0xc60] sm:$0xff]  ;;  %6637 = vmatpush1.bf16.msra.mxu0 %v9286_v2  ;;  %6678 = vmatpush1.bf16.msra.mxu1 %v9414_v3 }
  0xc8   : > { %v9407_v5 = vcombine.high %v792_v0, %v796_v1  ;;  %v656_v6 = vld [vmem:[%s10757_s27 + $0x800] sm:$0xff]  ;;  %6638 = vmatprep.subr.bf16.mxu0 %v9279_v4  ;;  %v9406_v11 = vcombine.low %v792_v0, %v796_v1 }
  0xc9   : > { %v660_v7 = vld [vmem:[%s10757_s27 + $0x820] sm:$0xff] }
  0xca   : > { %v784_v8 = vld [vmem:[%s10757_s27 + $0xc00] sm:$0xff]  ;;  %v9271_v12 = vcombine.high %v656_v6, %v660_v7  ;;  %6679 = vmatprep.subr.bf16.mxu1 %v9407_v5  ;;  %v9270_v19 = vcombine.low %v656_v6, %v660_v7 }
  0xcb   : > { %v788_v9 = vld [vmem:[%s10757_s27 + $0xc20] sm:$0xff]  ;;  %6639 = vmatpush1.bf16.msra.mxu0 %v9278_v10  ;;  %6680 = vmatpush1.bf16.msra.mxu1 %v9406_v11 }
  0xcc   : > { %v9399_v13 = vcombine.high %v784_v8, %v788_v9  ;;  %v776_v14 = vld [vmem:[%s10757_s27 + $0xbc0] sm:$0xff]  ;;  %6640 = vmatprep.subr.bf16.mxu0 %v9271_v12  ;;  %v9398_v21 = vcombine.low %v784_v8, %v788_v9 }
  0xcd   : > { %v780_v15 = vld [vmem:[%s10757_s27 + $0xbe0] sm:$0xff] }
  0xce   : > { %v904_v17 = vld [vmem:[%s10757_s27 + $0xfc0] sm:$0xff]  ;;  %v9391_v22 = vcombine.high %v776_v14, %v780_v15  ;;  %6681 = vmatprep.subr.bf16.mxu1 %v9399_v13  ;;  %v9390_v29 = vcombine.low %v776_v14, %v780_v15 }
  0xcf   : > { %v908_v18 = vld [vmem:[%s10757_s27 + $0xfe0] sm:$0xff]  ;;  %6641 = vmatpush1.bf16.msra.mxu0 %v9270_v19  ;;  %6682 = vmatpush1.bf16.msra.mxu1 %v9398_v21 }
  0xd0   : > { %v9519_v23 = vcombine.high %v904_v17, %v908_v18  ;;  %v768_v24 = vld [vmem:[%s10757_s27 + $0xb80] sm:$0xff]  ;;  %6642 = vmatprep.subr.bf16.mxu0 %v9391_v22  ;;  %v9518_v30 = vcombine.low %v904_v17, %v908_v18 }
  0xd1   : > { %v772_v25 = vld [vmem:[%s10757_s27 + $0xba0] sm:$0xff] }
  0xd2   : > { %v896_v26 = vld [vmem:[%s10757_s27 + $0xf80] sm:$0xff]  ;;  %v9383_v32 = vcombine.high %v768_v24, %v772_v25  ;;  %6683 = vmatprep.subr.bf16.mxu1 %v9519_v23  ;;  %v9382_v38 = vcombine.low %v768_v24, %v772_v25 }
  0xd3   : > { %v900_v27 = vld [vmem:[%s10757_s27 + $0xfa0] sm:$0xff]  ;;  %6643 = vmatpush2.bf16.msra.mxu0 %v9390_v29  ;;  %6684 = vmatpush2.bf16.msra.mxu1 %v9518_v30  ;;  %v374_v30 = vld [vmem:[%s10749_s15 + $0x30] sm:$0xff] }
  0xd4   : > { %v9511_v33 = vcombine.high %v896_v26, %v900_v27  ;;  %v760_v34 = vld [vmem:[%s10757_s27 + $0xb40] sm:$0xff]  ;;  %6644 = vmatprep.subr.bf16.mxu0 %v9383_v32  ;;  %v9510_v39 = vcombine.low %v896_v26, %v900_v27 }
  0xd5   : > { %v764_v35 = vld [vmem:[%s10757_s27 + $0xb60] sm:$0xff] }
  0xd6   : > { %v888_v36 = vld [vmem:[%s10757_s27 + $0xf40] sm:$0xff]  ;;  %v9375_v40 = vcombine.high %v760_v34, %v764_v35  ;;  %6685 = vmatprep.subr.bf16.mxu1 %v9511_v33  ;;  %v9374_v46 = vcombine.low %v760_v34, %v764_v35 }
  0xd7   : > { %v892_v37 = vld [vmem:[%s10757_s27 + $0xf60] sm:$0xff]  ;;  %6645 = vmatpush2.bf16.msra.mxu0 %v9382_v38  ;;  %6686 = vmatpush2.bf16.msra.mxu1 %v9510_v39  ;;  %v377_v39 = vld [vmem:[%s10749_s15 + $0x48] sm:$0xff] }
  0xd8   : > { %v9503_v41 = vcombine.high %v888_v36, %v892_v37  ;;  %v752_v42 = vld [vmem:[%s10757_s27 + $0xb00] sm:$0xff]  ;;  %6646 = vmatprep.subr.bf16.mxu0 %v9375_v40  ;;  %v9502_v47 = vcombine.low %v888_v36, %v892_v37  ;;  %v10936_v40 = vpack.c.bf16 %v374_v30, %v374_v30 }
  0xd9   : > { %v756_v43 = vld [vmem:[%s10757_s27 + $0xb20] sm:$0xff] }
  0xda   : > { %v880_v44 = vld [vmem:[%s10757_s27 + $0xf00] sm:$0xff]  ;;  %v9367_v48 = vcombine.high %v752_v42, %v756_v43  ;;  %6687 = vmatprep.subr.bf16.mxu1 %v9503_v41  ;;  %v9366_v54 = vcombine.low %v752_v42, %v756_v43  ;;  %v379_v42 = vld [vmem:[%s10749_s15 + $0x58] sm:$0xff] }
  0xdb   : > { %v884_v45 = vld [vmem:[%s10757_s27 + $0xf20] sm:$0xff]  ;;  %6647 = vmatpush2.bf16.msra.mxu0 %v9374_v46  ;;  %6688 = vmatpush2.bf16.msra.mxu1 %v9502_v47 }
  0xdc   : > { %v9495_v49 = vcombine.high %v880_v44, %v884_v45  ;;  %v744_v50 = vld [vmem:[%s10757_s27 + $0xac0] sm:$0xff]  ;;  %6648 = vmatprep.subr.bf16.mxu0 %v9367_v48  ;;  %v9494_v55 = vcombine.low %v880_v44, %v884_v45  ;;  %v10941_v48 = vpack.c.bf16 %v377_v39, %v377_v39 }
  0xdd   : > { %v748_v51 = vld [vmem:[%s10757_s27 + $0xae0] sm:$0xff] }
  0xde   : > { %v872_v52 = vld [vmem:[%s10757_s27 + $0xec0] sm:$0xff]  ;;  %v9359_v56 = vcombine.high %v744_v50, %v748_v51  ;;  %6689 = vmatprep.subr.bf16.mxu1 %v9495_v49  ;;  %v9358_v0 = vcombine.low %v744_v50, %v748_v51  ;;  %v10946_v51 = vpack.c.bf16 %v379_v42, %v379_v42 }
  0xdf   : > { %v876_v53 = vld [vmem:[%s10757_s27 + $0xee0] sm:$0xff]  ;;  %6649 = vmatpush2.bf16.msra.mxu0 %v9366_v54  ;;  %6690 = vmatpush2.bf16.msra.mxu1 %v9494_v55 }
  0xe0   : > { %v9487_v57 = vcombine.high %v872_v52, %v876_v53  ;;  %v736_v60 = vld [vmem:[%s10757_s27 + $0xa80] sm:$0xff]  ;;  %6650 = vmatprep.subr.bf16.mxu0 %v9359_v56  ;;  %v9486_v1 = vcombine.low %v872_v52, %v876_v53 }
  0xe1   : > { %v740_v61 = vld [vmem:[%s10757_s27 + $0xaa0] sm:$0xff] }
  0xe2   : > { %v864_v62 = vld [vmem:[%s10757_s27 + $0xe80] sm:$0xff]  ;;  %v9351_v2 = vcombine.high %v736_v60, %v740_v61  ;;  %6691 = vmatprep.subr.bf16.mxu1 %v9487_v57  ;;  %v9350_v8 = vcombine.low %v736_v60, %v740_v61 }
  0xe3   : > { %v868_v63 = vld [vmem:[%s10757_s27 + $0xea0] sm:$0xff]  ;;  %6651 = vmatpush2.bf16.msra.mxu0 %v9358_v0  ;;  %6692 = vmatpush2.bf16.msra.mxu1 %v9486_v1 }
  0xe4   : > { %v9479_v3 = vcombine.high %v864_v62, %v868_v63  ;;  %v728_v4 = vld [vmem:[%s10757_s27 + $0xa40] sm:$0xff]  ;;  %6652 = vmatprep.subr.bf16.mxu0 %v9351_v2  ;;  %v9478_v9 = vcombine.low %v864_v62, %v868_v63 }
  0xe5   : > { %v732_v5 = vld [vmem:[%s10757_s27 + $0xa60] sm:$0xff] }
  0xe6   : > { %v856_v6 = vld [vmem:[%s10757_s27 + $0xe40] sm:$0xff]  ;;  %v9343_v10 = vcombine.high %v728_v4, %v732_v5  ;;  %6693 = vmatprep.subr.bf16.mxu1 %v9479_v3  ;;  %v9342_v17 = vcombine.low %v728_v4, %v732_v5 }
  0xe7   : > { %v860_v7 = vld [vmem:[%s10757_s27 + $0xe60] sm:$0xff]  ;;  %6653 = vmatpush2.bf16.msra.mxu0 %v9350_v8  ;;  %6694 = vmatpush2.bf16.msra.mxu1 %v9478_v9 }
  0xe8   : > { %v9471_v11 = vcombine.high %v856_v6, %v860_v7  ;;  %v720_v12 = vld [vmem:[%s10757_s27 + $0xa00] sm:$0xff]  ;;  %6654 = vmatprep.subr.bf16.mxu0 %v9343_v10  ;;  %v9470_v18 = vcombine.low %v856_v6, %v860_v7 }
  0xe9   : > { %v724_v13 = vld [vmem:[%s10757_s27 + $0xa20] sm:$0xff] }
  0xea   : > { %v848_v14 = vld [vmem:[%s10757_s27 + $0xe00] sm:$0xff]  ;;  %v9335_v19 = vcombine.high %v720_v12, %v724_v13  ;;  %6695 = vmatprep.subr.bf16.mxu1 %v9471_v11  ;;  %v9334_v26 = vcombine.low %v720_v12, %v724_v13 }
  0xeb   : > { %v852_v15 = vld [vmem:[%s10757_s27 + $0xe20] sm:$0xff]  ;;  %6655 = vmatpush2.bf16.msra.mxu0 %v9342_v17  ;;  %6696 = vmatpush2.bf16.msra.mxu1 %v9470_v18 }
  0xec   : > { %v9463_v21 = vcombine.high %v848_v14, %v852_v15  ;;  %v968_v22 = vld [vmem:[%s10757_s27 + $0x11c0] sm:$0xff]  ;;  %6656 = vmatprep.subr.bf16.mxu0 %v9335_v19  ;;  %v9462_v29 = vcombine.low %v848_v14, %v852_v15 }
  0xed   : > { %v972_v23 = vld [vmem:[%s10757_s27 + $0x11e0] sm:$0xff] }
  0xee   : > { %v1096_v24 = vld [vmem:[%s10757_s27 + $0x15c0] sm:$0xff]  ;;  %v9583_v32 = vcombine.high %v968_v22, %v972_v23  ;;  %6697 = vmatprep.subr.bf16.mxu1 %v9463_v21  ;;  %v9582_v41 = vcombine.low %v968_v22, %v972_v23 }
  0xef   : > { %v1100_v25 = vld [vmem:[%s10757_s27 + $0x15e0] sm:$0xff]  ;;  %6657 = vmatpush2.bf16.msra.mxu0 %v9334_v26  ;;  %6698 = vmatpush2.bf16.msra.mxu1 %v9462_v29 }
  0xf0   : > { %v372_v27 = vld [vmem:[%s10749_s15 + $0x20] sm:$0xff]  ;;  %v9711_v33 = vcombine.high %v1096_v24, %v1100_v25  ;;  %6708 = vmatprep.subr.bf16.mxu0 %v9583_v32  ;;  %v9710_v43 = vcombine.low %v1096_v24, %v1100_v25 }
  0xf1   : > { %v960_v34 = vld [vmem:[%s10757_s27 + $0x1180] sm:$0xff]  ;;  %v10931_v36 = vpack.c.bf16 %v372_v27, %v372_v27 }
  0xf2   : > { %v964_v35 = vld [vmem:[%s10757_s27 + $0x11a0] sm:$0xff]  ;;  %6749 = vmatprep.subr.bf16.mxu1 %v9711_v33  ;;  %6700 = vmatmul.mubr.bf16.vlgmr.msra.gmra.mxu1 %v10936_v40 }
  0xf3   : > { %v1088_v37 = vld [vmem:[%s10757_s27 + $0x1580] sm:$0xff]  ;;  %v9575_v44 = vcombine.high %v960_v34, %v964_v35  ;;  %6659 = vmatmul.mubr.bf16.vlgmr.msra.gmra.mxu0 %v10931_v36  ;;  %v9574_v52 = vcombine.low %v960_v34, %v964_v35  ;;  %6750 = vmatpush1.bf16.msra.mxu1 %v9710_v43 }
  0xf4   : > { %v1092_v38 = vld [vmem:[%s10757_s27 + $0x15a0] sm:$0xff]  ;;  %6709 = vmatpush1.bf16.msra.mxu0 %v9582_v41  ;;  %6740 = vmatprep.mubr.bf16.mxu0 %v10941_v48 }
  0xf5   : > { %v9703_v45 = vcombine.high %v1088_v37, %v1092_v38  ;;  %v952_v46 = vld [vmem:[%s10757_s27 + $0x1140] sm:$0xff]  ;;  %6710 = vmatprep.subr.bf16.mxu0 %v9575_v44  ;;  %v9702_v53 = vcombine.low %v1088_v37, %v1092_v38  ;;  %6781 = vmatprep.mubr.bf16.mxu1 %v10946_v51 }
  0xf6   : > { %v956_v47 = vld [vmem:[%s10757_s27 + $0x1160] sm:$0xff] }
  0xf7   : > { %v1080_v49 = vld [vmem:[%s10757_s27 + $0x1540] sm:$0xff]  ;;  %v9567_v54 = vcombine.high %v952_v46, %v956_v47  ;;  %6751 = vmatprep.subr.bf16.mxu1 %v9703_v45  ;;  %v9566_v62 = vcombine.low %v952_v46, %v956_v47 }
  0xf8   : > { %v1084_v50 = vld [vmem:[%s10757_s27 + $0x1560] sm:$0xff]  ;;  %6711 = vmatpush1.bf16.msra.mxu0 %v9574_v52  ;;  %6752 = vmatpush1.bf16.msra.mxu1 %v9702_v53 }
  0xf9   : > { %v9695_v55 = vcombine.high %v1080_v49, %v1084_v50  ;;  %v944_v56 = vld [vmem:[%s10757_s27 + $0x1100] sm:$0xff]  ;;  %6712 = vmatprep.subr.bf16.mxu0 %v9567_v54  ;;  %v9694_v63 = vcombine.low %v1080_v49, %v1084_v50 }
  0xfa   : > { %v948_v57 = vld [vmem:[%s10757_s27 + $0x1120] sm:$0xff] }
  0xfb   : > { %v1072_v60 = vld [vmem:[%s10757_s27 + $0x1500] sm:$0xff]  ;;  %v9559_v0 = vcombine.high %v944_v56, %v948_v57  ;;  %6753 = vmatprep.subr.bf16.mxu1 %v9695_v55  ;;  %v9558_v6 = vcombine.low %v944_v56, %v948_v57 }
  0xfc   : > { %v1076_v61 = vld [vmem:[%s10757_s27 + $0x1520] sm:$0xff]  ;;  %6713 = vmatpush1.bf16.msra.mxu0 %v9566_v62  ;;  %6754 = vmatpush1.bf16.msra.mxu1 %v9694_v63 }
  0xfd   : > { %v9687_v1 = vcombine.high %v1072_v60, %v1076_v61  ;;  %v936_v2 = vld [vmem:[%s10757_s27 + $0x10c0] sm:$0xff]  ;;  %6714 = vmatprep.subr.bf16.mxu0 %v9559_v0  ;;  %v9686_v7 = vcombine.low %v1072_v60, %v1076_v61 }
  0xfe   : > { %v940_v3 = vld [vmem:[%s10757_s27 + $0x10e0] sm:$0xff] }
  0xff   : > { %v1064_v4 = vld [vmem:[%s10757_s27 + $0x14c0] sm:$0xff]  ;;  %v9551_v8 = vcombine.high %v936_v2, %v940_v3  ;;  %6755 = vmatprep.subr.bf16.mxu1 %v9687_v1  ;;  %v9550_v14 = vcombine.low %v936_v2, %v940_v3 }
 0x100   : > { %v1068_v5 = vld [vmem:[%s10757_s27 + $0x14e0] sm:$0xff]  ;;  %6715 = vmatpush1.bf16.msra.mxu0 %v9558_v6  ;;  %6756 = vmatpush1.bf16.msra.mxu1 %v9686_v7 }
 0x101   : > { %v9679_v9 = vcombine.high %v1064_v4, %v1068_v5  ;;  %v928_v10 = vld [vmem:[%s10757_s27 + $0x1080] sm:$0xff]  ;;  %6716 = vmatprep.subr.bf16.mxu0 %v9551_v8  ;;  %v9678_v15 = vcombine.low %v1064_v4, %v1068_v5 }
 0x102   : > { %v932_v11 = vld [vmem:[%s10757_s27 + $0x10a0] sm:$0xff] }
 0x103   : > { %v1056_v12 = vld [vmem:[%s10757_s27 + $0x1480] sm:$0xff]  ;;  %v9543_v17 = vcombine.high %v928_v10, %v932_v11  ;;  %6757 = vmatprep.subr.bf16.mxu1 %v9679_v9  ;;  %v9542_v24 = vcombine.low %v928_v10, %v932_v11 }
 0x104   : > { %v1060_v13 = vld [vmem:[%s10757_s27 + $0x14a0] sm:$0xff]  ;;  %6717 = vmatpush1.bf16.msra.mxu0 %v9550_v14  ;;  %6758 = vmatpush1.bf16.msra.mxu1 %v9678_v15 }
 0x105   : > { %v9671_v18 = vcombine.high %v1056_v12, %v1060_v13  ;;  %v920_v19 = vld [vmem:[%s10757_s27 + $0x1040] sm:$0xff]  ;;  %6718 = vmatprep.subr.bf16.mxu0 %v9543_v17  ;;  %v9670_v25 = vcombine.low %v1056_v12, %v1060_v13 }
 0x106   : > { %v924_v21 = vld [vmem:[%s10757_s27 + $0x1060] sm:$0xff] }
 0x107   : > { %v1048_v22 = vld [vmem:[%s10757_s27 + $0x1440] sm:$0xff]  ;;  %v9535_v26 = vcombine.high %v920_v19, %v924_v21  ;;  %6759 = vmatprep.subr.bf16.mxu1 %v9671_v18  ;;  %v9534_v34 = vcombine.low %v920_v19, %v924_v21 }
 0x108   : > { %v1052_v23 = vld [vmem:[%s10757_s27 + $0x1460] sm:$0xff]  ;;  %6719 = vmatpush1.bf16.msra.mxu0 %v9542_v24  ;;  %6760 = vmatpush1.bf16.msra.mxu1 %v9670_v25 }
 0x109   : > { %v9663_v27 = vcombine.high %v1048_v22, %v1052_v23  ;;  %v912_v29 = vld [vmem:[%s10757_s27 + $0x1000] sm:$0xff]  ;;  %6720 = vmatprep.subr.bf16.mxu0 %v9535_v26  ;;  %v9662_v35 = vcombine.low %v1048_v22, %v1052_v23 }
 0x10a   : > { %v916_v30 = vld [vmem:[%s10757_s27 + $0x1020] sm:$0xff] }
 0x10b   : > { %v1040_v32 = vld [vmem:[%s10757_s27 + $0x1400] sm:$0xff]  ;;  %v9527_v37 = vcombine.high %v912_v29, %v916_v30  ;;  %6761 = vmatprep.subr.bf16.mxu1 %v9663_v27  ;;  %v9526_v44 = vcombine.low %v912_v29, %v916_v30 }
 0x10c   : > { %v1044_v33 = vld [vmem:[%s10757_s27 + $0x1420] sm:$0xff]  ;;  %6721 = vmatpush1.bf16.msra.mxu0 %v9534_v34  ;;  %6762 = vmatpush1.bf16.msra.mxu1 %v9662_v35 }
 0x10d   : > { %v9655_v38 = vcombine.high %v1040_v32, %v1044_v33  ;;  %v1032_v39 = vld [vmem:[%s10757_s27 + $0x13c0] sm:$0xff]  ;;  %6722 = vmatprep.subr.bf16.mxu0 %v9527_v37  ;;  %v9654_v45 = vcombine.low %v1040_v32, %v1044_v33 }
 0x10e   : > { %v1036_v41 = vld [vmem:[%s10757_s27 + $0x13e0] sm:$0xff] }
 0x10f   : > { %v1160_v42 = vld [vmem:[%s10757_s27 + $0x17c0] sm:$0xff]  ;;  %v9647_v46 = vcombine.high %v1032_v39, %v1036_v41  ;;  %6763 = vmatprep.subr.bf16.mxu1 %v9655_v38  ;;  %v9646_v54 = vcombine.low %v1032_v39, %v1036_v41 }
 0x110   : > { %v1164_v43 = vld [vmem:[%s10757_s27 + $0x17e0] sm:$0xff]  ;;  %6723 = vmatpush1.bf16.msra.mxu0 %v9526_v44  ;;  %6764 = vmatpush1.bf16.msra.mxu1 %v9654_v45 }
 0x111   : > { %v9775_v47 = vcombine.high %v1160_v42, %v1164_v43  ;;  %v1024_v49 = vld [vmem:[%s10757_s27 + $0x1380] sm:$0xff]  ;;  %6724 = vmatprep.subr.bf16.mxu0 %v9647_v46  ;;  %v9774_v55 = vcombine.low %v1160_v42, %v1164_v43 }
 0x112   : > { %v1028_v50 = vld [vmem:[%s10757_s27 + $0x13a0] sm:$0xff] }
 0x113   : > { %v1152_v52 = vld [vmem:[%s10757_s27 + $0x1780] sm:$0xff]  ;;  %v9639_v56 = vcombine.high %v1024_v49, %v1028_v50  ;;  %6765 = vmatprep.subr.bf16.mxu1 %v9775_v47  ;;  %v9638_v0 = vcombine.low %v1024_v49, %v1028_v50 }
 0x114   : > { %v1156_v53 = vld [vmem:[%s10757_s27 + $0x17a0] sm:$0xff]  ;;  %6725 = vmatpush2.bf16.msra.mxu0 %v9646_v54  ;;  %6766 = vmatpush2.bf16.msra.mxu1 %v9774_v55 }
 0x115   : > { %v9767_v57 = vcombine.high %v1152_v52, %v1156_v53  ;;  %v1016_v60 = vld [vmem:[%s10757_s27 + $0x1340] sm:$0xff]  ;;  %6726 = vmatprep.subr.bf16.mxu0 %v9639_v56  ;;  %v9766_v1 = vcombine.low %v1152_v52, %v1156_v53 }
 0x116   : > { %v1020_v61 = vld [vmem:[%s10757_s27 + $0x1360] sm:$0xff] }
 0x117   : > { %v1144_v62 = vld [vmem:[%s10757_s27 + $0x1740] sm:$0xff]  ;;  %v9631_v2 = vcombine.high %v1016_v60, %v1020_v61  ;;  %6767 = vmatprep.subr.bf16.mxu1 %v9767_v57  ;;  %v9630_v8 = vcombine.low %v1016_v60, %v1020_v61  ;;  %v378_v61 = vld [vmem:[%s10749_s15 + $0x50] sm:$0xff] }
 0x118   : > { %v1148_v63 = vld [vmem:[%s10757_s27 + $0x1760] sm:$0xff]  ;;  %6727 = vmatpush2.bf16.msra.mxu0 %v9638_v0  ;;  %6768 = vmatpush2.bf16.msra.mxu1 %v9766_v1 }
 0x119   : > { %v9759_v3 = vcombine.high %v1144_v62, %v1148_v63  ;;  %v1008_v4 = vld [vmem:[%s10757_s27 + $0x1300] sm:$0xff]  ;;  %6728 = vmatprep.subr.bf16.mxu0 %v9631_v2  ;;  %v9758_v9 = vcombine.low %v1144_v62, %v1148_v63 }
 0x11a   : > { %v1012_v5 = vld [vmem:[%s10757_s27 + $0x1320] sm:$0xff] }
 0x11b   : > { %v1136_v6 = vld [vmem:[%s10757_s27 + $0x1700] sm:$0xff]  ;;  %v9623_v10 = vcombine.high %v1008_v4, %v1012_v5  ;;  %6769 = vmatprep.subr.bf16.mxu1 %v9759_v3  ;;  %v9622_v17 = vcombine.low %v1008_v4, %v1012_v5  ;;  %v381_v5 = vld [vmem:[%s10749_s15 + $0x68] sm:$0xff] }
 0x11c   : > { %v1140_v7 = vld [vmem:[%s10757_s27 + $0x1720] sm:$0xff]  ;;  %6729 = vmatpush2.bf16.msra.mxu0 %v9630_v8  ;;  %6770 = vmatpush2.bf16.msra.mxu1 %v9758_v9  ;;  %v383_v8 = vld [vmem:[%s10749_s15 + $0x78] sm:$0xff] }
 0x11d   : > { %v9751_v11 = vcombine.high %v1136_v6, %v1140_v7  ;;  %v1000_v12 = vld [vmem:[%s10757_s27 + $0x12c0] sm:$0xff]  ;;  %6730 = vmatprep.subr.bf16.mxu0 %v9623_v10  ;;  %v9750_v18 = vcombine.low %v1136_v6, %v1140_v7  ;;  %v11016_v6 = vpack.c.bf16 %v378_v61, %v378_v61 }
 0x11e   : > { %v1004_v13 = vld [vmem:[%s10757_s27 + $0x12e0] sm:$0xff] }
 0x11f   : > { %v1128_v14 = vld [vmem:[%s10757_s27 + $0x16c0] sm:$0xff]  ;;  %v9615_v19 = vcombine.high %v1000_v12, %v1004_v13  ;;  %6771 = vmatprep.subr.bf16.mxu1 %v9751_v11  ;;  %v9614_v26 = vcombine.low %v1000_v12, %v1004_v13 }
 0x120   : > { %v1132_v15 = vld [vmem:[%s10757_s27 + $0x16e0] sm:$0xff]  ;;  %6731 = vmatpush2.bf16.msra.mxu0 %v9622_v17  ;;  %6772 = vmatpush2.bf16.msra.mxu1 %v9750_v18  ;;  %v11026_v18 = vpack.c.bf16 %v383_v8, %v383_v8 }
 0x121   : > { %v9743_v21 = vcombine.high %v1128_v14, %v1132_v15  ;;  %v992_v22 = vld [vmem:[%s10757_s27 + $0x1280] sm:$0xff]  ;;  %6732 = vmatprep.subr.bf16.mxu0 %v9615_v19  ;;  %v9742_v27 = vcombine.low %v1128_v14, %v1132_v15  ;;  %v11021_v14 = vpack.c.bf16 %v381_v5, %v381_v5 }
 0x122   : > { %v996_v23 = vld [vmem:[%s10757_s27 + $0x12a0] sm:$0xff] }
 0x123   : > { %v1120_v24 = vld [vmem:[%s10757_s27 + $0x1680] sm:$0xff]  ;;  %v9607_v29 = vcombine.high %v992_v22, %v996_v23  ;;  %6773 = vmatprep.subr.bf16.mxu1 %v9743_v21  ;;  %v9606_v37 = vcombine.low %v992_v22, %v996_v23 }
 0x124   : > { %v1124_v25 = vld [vmem:[%s10757_s27 + $0x16a0] sm:$0xff]  ;;  %6733 = vmatpush2.bf16.msra.mxu0 %v9614_v26  ;;  %6774 = vmatpush2.bf16.msra.mxu1 %v9742_v27 }
 0x125   : > { %v9735_v30 = vcombine.high %v1120_v24, %v1124_v25  ;;  %v984_v32 = vld [vmem:[%s10757_s27 + $0x1240] sm:$0xff]  ;;  %6734 = vmatprep.subr.bf16.mxu0 %v9607_v29  ;;  %v9734_v38 = vcombine.low %v1120_v24, %v1124_v25 }
 0x126   : > { %v988_v33 = vld [vmem:[%s10757_s27 + $0x1260] sm:$0xff] }
 0x127   : > { %v1112_v34 = vld [vmem:[%s10757_s27 + $0x1640] sm:$0xff]  ;;  %v9599_v39 = vcombine.high %v984_v32, %v988_v33  ;;  %6775 = vmatprep.subr.bf16.mxu1 %v9735_v30  ;;  %v9598_v46 = vcombine.low %v984_v32, %v988_v33 }
 0x128   : > { %v1116_v35 = vld [vmem:[%s10757_s27 + $0x1660] sm:$0xff]  ;;  %6735 = vmatpush2.bf16.msra.mxu0 %v9606_v37  ;;  %6776 = vmatpush2.bf16.msra.mxu1 %v9734_v38 }
 0x129   : > { %v9727_v41 = vcombine.high %v1112_v34, %v1116_v35  ;;  %v976_v42 = vld [vmem:[%s10757_s27 + $0x1200] sm:$0xff]  ;;  %6736 = vmatprep.subr.bf16.mxu0 %v9599_v39  ;;  %v9726_v47 = vcombine.low %v1112_v34, %v1116_v35 }
 0x12a   : > { %v980_v43 = vld [vmem:[%s10757_s27 + $0x1220] sm:$0xff] }
 0x12b   : > { %v1104_v44 = vld [vmem:[%s10757_s27 + $0x1600] sm:$0xff]  ;;  %v9591_v49 = vcombine.high %v976_v42, %v980_v43  ;;  %6777 = vmatprep.subr.bf16.mxu1 %v9727_v41  ;;  %v9590_v56 = vcombine.low %v976_v42, %v980_v43 }
 0x12c   : > { %v1108_v45 = vld [vmem:[%s10757_s27 + $0x1620] sm:$0xff]  ;;  %6737 = vmatpush2.bf16.msra.mxu0 %v9598_v46  ;;  %6778 = vmatpush2.bf16.msra.mxu1 %v9726_v47 }
 0x12d   : > { %v9719_v50 = vcombine.high %v1104_v44, %v1108_v45  ;;  %v1224_v52 = vld [vmem:[%s10757_s27 + $0x19c0] sm:$0xff]  ;;  %6738 = vmatprep.subr.bf16.mxu0 %v9591_v49  ;;  %v9718_v60 = vcombine.low %v1104_v44, %v1108_v45 }
 0x12e   : > { %v1228_v53 = vld [vmem:[%s10757_s27 + $0x19e0] sm:$0xff] }
 0x12f   : > { %v1352_v54 = vld [vmem:[%s10757_s27 + $0x1dc0] sm:$0xff]  ;;  %v9839_v62 = vcombine.high %v1224_v52, %v1228_v53  ;;  %6779 = vmatprep.subr.bf16.mxu1 %v9719_v50  ;;  %v9838_v7 = vcombine.low %v1224_v52, %v1228_v53 }
 0x130   : > { %v1356_v55 = vld [vmem:[%s10757_s27 + $0x1de0] sm:$0xff]  ;;  %6739 = vmatpush2.bf16.msra.mxu0 %v9590_v56  ;;  %6780 = vmatpush2.bf16.msra.mxu1 %v9718_v60 }
 0x131   : > { %v376_v57 = vld [vmem:[%s10749_s15 + $0x40] sm:$0xff]  ;;  %v9967_v63 = vcombine.high %v1352_v54, %v1356_v55  ;;  %6790 = vmatprep.subr.bf16.mxu0 %v9839_v62  ;;  %v9966_v9 = vcombine.low %v1352_v54, %v1356_v55 }
 0x132   : > { %v1216_v0 = vld [vmem:[%s10757_s27 + $0x1980] sm:$0xff]  ;;  %v11011_v2 = vpack.c.bf16 %v376_v57, %v376_v57 }
 0x133   : > { %v1220_v1 = vld [vmem:[%s10757_s27 + $0x19a0] sm:$0xff]  ;;  %6831 = vmatprep.subr.bf16.mxu1 %v9967_v63  ;;  %6782 = vmatmul.mubr.bf16.vlgmr.msra.gmra.mxu1 %v11016_v6 }
 0x134   : > { %v1344_v3 = vld [vmem:[%s10757_s27 + $0x1d80] sm:$0xff]  ;;  %v9831_v10 = vcombine.high %v1216_v0, %v1220_v1  ;;  %6741 = vmatmul.mubr.bf16.vlgmr.msra.gmra.mxu0 %v11011_v2  ;;  %v9830_v19 = vcombine.low %v1216_v0, %v1220_v1  ;;  %6832 = vmatpush1.bf16.msra.mxu1 %v9966_v9 }
 0x135   : > { %v1348_v4 = vld [vmem:[%s10757_s27 + $0x1da0] sm:$0xff]  ;;  %6791 = vmatpush1.bf16.msra.mxu0 %v9838_v7  ;;  %6822 = vmatprep.mubr.bf16.mxu0 %v11021_v14 }
 0x136   : > { %v9959_v11 = vcombine.high %v1344_v3, %v1348_v4  ;;  %v1208_v12 = vld [vmem:[%s10757_s27 + $0x1940] sm:$0xff]  ;;  %6792 = vmatprep.subr.bf16.mxu0 %v9831_v10  ;;  %v9958_v21 = vcombine.low %v1344_v3, %v1348_v4  ;;  %6863 = vmatprep.mubr.bf16.mxu1 %v11026_v18 }
 0x137   : > { %v1212_v13 = vld [vmem:[%s10757_s27 + $0x1960] sm:$0xff] }
 0x138   : > { %v1336_v15 = vld [vmem:[%s10757_s27 + $0x1d40] sm:$0xff]  ;;  %v9823_v22 = vcombine.high %v1208_v12, %v1212_v13  ;;  %6833 = vmatprep.subr.bf16.mxu1 %v9959_v11  ;;  %v9822_v29 = vcombine.low %v1208_v12, %v1212_v13 }
 0x139   : > { %v1340_v17 = vld [vmem:[%s10757_s27 + $0x1d60] sm:$0xff]  ;;  %6793 = vmatpush1.bf16.msra.mxu0 %v9830_v19  ;;  %6834 = vmatpush1.bf16.msra.mxu1 %v9958_v21 }
 0x13a   : > { %v9951_v23 = vcombine.high %v1336_v15, %v1340_v17  ;;  %v1200_v24 = vld [vmem:[%s10757_s27 + $0x1900] sm:$0xff]  ;;  %6794 = vmatprep.subr.bf16.mxu0 %v9823_v22  ;;  %v9950_v30 = vcombine.low %v1336_v15, %v1340_v17 }
 0x13b   : > { %v1204_v25 = vld [vmem:[%s10757_s27 + $0x1920] sm:$0xff] }
 0x13c   : > { %v1328_v26 = vld [vmem:[%s10757_s27 + $0x1d00] sm:$0xff]  ;;  %v9815_v32 = vcombine.high %v1200_v24, %v1204_v25  ;;  %6835 = vmatprep.subr.bf16.mxu1 %v9951_v23  ;;  %v9814_v39 = vcombine.low %v1200_v24, %v1204_v25 }
 0x13d   : > { %v1332_v27 = vld [vmem:[%s10757_s27 + $0x1d20] sm:$0xff]  ;;  %6795 = vmatpush1.bf16.msra.mxu0 %v9822_v29  ;;  %6836 = vmatpush1.bf16.msra.mxu1 %v9950_v30 }
 0x13e   : > { %v9943_v33 = vcombine.high %v1328_v26, %v1332_v27  ;;  %v1192_v34 = vld [vmem:[%s10757_s27 + $0x18c0] sm:$0xff]  ;;  %6796 = vmatprep.subr.bf16.mxu0 %v9815_v32  ;;  %v9942_v41 = vcombine.low %v1328_v26, %v1332_v27 }
 0x13f   : > { %v1196_v35 = vld [vmem:[%s10757_s27 + $0x18e0] sm:$0xff] }
 0x140   : > { %v1320_v37 = vld [vmem:[%s10757_s27 + $0x1cc0] sm:$0xff]  ;;  %v9807_v42 = vcombine.high %v1192_v34, %v1196_v35  ;;  %6837 = vmatprep.subr.bf16.mxu1 %v9943_v33  ;;  %v9806_v49 = vcombine.low %v1192_v34, %v1196_v35 }
 0x141   : > { %v1324_v38 = vld [vmem:[%s10757_s27 + $0x1ce0] sm:$0xff]  ;;  %6797 = vmatpush1.bf16.msra.mxu0 %v9814_v39  ;;  %6838 = vmatpush1.bf16.msra.mxu1 %v9942_v41 }
 0x142   : > { %v9935_v43 = vcombine.high %v1320_v37, %v1324_v38  ;;  %v1184_v44 = vld [vmem:[%s10757_s27 + $0x1880] sm:$0xff]  ;;  %6798 = vmatprep.subr.bf16.mxu0 %v9807_v42  ;;  %v9934_v50 = vcombine.low %v1320_v37, %v1324_v38 }
 0x143   : > { %v1188_v45 = vld [vmem:[%s10757_s27 + $0x18a0] sm:$0xff] }
 0x144   : > { %v1312_v46 = vld [vmem:[%s10757_s27 + $0x1c80] sm:$0xff]  ;;  %v9799_v52 = vcombine.high %v1184_v44, %v1188_v45  ;;  %6839 = vmatprep.subr.bf16.mxu1 %v9935_v43  ;;  %v9798_v60 = vcombine.low %v1184_v44, %v1188_v45 }
 0x145   : > { %v1316_v47 = vld [vmem:[%s10757_s27 + $0x1ca0] sm:$0xff]  ;;  %6799 = vmatpush1.bf16.msra.mxu0 %v9806_v49  ;;  %6840 = vmatpush1.bf16.msra.mxu1 %v9934_v50 }
 0x146   : > { %v9927_v53 = vcombine.high %v1312_v46, %v1316_v47  ;;  %v1176_v54 = vld [vmem:[%s10757_s27 + $0x1840] sm:$0xff]  ;;  %6800 = vmatprep.subr.bf16.mxu0 %v9799_v52  ;;  %v9926_v61 = vcombine.low %v1312_v46, %v1316_v47 }
 0x147   : > { %v1180_v55 = vld [vmem:[%s10757_s27 + $0x1860] sm:$0xff] }
 0x148   : > { %v1304_v56 = vld [vmem:[%s10757_s27 + $0x1c40] sm:$0xff]  ;;  %v9791_v62 = vcombine.high %v1176_v54, %v1180_v55  ;;  %6841 = vmatprep.subr.bf16.mxu1 %v9927_v53  ;;  %v9790_v5 = vcombine.low %v1176_v54, %v1180_v55 }
 0x149   : > { %v1308_v57 = vld [vmem:[%s10757_s27 + $0x1c60] sm:$0xff]  ;;  %6801 = vmatpush1.bf16.msra.mxu0 %v9798_v60  ;;  %6842 = vmatpush1.bf16.msra.mxu1 %v9926_v61 }
 0x14a   : > { %v9919_v63 = vcombine.high %v1304_v56, %v1308_v57  ;;  %v1168_v0 = vld [vmem:[%s10757_s27 + $0x1800] sm:$0xff]  ;;  %6802 = vmatprep.subr.bf16.mxu0 %v9791_v62  ;;  %v9918_v7 = vcombine.low %v1304_v56, %v1308_v57 }
 0x14b   : > { %v1172_v1 = vld [vmem:[%s10757_s27 + $0x1820] sm:$0xff] }
 0x14c   : > { %v1296_v3 = vld [vmem:[%s10757_s27 + $0x1c00] sm:$0xff]  ;;  %v9783_v8 = vcombine.high %v1168_v0, %v1172_v1  ;;  %6843 = vmatprep.subr.bf16.mxu1 %v9919_v63  ;;  %v9782_v15 = vcombine.low %v1168_v0, %v1172_v1 }
 0x14d   : > { %v1300_v4 = vld [vmem:[%s10757_s27 + $0x1c20] sm:$0xff]  ;;  %6803 = vmatpush1.bf16.msra.mxu0 %v9790_v5  ;;  %6844 = vmatpush1.bf16.msra.mxu1 %v9918_v7 }
 0x14e   : > { %v9911_v9 = vcombine.high %v1296_v3, %v1300_v4  ;;  %v1288_v10 = vld [vmem:[%s10757_s27 + $0x1bc0] sm:$0xff]  ;;  %6804 = vmatprep.subr.bf16.mxu0 %v9783_v8  ;;  %v9910_v17 = vcombine.low %v1296_v3, %v1300_v4 }
 0x14f   : > { %v1292_v11 = vld [vmem:[%s10757_s27 + $0x1be0] sm:$0xff] }
 0x150   : > { %v1416_v12 = vld [vmem:[%s10757_s27 + $0x1fc0] sm:$0xff]  ;;  %v9903_v19 = vcombine.high %v1288_v10, %v1292_v11  ;;  %6845 = vmatprep.subr.bf16.mxu1 %v9911_v9  ;;  %v9902_v26 = vcombine.low %v1288_v10, %v1292_v11 }
 0x151   : > { %v1420_v13 = vld [vmem:[%s10757_s27 + $0x1fe0] sm:$0xff]  ;;  %6805 = vmatpush1.bf16.msra.mxu0 %v9782_v15  ;;  %6846 = vmatpush1.bf16.msra.mxu1 %v9910_v17 }
 0x152   : > { %v10031_v21 = vcombine.high %v1416_v12, %v1420_v13  ;;  %v1280_v22 = vld [vmem:[%s10757_s27 + $0x1b80] sm:$0xff]  ;;  %6806 = vmatprep.subr.bf16.mxu0 %v9903_v19  ;;  %v10030_v27 = vcombine.low %v1416_v12, %v1420_v13 }
 0x153   : > { %v1284_v23 = vld [vmem:[%s10757_s27 + $0x1ba0] sm:$0xff] }
 0x154   : > { %v1408_v24 = vld [vmem:[%s10757_s27 + $0x1f80] sm:$0xff]  ;;  %v9895_v29 = vcombine.high %v1280_v22, %v1284_v23  ;;  %6847 = vmatprep.subr.bf16.mxu1 %v10031_v21  ;;  %v9894_v37 = vcombine.low %v1280_v22, %v1284_v23 }
 0x155   : > { %v1412_v25 = vld [vmem:[%s10757_s27 + $0x1fa0] sm:$0xff]  ;;  %6807 = vmatpush2.bf16.msra.mxu0 %v9902_v26  ;;  %6848 = vmatpush2.bf16.msra.mxu1 %v10030_v27 }
 0x156   : > { %v10023_v30 = vcombine.high %v1408_v24, %v1412_v25  ;;  %v1272_v32 = vld [vmem:[%s10757_s27 + $0x1b40] sm:$0xff]  ;;  %6808 = vmatprep.subr.bf16.mxu0 %v9895_v29  ;;  %v10022_v38 = vcombine.low %v1408_v24, %v1412_v25  ;;  %v457_v29 = vld [vmem:[%s10757_s27 + $0x1c8] sm:$0xff] }
 0x157   : > { %v1276_v33 = vld [vmem:[%s10757_s27 + $0x1b60] sm:$0xff] }
 0x158   : > { %v1400_v34 = vld [vmem:[%s10757_s27 + $0x1f40] sm:$0xff]  ;;  %v9887_v39 = vcombine.high %v1272_v32, %v1276_v33  ;;  %6849 = vmatprep.subr.bf16.mxu1 %v10023_v30  ;;  %v9886_v46 = vcombine.low %v1272_v32, %v1276_v33  ;;  %v461_v30 = vld [vmem:[%s10757_s27 + $0x1e8] sm:$0xff] }
 0x159   : > { %v1404_v35 = vld [vmem:[%s10757_s27 + $0x1f60] sm:$0xff]  ;;  %6809 = vmatpush2.bf16.msra.mxu0 %v9894_v37  ;;  %6850 = vmatpush2.bf16.msra.mxu1 %v10022_v38  ;;  %v585_v32 = vld [vmem:[%s10757_s27 + $0x5c8] sm:$0xff]  ;;  %v382_v38 = vld [vmem:[%s10749_s15 + $0x70] sm:$0xff] }
 0x15a   : > { %v10015_v41 = vcombine.high %v1400_v34, %v1404_v35  ;;  %v1264_v42 = vld [vmem:[%s10757_s27 + $0x1b00] sm:$0xff]  ;;  %6810 = vmatprep.subr.bf16.mxu0 %v9887_v39  ;;  %v10014_v47 = vcombine.low %v1400_v34, %v1404_v35  ;;  %v589_v33 = vld [vmem:[%s10757_s27 + $0x5e8] sm:$0xff]  ;;  %v9073_v39 = vcombine.high %v457_v29, %v461_v30 }
 0x15b   : > { %v1268_v43 = vld [vmem:[%s10757_s27 + $0x1b20] sm:$0xff] }
 0x15c   : > { %v1392_v44 = vld [vmem:[%s10757_s27 + $0x1f00] sm:$0xff]  ;;  %v9879_v49 = vcombine.high %v1264_v42, %v1268_v43  ;;  %6851 = vmatprep.subr.bf16.mxu1 %v10015_v41  ;;  %v9878_v56 = vcombine.low %v1264_v42, %v1268_v43  ;;  %v9201_v41 = vcombine.high %v585_v32, %v589_v33  ;;  %v449_v42 = vld [vmem:[%s10757_s27 + $0x188] sm:$0xff] }
 0x15d   : > { %v1396_v45 = vld [vmem:[%s10757_s27 + $0x1f20] sm:$0xff]  ;;  %6811 = vmatpush2.bf16.msra.mxu0 %v9886_v46  ;;  %6852 = vmatpush2.bf16.msra.mxu1 %v10014_v47  ;;  %v453_v43 = vld [vmem:[%s10757_s27 + $0x1a8] sm:$0xff]  ;;  %v11095_v47 = vpack.c.bf16 %v382_v38, %v382_v38 }
 0x15e   : > { %v10007_v50 = vcombine.high %v1392_v44, %v1396_v45  ;;  %v1256_v52 = vld [vmem:[%s10757_s27 + $0x1ac0] sm:$0xff]  ;;  %6812 = vmatprep.subr.bf16.mxu0 %v9879_v49  ;;  %v10006_v57 = vcombine.low %v1392_v44, %v1396_v45  ;;  %v577_v45 = vld [vmem:[%s10757_s27 + $0x588] sm:$0xff]  ;;  %v9072_v49 = vcombine.low %v457_v29, %v461_v30 }
 0x15f   : > { %v1260_v53 = vld [vmem:[%s10757_s27 + $0x1ae0] sm:$0xff]  ;;  %v581_v46 = vld [vmem:[%s10757_s27 + $0x5a8] sm:$0xff] }
 0x160   : > { %v1384_v54 = vld [vmem:[%s10757_s27 + $0x1ec0] sm:$0xff]  ;;  %v9871_v60 = vcombine.high %v1256_v52, %v1260_v53  ;;  %6853 = vmatprep.subr.bf16.mxu1 %v10007_v50  ;;  %v9870_v3 = vcombine.low %v1256_v52, %v1260_v53  ;;  %v9200_v50 = vcombine.low %v585_v32, %v589_v33  ;;  %v9065_v52 = vcombine.high %v449_v42, %v453_v43  ;;  %v549_v38 = vld [vmem:[%s10757_s27 + $0x4a8] sm:$0xff] }
 0x161   : > { %v1388_v55 = vld [vmem:[%s10757_s27 + $0x1ee0] sm:$0xff]  ;;  %6813 = vmatpush2.bf16.msra.mxu0 %v9878_v56  ;;  %6854 = vmatpush2.bf16.msra.mxu1 %v10006_v57  ;;  %v9193_v53 = vcombine.high %v577_v45, %v581_v46  ;;  %v569_v57 = vld [vmem:[%s10757_s27 + $0x548] sm:$0xff] }
 0x162   : > { %v9999_v61 = vcombine.high %v1384_v54, %v1388_v55  ;;  %v1248_v62 = vld [vmem:[%s10757_s27 + $0x1a80] sm:$0xff]  ;;  %6814 = vmatprep.subr.bf16.mxu0 %v9871_v60  ;;  %v9998_v4 = vcombine.low %v1384_v54, %v1388_v55  ;;  %v441_v54 = vld [vmem:[%s10757_s27 + $0x148] sm:$0xff] }
 0x163   : > { %v1252_v63 = vld [vmem:[%s10757_s27 + $0x1aa0] sm:$0xff]  ;;  %v445_v55 = vld [vmem:[%s10757_s27 + $0x168] sm:$0xff] }
 0x164   : > { %v1376_v0 = vld [vmem:[%s10757_s27 + $0x1e80] sm:$0xff]  ;;  %v9863_v5 = vcombine.high %v1248_v62, %v1252_v63  ;;  %6855 = vmatprep.subr.bf16.mxu1 %v9999_v61  ;;  %v9862_v12 = vcombine.low %v1248_v62, %v1252_v63  ;;  %v573_v60 = vld [vmem:[%s10757_s27 + $0x568] sm:$0xff]  ;;  %v9064_v62 = vcombine.low %v449_v42, %v453_v43 }
 0x165   : > { %v1380_v1 = vld [vmem:[%s10757_s27 + $0x1ea0] sm:$0xff]  ;;  %6815 = vmatpush2.bf16.msra.mxu0 %v9870_v3  ;;  %6856 = vmatpush2.bf16.msra.mxu1 %v9998_v4  ;;  %v9057_v3 = vcombine.high %v441_v54, %v445_v55 }
 0x166   : > { %v9991_v7 = vcombine.high %v1376_v0, %v1380_v1  ;;  %v1240_v8 = vld [vmem:[%s10757_s27 + $0x1a40] sm:$0xff]  ;;  %6816 = vmatprep.subr.bf16.mxu0 %v9863_v5  ;;  %v9990_v13 = vcombine.low %v1376_v0, %v1380_v1  ;;  %v9192_v1 = vcombine.low %v577_v45, %v581_v46  ;;  %v9185_v5 = vcombine.high %v569_v57, %v573_v60  ;;  %v409_v45 = vld [vmem:[%s10757_s27 + $0x48] sm:$0xff] }
 0x167   : > { %v1244_v9 = vld [vmem:[%s10757_s27 + $0x1a60] sm:$0xff]  ;;  %v413_v46 = vld [vmem:[%s10757_s27 + $0x68] sm:$0xff] }
 0x168   : > { %v1368_v10 = vld [vmem:[%s10757_s27 + $0x1e40] sm:$0xff]  ;;  %v9855_v15 = vcombine.high %v1240_v8, %v1244_v9  ;;  %6857 = vmatprep.subr.bf16.mxu1 %v9991_v7  ;;  %v9854_v24 = vcombine.low %v1240_v8, %v1244_v9  ;;  %v433_v7 = vld [vmem:[%s10757_s27 + $0x108] sm:$0xff] }
 0x169   : > { %v1372_v11 = vld [vmem:[%s10757_s27 + $0x1e60] sm:$0xff]  ;;  %6817 = vmatpush2.bf16.msra.mxu0 %v9862_v12  ;;  %6858 = vmatpush2.bf16.msra.mxu1 %v9990_v13  ;;  %v437_v8 = vld [vmem:[%s10757_s27 + $0x128] sm:$0xff] }
 0x16a   : > { %v9983_v17 = vcombine.high %v1368_v10, %v1372_v11  ;;  %v1232_v19 = vld [vmem:[%s10757_s27 + $0x1a00] sm:$0xff]  ;;  %6818 = vmatprep.subr.bf16.mxu0 %v9855_v15  ;;  %v9982_v25 = vcombine.low %v1368_v10, %v1372_v11  ;;  %v561_v11 = vld [vmem:[%s10757_s27 + $0x508] sm:$0xff]  ;;  %v9056_v15 = vcombine.low %v441_v54, %v445_v55  ;;  %v9048_v29 = vcombine.low %v433_v7, %v437_v8 }
 0x16b   : > { %v1236_v21 = vld [vmem:[%s10757_s27 + $0x1a20] sm:$0xff]  ;;  %v565_v12 = vld [vmem:[%s10757_s27 + $0x528] sm:$0xff]  ;;  %v9025_v54 = vcombine.high %v409_v45, %v413_v46 }
 0x16c   : > { %v1360_v22 = vld [vmem:[%s10757_s27 + $0x1e00] sm:$0xff]  ;;  %v9847_v26 = vcombine.high %v1232_v19, %v1236_v21  ;;  %6859 = vmatprep.subr.bf16.mxu1 %v9983_v17  ;;  %v9846_v34 = vcombine.low %v1232_v19, %v1236_v21  ;;  %v9184_v19 = vcombine.low %v569_v57, %v573_v60  ;;  %v9049_v21 = vcombine.high %v433_v7, %v437_v8  ;;  %v405_v57 = vld [vmem:[%s10757_s27 + $0x28] sm:$0xff] }
 0x16d   : > { %v1364_v23 = vld [vmem:[%s10757_s27 + $0x1e20] sm:$0xff]  ;;  %6819 = vmatpush2.bf16.msra.mxu0 %v9854_v24  ;;  %6860 = vmatpush2.bf16.msra.mxu1 %v9982_v25  ;;  %v425_v24 = vld [vmem:[%s10757_s27 + $0xc8] sm:$0xff]  ;;  %v9176_v30 = vcombine.low %v561_v11, %v565_v12 }
 0x16e   : > { %v9975_v27 = vcombine.high %v1360_v22, %v1364_v23  ;;  %v380_v35 = vld [vmem:[%s10749_s15 + $0x60] sm:$0xff]  ;;  %6820 = vmatprep.subr.bf16.mxu0 %v9847_v26  ;;  %v9974_v37 = vcombine.low %v1360_v22, %v1364_v23  ;;  %v9177_v23 = vcombine.high %v561_v11, %v565_v12  ;;  %v429_v25 = vld [vmem:[%s10757_s27 + $0xe8] sm:$0xff] }
 0x16f   : > { %v11091_v44 = vpack.c.bf16 %v380_v35, %v380_v35  ;;  %v553_v26 = vld [vmem:[%s10757_s27 + $0x4c8] sm:$0xff]  ;;  %v9041_v32 = vcombine.high %v425_v24, %v429_v25 }
 0x170   : > { %6861 = vmatprep.subr.bf16.mxu1 %v9975_v27  ;;  %v557_v27 = vld [vmem:[%s10757_s27 + $0x4e8] sm:$0xff] }
 0x171   : > { %6821 = vmatpush2.bf16.msra.mxu0 %v9846_v34  ;;  %6862 = vmatpush2.bf16.msra.mxu1 %v9974_v37  ;;  %v6619_v61 = vpop.f32.mrf.mxu1  ;;  %v9169_v33 = vcombine.high %v553_v26, %v557_v27  ;;  %v417_v34 = vld [vmem:[%s10757_s27 + $0x88] sm:$0xff] }
 0x172   : > { %6872 = vmatprep.subr.bf16.mxu0 %v9073_v39  ;;  %6913 = vmatprep.subr.bf16.mxu1 %v9201_v41  ;;  %v6578_v56 = vpop.f32.mrf.mxu0  ;;  %v421_v35 = vld [vmem:[%s10757_s27 + $0xa8] sm:$0xff]  ;;  %v9040_v39 = vcombine.low %v425_v24, %v429_v25  ;;  %v9168_v41 = vcombine.low %v553_v26, %v557_v27 }
 0x173   : > { %v11103_v63 = vadd.f32 %v6619_v61, %v6578_v56  ;;  %v6621_v4 = vpop.f32.mrf.mxu1  ;;  %v545_v37 = vld [vmem:[%s10757_s27 + $0x488] sm:$0xff]  ;;  %v9033_v42 = vcombine.high %v417_v34, %v421_v35 }
 0x174   : > { %6823 = vmatmul.mubr.bf16.vlgmr.msra.gmra.mxu0 %v11091_v44  ;;  %6864 = vmatmul.mubr.bf16.vlgmr.msra.gmra.mxu1 %v11095_v47  ;;  %v6580_v0 = vpop.f32.mrf.mxu0  ;;  %v9161_v43 = vcombine.high %v545_v37, %v549_v38  ;;  %v401_v56 = vld [vmem:[%s10757_s27 + $0x8] sm:$0xff] }
 0x175   : > { %6873 = vmatpush1.bf16.msra.mxu0 %v9072_v49  ;;  %6914 = vmatpush1.bf16.msra.mxu1 %v9200_v50  ;;  %v11108_v9 = vadd.f32 %v6621_v4, %v6580_v0  ;;  %v6623_v13 = vpop.f32.mrf.mxu1  ;;  %v537_v49 = vld [vmem:[%s10757_s27 + $0x448] sm:$0xff] }
 0x176   : > { %6874 = vmatprep.subr.bf16.mxu0 %v9065_v52  ;;  %6915 = vmatprep.subr.bf16.mxu1 %v9193_v53  ;;  %v6582_v10 = vpop.f32.mrf.mxu0  ;;  %v541_v50 = vld [vmem:[%s10757_s27 + $0x468] sm:$0xff]  ;;  %v9032_v52 = vcombine.low %v417_v34, %v421_v35  ;;  %v9160_v53 = vcombine.low %v545_v37, %v549_v38 }
 0x177   : > { %6904 = vmatprep.mubr.bf16.mxu0 %v10803_v58  ;;  %6945 = vmatprep.mubr.bf16.mxu1 %v10805_v59  ;;  %v6624_v22 = vpop.f32.mrf.mxu1  ;;  %v9153_v55 = vcombine.high %v537_v49, %v541_v50  ;;  %v529_v60 = vld [vmem:[%s10757_s27 + $0x408] sm:$0xff]  ;;  %v9152_v0 = vcombine.low %v537_v49, %v541_v50  ;;  %v9016_v10 = vcombine.low %v401_v56, %v405_v57 }
 0x178   : > { %v6583_v17 = vpop.f32.mrf.mxu0  ;;  %v533_v61 = vld [vmem:[%s10757_s27 + $0x428] sm:$0xff] }
 0x179   : > { %6875 = vmatpush1.bf16.msra.mxu0 %v9064_v62  ;;  %6916 = vmatpush1.bf16.msra.mxu1 %v9192_v1  ;;  %v9024_v62 = vcombine.low %v409_v45, %v413_v46  ;;  %v9017_v1 = vcombine.high %v401_v56, %v405_v57  ;;  %v521_v4 = vld [vmem:[%s10757_s27 + $0x3c8] sm:$0xff]  ;;  %v9144_v11 = vcombine.low %v529_v60, %v533_v61 }
 0x17a   : > { %6876 = vmatprep.subr.bf16.mxu0 %v9057_v3  ;;  %6917 = vmatprep.subr.bf16.mxu1 %v9185_v5  ;;  %v9145_v3 = vcombine.high %v529_v60, %v533_v61  ;;  %v525_v5 = vld [vmem:[%s10757_s27 + $0x3e8] sm:$0xff] }
 0x17b   : > { %v649_v7 = vld [vmem:[%s10757_s27 + $0x7c8] sm:$0xff]  ;;  %v9137_v12 = vcombine.high %v521_v4, %v525_v5  ;;  %v9136_v22 = vcombine.low %v521_v4, %v525_v5 }
 0x17c   : > { %v653_v8 = vld [vmem:[%s10757_s27 + $0x7e8] sm:$0xff] }
 0x17d   : > { %6877 = vmatpush1.bf16.msra.mxu0 %v9056_v15  ;;  %6918 = vmatpush1.bf16.msra.mxu1 %v9184_v19  ;;  %v9265_v13 = vcombine.high %v649_v7, %v653_v8  ;;  %v513_v15 = vld [vmem:[%s10757_s27 + $0x388] sm:$0xff] }
 0x17e   : > { %6878 = vmatprep.subr.bf16.mxu0 %v9049_v21  ;;  %6919 = vmatprep.subr.bf16.mxu1 %v9177_v23  ;;  %v517_v17 = vld [vmem:[%s10757_s27 + $0x3a8] sm:$0xff]  ;;  %v9264_v23 = vcombine.low %v649_v7, %v653_v8 }
 0x17f   : > { %v641_v19 = vld [vmem:[%s10757_s27 + $0x788] sm:$0xff]  ;;  %v9129_v24 = vcombine.high %v513_v15, %v517_v17 }
 0x180   : > { %v645_v21 = vld [vmem:[%s10757_s27 + $0x7a8] sm:$0xff] }
 0x181   : > { %6879 = vmatpush1.bf16.msra.mxu0 %v9048_v29  ;;  %6920 = vmatpush1.bf16.msra.mxu1 %v9176_v30  ;;  %v9257_v25 = vcombine.high %v641_v19, %v645_v21  ;;  %v505_v26 = vld [vmem:[%s10757_s27 + $0x348] sm:$0xff] }
 0x182   : > { %6880 = vmatprep.subr.bf16.mxu0 %v9041_v32  ;;  %6921 = vmatprep.subr.bf16.mxu1 %v9169_v33  ;;  %v509_v27 = vld [vmem:[%s10757_s27 + $0x368] sm:$0xff]  ;;  %v9128_v32 = vcombine.low %v513_v15, %v517_v17  ;;  %v9256_v33 = vcombine.low %v641_v19, %v645_v21 }
 0x183   : > { %v633_v29 = vld [vmem:[%s10757_s27 + $0x748] sm:$0xff]  ;;  %v9121_v34 = vcombine.high %v505_v26, %v509_v27 }
 0x184   : > { %v637_v30 = vld [vmem:[%s10757_s27 + $0x768] sm:$0xff] }
 0x185   : > { %6881 = vmatpush1.bf16.msra.mxu0 %v9040_v39  ;;  %6922 = vmatpush1.bf16.msra.mxu1 %v9168_v41  ;;  %v9249_v35 = vcombine.high %v633_v29, %v637_v30  ;;  %v497_v37 = vld [vmem:[%s10757_s27 + $0x308] sm:$0xff] }
 0x186   : > { %6882 = vmatprep.subr.bf16.mxu0 %v9033_v42  ;;  %6923 = vmatprep.subr.bf16.mxu1 %v9161_v43  ;;  %v501_v38 = vld [vmem:[%s10757_s27 + $0x328] sm:$0xff]  ;;  %v9120_v42 = vcombine.low %v505_v26, %v509_v27  ;;  %v9248_v43 = vcombine.low %v633_v29, %v637_v30 }
 0x187   : > { %v625_v39 = vld [vmem:[%s10757_s27 + $0x708] sm:$0xff]  ;;  %v9113_v45 = vcombine.high %v497_v37, %v501_v38 }
 0x188   : > { %v629_v41 = vld [vmem:[%s10757_s27 + $0x728] sm:$0xff] }
 0x189   : > { %6883 = vmatpush1.bf16.msra.mxu0 %v9032_v52  ;;  %6924 = vmatpush1.bf16.msra.mxu1 %v9160_v53  ;;  %v9241_v46 = vcombine.high %v625_v39, %v629_v41  ;;  %v489_v49 = vld [vmem:[%s10757_s27 + $0x2c8] sm:$0xff] }
 0x18a   : > { %6884 = vmatprep.subr.bf16.mxu0 %v9025_v54  ;;  %6925 = vmatprep.subr.bf16.mxu1 %v9153_v55  ;;  %v493_v50 = vld [vmem:[%s10757_s27 + $0x2e8] sm:$0xff]  ;;  %v9112_v54 = vcombine.low %v497_v37, %v501_v38  ;;  %v9240_v55 = vcombine.low %v625_v39, %v629_v41 }
 0x18b   : > { %v617_v52 = vld [vmem:[%s10757_s27 + $0x6c8] sm:$0xff]  ;;  %v9105_v56 = vcombine.high %v489_v49, %v493_v50 }
 0x18c   : > { %v621_v53 = vld [vmem:[%s10757_s27 + $0x6e8] sm:$0xff] }
 0x18d   : > { %6885 = vmatpush1.bf16.msra.mxu0 %v9024_v62  ;;  %6926 = vmatpush1.bf16.msra.mxu1 %v9152_v0  ;;  %v9233_v57 = vcombine.high %v617_v52, %v621_v53  ;;  %v481_v60 = vld [vmem:[%s10757_s27 + $0x288] sm:$0xff] }
 0x18e   : > { %6886 = vmatprep.subr.bf16.mxu0 %v9017_v1  ;;  %6927 = vmatprep.subr.bf16.mxu1 %v9145_v3  ;;  %v485_v61 = vld [vmem:[%s10757_s27 + $0x2a8] sm:$0xff]  ;;  %v9104_v1 = vcombine.low %v489_v49, %v493_v50  ;;  %v9232_v3 = vcombine.low %v617_v52, %v621_v53 }
 0x18f   : > { %v609_v62 = vld [vmem:[%s10757_s27 + $0x688] sm:$0xff]  ;;  %v9097_v4 = vcombine.high %v481_v60, %v485_v61 }
 0x190   : > { %v613_v0 = vld [vmem:[%s10757_s27 + $0x6a8] sm:$0xff] }
 0x191   : > { %6887 = vmatpush1.bf16.msra.mxu0 %v9016_v10  ;;  %6928 = vmatpush1.bf16.msra.mxu1 %v9144_v11  ;;  %v9225_v5 = vcombine.high %v609_v62, %v613_v0  ;;  %v473_v7 = vld [vmem:[%s10757_s27 + $0x248] sm:$0xff] }
 0x192   : > { %6888 = vmatprep.subr.bf16.mxu0 %v9137_v12  ;;  %6929 = vmatprep.subr.bf16.mxu1 %v9265_v13  ;;  %v477_v8 = vld [vmem:[%s10757_s27 + $0x268] sm:$0xff]  ;;  %v9096_v12 = vcombine.low %v481_v60, %v485_v61  ;;  %v9224_v13 = vcombine.low %v609_v62, %v613_v0 }
 0x193   : > { %v601_v10 = vld [vmem:[%s10757_s27 + $0x648] sm:$0xff]  ;;  %v9089_v15 = vcombine.high %v473_v7, %v477_v8 }
 0x194   : > { %v605_v11 = vld [vmem:[%s10757_s27 + $0x668] sm:$0xff] }
 0x195   : > { %6889 = vmatpush2.bf16.msra.mxu0 %v9136_v22  ;;  %6930 = vmatpush2.bf16.msra.mxu1 %v9264_v23  ;;  %v9217_v17 = vcombine.high %v601_v10, %v605_v11  ;;  %v465_v19 = vld [vmem:[%s10757_s27 + $0x208] sm:$0xff] }
 0x196   : > { %6890 = vmatprep.subr.bf16.mxu0 %v9129_v24  ;;  %6931 = vmatprep.subr.bf16.mxu1 %v9257_v25  ;;  %v469_v21 = vld [vmem:[%s10757_s27 + $0x228] sm:$0xff]  ;;  %v9088_v24 = vcombine.low %v473_v7, %v477_v8  ;;  %v9216_v25 = vcombine.low %v601_v10, %v605_v11 }
 0x197   : > { %v593_v22 = vld [vmem:[%s10757_s27 + $0x608] sm:$0xff]  ;;  %v9081_v26 = vcombine.high %v465_v19, %v469_v21 }
 0x198   : > { %v597_v23 = vld [vmem:[%s10757_s27 + $0x628] sm:$0xff] }
 0x199   : > { %6891 = vmatpush2.bf16.msra.mxu0 %v9128_v32  ;;  %6932 = vmatpush2.bf16.msra.mxu1 %v9256_v33  ;;  %v9209_v27 = vcombine.high %v593_v22, %v597_v23  ;;  %v713_v29 = vld [vmem:[%s10757_s27 + $0x9c8] sm:$0xff] }
 0x19a   : > { %6892 = vmatprep.subr.bf16.mxu0 %v9121_v34  ;;  %6933 = vmatprep.subr.bf16.mxu1 %v9249_v35  ;;  %v717_v30 = vld [vmem:[%s10757_s27 + $0x9e8] sm:$0xff]  ;;  %v9080_v34 = vcombine.low %v465_v19, %v469_v21  ;;  %v9208_v35 = vcombine.low %v593_v22, %v597_v23 }
 0x19b   : > { %v841_v32 = vld [vmem:[%s10757_s27 + $0xdc8] sm:$0xff]  ;;  %v9329_v37 = vcombine.high %v713_v29, %v717_v30 }
 0x19c   : > { %v845_v33 = vld [vmem:[%s10757_s27 + $0xde8] sm:$0xff] }
 0x19d   : > { %6893 = vmatpush2.bf16.msra.mxu0 %v9120_v42  ;;  %6934 = vmatpush2.bf16.msra.mxu1 %v9248_v43  ;;  %v9457_v38 = vcombine.high %v841_v32, %v845_v33  ;;  %v705_v39 = vld [vmem:[%s10757_s27 + $0x988] sm:$0xff] }
 0x19e   : > { %6894 = vmatprep.subr.bf16.mxu0 %v9113_v45  ;;  %6935 = vmatprep.subr.bf16.mxu1 %v9241_v46  ;;  %v709_v41 = vld [vmem:[%s10757_s27 + $0x9a8] sm:$0xff]  ;;  %v9328_v45 = vcombine.low %v713_v29, %v717_v30  ;;  %v9456_v46 = vcombine.low %v841_v32, %v845_v33 }
 0x19f   : > { %v833_v42 = vld [vmem:[%s10757_s27 + $0xd88] sm:$0xff]  ;;  %v9321_v49 = vcombine.high %v705_v39, %v709_v41  ;;  %v9320_v61 = vcombine.low %v705_v39, %v709_v41 }
 0x1a0   : > { %v837_v43 = vld [vmem:[%s10757_s27 + $0xda8] sm:$0xff] }
 0x1a1   : > { %6895 = vmatpush2.bf16.msra.mxu0 %v9112_v54  ;;  %6936 = vmatpush2.bf16.msra.mxu1 %v9240_v55  ;;  %v9449_v50 = vcombine.high %v833_v42, %v837_v43  ;;  %v697_v52 = vld [vmem:[%s10757_s27 + $0x948] sm:$0xff]  ;;  %v9448_v0 = vcombine.low %v833_v42, %v837_v43 }
 0x1a2   : > { %6896 = vmatprep.subr.bf16.mxu0 %v9105_v56  ;;  %6937 = vmatprep.subr.bf16.mxu1 %v9233_v57  ;;  %v701_v53 = vld [vmem:[%s10757_s27 + $0x968] sm:$0xff] }
 0x1a3   : > { %v825_v55 = vld [vmem:[%s10757_s27 + $0xd48] sm:$0xff] }
 0x1a4   : > { %v829_v56 = vld [vmem:[%s10757_s27 + $0xd68] sm:$0xff] }
 0x1a5   : > { %6897 = vmatpush2.bf16.msra.mxu0 %v9104_v1  ;;  %6938 = vmatpush2.bf16.msra.mxu1 %v9232_v3  ;;  %v9313_v1 = vcombine.high %v697_v52, %v701_v53  ;;  %v689_v7 = vld [vmem:[%s10757_s27 + $0x908] sm:$0xff]  ;;  %v9440_v19 = vcombine.low %v825_v55, %v829_v56 }
 0x1a6   : > { %6898 = vmatprep.subr.bf16.mxu0 %v9097_v4  ;;  %6939 = vmatprep.subr.bf16.mxu1 %v9225_v5  ;;  %v693_v8 = vld [vmem:[%s10757_s27 + $0x928] sm:$0xff] }
 0x1a7   : > { %v817_v11 = vld [vmem:[%s10757_s27 + $0xd08] sm:$0xff]  ;;  %v9305_v21 = vcombine.high %v689_v7, %v693_v8  ;;  %v9304_v29 = vcombine.low %v689_v7, %v693_v8 }
 0x1a8   : > { %v905_v7 = vld [vmem:[%s10757_s27 + $0xfc8] sm:$0xff] }
 0x1a9   : > { %6899 = vmatpush2.bf16.msra.mxu0 %v9096_v12  ;;  %6940 = vmatpush2.bf16.msra.mxu1 %v9224_v13  ;;  %v821_v12 = vld [vmem:[%s10757_s27 + $0xd28] sm:$0xff] }
 0x1aa   : > { %6900 = vmatprep.subr.bf16.mxu0 %v9089_v15  ;;  %6941 = vmatprep.subr.bf16.mxu1 %v9217_v17  ;;  %v9433_v23 = vcombine.high %v817_v11, %v821_v12  ;;  %v9432_v30 = vcombine.low %v817_v11, %v821_v12  ;;  %v909_v8 = vld [vmem:[%s10757_s27 + $0xfe8] sm:$0xff] }
 0x1ad   : > { %6901 = vmatpush2.bf16.msra.mxu0 %v9088_v24  ;;  %6942 = vmatpush2.bf16.msra.mxu1 %v9216_v25  ;;  %v681_v24 = vld [vmem:[%s10757_s27 + $0x8c8] sm:$0xff] }
 0x1ae   : > { %6902 = vmatprep.subr.bf16.mxu0 %v9081_v26  ;;  %6943 = vmatprep.subr.bf16.mxu1 %v9209_v27  ;;  %v685_v25 = vld [vmem:[%s10757_s27 + $0x8e8] sm:$0xff] }
 0x1af   : > { %v809_v26 = vld [vmem:[%s10757_s27 + $0xcc8] sm:$0xff]  ;;  %v9297_v32 = vcombine.high %v681_v24, %v685_v25  ;;  %v9296_v39 = vcombine.low %v681_v24, %v685_v25 }
 0x1b0   : > { %v813_v27 = vld [vmem:[%s10757_s27 + $0xce8] sm:$0xff] }
 0x1b1   : > { %6903 = vmatpush2.bf16.msra.mxu0 %v9080_v34  ;;  %6944 = vmatpush2.bf16.msra.mxu1 %v9208_v35  ;;  %v9425_v33 = vcombine.high %v809_v26, %v813_v27  ;;  %v673_v34 = vld [vmem:[%s10757_s27 + $0x888] sm:$0xff]  ;;  %v9424_v41 = vcombine.low %v809_v26, %v813_v27 }
 0x1b2   : > { %6954 = vmatprep.subr.bf16.mxu0 %v9329_v37  ;;  %6995 = vmatprep.subr.bf16.mxu1 %v9457_v38  ;;  %v6701_v60 = vpop.f32.mrf.mxu1  ;;  %v677_v35 = vld [vmem:[%s10757_s27 + $0x8a8] sm:$0xff] }
 0x1b3   : > { %v6660_v54 = vpop.f32.mrf.mxu0  ;;  %v801_v37 = vld [vmem:[%s10757_s27 + $0xc88] sm:$0xff]  ;;  %v9289_v42 = vcombine.high %v673_v34, %v677_v35 }
 0x1b4   : > { %6905 = vmatmul.mubr.bf16.vlgmr.msra.gmra.mxu0 %v10851_v16  ;;  %v6661_v57 = vadd.f32 %v6660_v54, %v11103_v63  ;;  %6946 = vmatmul.mubr.bf16.vlgmr.msra.gmra.mxu1 %v10856_v20  ;;  %v6703_v5 = vpop.f32.mrf.mxu1  ;;  %v9441_v63 = vcombine.high %v825_v55, %v829_v56  ;;  %v805_v38 = vld [vmem:[%s10757_s27 + $0xca8] sm:$0xff] }
 0x1b5   : > { %6955 = vmatpush1.bf16.msra.mxu0 %v9328_v45  ;;  %6996 = vmatpush1.bf16.msra.mxu1 %v9456_v46  ;;  %v6662_v62 = vpop.f32.mrf.mxu0  ;;  %v9417_v43 = vcombine.high %v801_v37, %v805_v38  ;;  %v665_v45 = vld [vmem:[%s10757_s27 + $0x848] sm:$0xff] }
 0x1b6   : > { %6956 = vmatprep.subr.bf16.mxu0 %v9321_v49  ;;  %v11176_v3 = vadd.f32 %v6701_v60, %v6661_v57  ;;  %v6663_v4 = vadd.f32 %v6662_v62, %v11108_v9  ;;  %6997 = vmatprep.subr.bf16.mxu1 %v9449_v50  ;;  %v6705_v15 = vpop.f32.mrf.mxu1  ;;  %v9312_v9 = vcombine.low %v697_v52, %v701_v53  ;;  %v669_v46 = vld [vmem:[%s10757_s27 + $0x868] sm:$0xff] }
 0x1b7   : > { %6986 = vmatprep.mubr.bf16.mxu0 %v10861_v28  ;;  %v6664_v10 = vpop.f32.mrf.mxu0  ;;  %7027 = vmatprep.mubr.bf16.mxu1 %v10866_v31  ;;  %v793_v49 = vld [vmem:[%s10757_s27 + $0xc48] sm:$0xff]  ;;  %v9288_v52 = vcombine.low %v673_v34, %v677_v35  ;;  %v9416_v53 = vcombine.low %v801_v37, %v805_v38  ;;  %v9281_v54 = vcombine.high %v665_v45, %v669_v46 }
 0x1b8   : > { %v11185_v13 = vadd.f32 %v6703_v5, %v6663_v4  ;;  %v6706_v22 = vpop.f32.mrf.mxu1  ;;  %v797_v50 = vld [vmem:[%s10757_s27 + $0xc68] sm:$0xff]  ;;  %v9280_v62 = vcombine.low %v665_v45, %v669_v46  ;;  %v9521_v15 = vcombine.high %v905_v7, %v909_v8 }
 0x1b9   : > { %6957 = vmatpush1.bf16.msra.mxu0 %v9320_v61  ;;  %6998 = vmatpush1.bf16.msra.mxu1 %v9448_v0  ;;  %v6665_v17 = vpop.f32.mrf.mxu0  ;;  %v9409_v55 = vcombine.high %v793_v49, %v797_v50  ;;  %v657_v56 = vld [vmem:[%s10757_s27 + $0x808] sm:$0xff]  ;;  %v9408_v0 = vcombine.low %v793_v49, %v797_v50 }
 0x1ba   : > { %6958 = vmatprep.subr.bf16.mxu0 %v9313_v1  ;;  %6999 = vmatprep.subr.bf16.mxu1 %v9441_v63  ;;  %v661_v57 = vld [vmem:[%s10757_s27 + $0x828] sm:$0xff] }
 0x1bb   : > { %v785_v60 = vld [vmem:[%s10757_s27 + $0xc08] sm:$0xff]  ;;  %v9273_v1 = vcombine.high %v657_v56, %v661_v57  ;;  %v9272_v10 = vcombine.low %v657_v56, %v661_v57 }
 0x1bc   : > { %v789_v61 = vld [vmem:[%s10757_s27 + $0xc28] sm:$0xff] }
 0x1bd   : > { %6959 = vmatpush1.bf16.msra.mxu0 %v9312_v9  ;;  %7000 = vmatpush1.bf16.msra.mxu1 %v9440_v19  ;;  %v9401_v4 = vcombine.high %v785_v60, %v789_v61  ;;  %v777_v5 = vld [vmem:[%s10757_s27 + $0xbc8] sm:$0xff]  ;;  %v9400_v11 = vcombine.low %v785_v60, %v789_v61 }
 0x1be   : > { %6960 = vmatprep.subr.bf16.mxu0 %v9305_v21  ;;  %7001 = vmatprep.subr.bf16.mxu1 %v9433_v23  ;;  %v781_v63 = vld [vmem:[%s10757_s27 + $0xbe8] sm:$0xff]  ;;  %v9520_v23 = vcombine.low %v905_v7, %v909_v8 }
 0x1bf   : > { %v9393_v12 = vcombine.high %v777_v5, %v781_v63  ;;  %v769_v9 = vld [vmem:[%s10757_s27 + $0xb88] sm:$0xff]  ;;  %v9392_v22 = vcombine.low %v777_v5, %v781_v63 }
 0x1c0   : > { %v773_v17 = vld [vmem:[%s10757_s27 + $0xba8] sm:$0xff] }
 0x1c1   : > { %6961 = vmatpush1.bf16.msra.mxu0 %v9304_v29  ;;  %7002 = vmatpush1.bf16.msra.mxu1 %v9432_v30  ;;  %v897_v19 = vld [vmem:[%s10757_s27 + $0xf88] sm:$0xff]  ;;  %v9385_v24 = vcombine.high %v769_v9, %v773_v17 }
 0x1c2   : > { %6962 = vmatprep.subr.bf16.mxu0 %v9297_v32  ;;  %7003 = vmatprep.subr.bf16.mxu1 %v9425_v33  ;;  %v901_v21 = vld [vmem:[%s10757_s27 + $0xfa8] sm:$0xff]  ;;  %v9384_v32 = vcombine.low %v769_v9, %v773_v17 }
 0x1c3   : > { %v9513_v25 = vcombine.high %v897_v19, %v901_v21  ;;  %v761_v26 = vld [vmem:[%s10757_s27 + $0xb48] sm:$0xff]  ;;  %v9512_v33 = vcombine.low %v897_v19, %v901_v21 }
 0x1c4   : > { %v765_v27 = vld [vmem:[%s10757_s27 + $0xb68] sm:$0xff] }
 0x1c5   : > { %6963 = vmatpush1.bf16.msra.mxu0 %v9296_v39  ;;  %7004 = vmatpush1.bf16.msra.mxu1 %v9424_v41  ;;  %v889_v29 = vld [vmem:[%s10757_s27 + $0xf48] sm:$0xff]  ;;  %v9377_v34 = vcombine.high %v761_v26, %v765_v27 }
 0x1c6   : > { %6964 = vmatprep.subr.bf16.mxu0 %v9289_v42  ;;  %7005 = vmatprep.subr.bf16.mxu1 %v9417_v43  ;;  %v893_v30 = vld [vmem:[%s10757_s27 + $0xf68] sm:$0xff]  ;;  %v9376_v42 = vcombine.low %v761_v26, %v765_v27 }
 0x1c7   : > { %v9505_v35 = vcombine.high %v889_v29, %v893_v30  ;;  %v753_v37 = vld [vmem:[%s10757_s27 + $0xb08] sm:$0xff]  ;;  %v9504_v43 = vcombine.low %v889_v29, %v893_v30 }
 0x1c8   : > { %v757_v38 = vld [vmem:[%s10757_s27 + $0xb28] sm:$0xff] }
 0x1c9   : > { %6965 = vmatpush1.bf16.msra.mxu0 %v9288_v52  ;;  %7006 = vmatpush1.bf16.msra.mxu1 %v9416_v53  ;;  %v881_v39 = vld [vmem:[%s10757_s27 + $0xf08] sm:$0xff]  ;;  %v9369_v45 = vcombine.high %v753_v37, %v757_v38 }
 0x1ca   : > { %6966 = vmatprep.subr.bf16.mxu0 %v9281_v54  ;;  %7007 = vmatprep.subr.bf16.mxu1 %v9409_v55  ;;  %v885_v41 = vld [vmem:[%s10757_s27 + $0xf28] sm:$0xff]  ;;  %v9368_v54 = vcombine.low %v753_v37, %v757_v38 }
 0x1cb   : > { %v9497_v46 = vcombine.high %v881_v39, %v885_v41  ;;  %v745_v49 = vld [vmem:[%s10757_s27 + $0xac8] sm:$0xff]  ;;  %v9496_v55 = vcombine.low %v881_v39, %v885_v41 }
 0x1cc   : > { %v749_v50 = vld [vmem:[%s10757_s27 + $0xae8] sm:$0xff] }
 0x1cd   : > { %6967 = vmatpush1.bf16.msra.mxu0 %v9280_v62  ;;  %7008 = vmatpush1.bf16.msra.mxu1 %v9408_v0  ;;  %v873_v52 = vld [vmem:[%s10757_s27 + $0xec8] sm:$0xff]  ;;  %v9361_v56 = vcombine.high %v745_v49, %v749_v50 }
 0x1ce   : > { %6968 = vmatprep.subr.bf16.mxu0 %v9273_v1  ;;  %7009 = vmatprep.subr.bf16.mxu1 %v9401_v4  ;;  %v877_v53 = vld [vmem:[%s10757_s27 + $0xee8] sm:$0xff]  ;;  %v9360_v1 = vcombine.low %v745_v49, %v749_v50 }
 0x1cf   : > { %v9489_v57 = vcombine.high %v873_v52, %v877_v53  ;;  %v737_v60 = vld [vmem:[%s10757_s27 + $0xa88] sm:$0xff]  ;;  %v9488_v4 = vcombine.low %v873_v52, %v877_v53 }
 0x1d0   : > { %v741_v61 = vld [vmem:[%s10757_s27 + $0xaa8] sm:$0xff] }
 0x1d1   : > { %6969 = vmatpush1.bf16.msra.mxu0 %v9272_v10  ;;  %7010 = vmatpush1.bf16.msra.mxu1 %v9400_v11  ;;  %v865_v62 = vld [vmem:[%s10757_s27 + $0xe88] sm:$0xff]  ;;  %v9353_v5 = vcombine.high %v737_v60, %v741_v61 }
 0x1d2   : > { %6970 = vmatprep.subr.bf16.mxu0 %v9393_v12  ;;  %7011 = vmatprep.subr.bf16.mxu1 %v9521_v15  ;;  %v869_v0 = vld [vmem:[%s10757_s27 + $0xea8] sm:$0xff]  ;;  %v9352_v12 = vcombine.low %v737_v60, %v741_v61 }
 0x1d3   : > { %v9481_v63 = vcombine.high %v865_v62, %v869_v0  ;;  %v729_v7 = vld [vmem:[%s10757_s27 + $0xa48] sm:$0xff]  ;;  %v9480_v15 = vcombine.low %v865_v62, %v869_v0 }
 0x1d4   : > { %v733_v8 = vld [vmem:[%s10757_s27 + $0xa68] sm:$0xff] }
 0x1d5   : > { %6971 = vmatpush2.bf16.msra.mxu0 %v9392_v22  ;;  %7012 = vmatpush2.bf16.msra.mxu1 %v9520_v23  ;;  %v857_v10 = vld [vmem:[%s10757_s27 + $0xe48] sm:$0xff]  ;;  %v9345_v9 = vcombine.high %v729_v7, %v733_v8 }
 0x1d6   : > { %6972 = vmatprep.subr.bf16.mxu0 %v9385_v24  ;;  %7013 = vmatprep.subr.bf16.mxu1 %v9513_v25  ;;  %v861_v11 = vld [vmem:[%s10757_s27 + $0xe68] sm:$0xff]  ;;  %v9344_v24 = vcombine.low %v729_v7, %v733_v8 }
 0x1d7   : > { %v9473_v17 = vcombine.high %v857_v10, %v861_v11  ;;  %v721_v19 = vld [vmem:[%s10757_s27 + $0xa08] sm:$0xff]  ;;  %v9472_v25 = vcombine.low %v857_v10, %v861_v11 }
 0x1d8   : > { %v725_v21 = vld [vmem:[%s10757_s27 + $0xa28] sm:$0xff] }
 0x1d9   : > { %6973 = vmatpush2.bf16.msra.mxu0 %v9384_v32  ;;  %7014 = vmatpush2.bf16.msra.mxu1 %v9512_v33  ;;  %v849_v22 = vld [vmem:[%s10757_s27 + $0xe08] sm:$0xff]  ;;  %v9337_v26 = vcombine.high %v721_v19, %v725_v21 }
 0x1da   : > { %6974 = vmatprep.subr.bf16.mxu0 %v9377_v34  ;;  %7015 = vmatprep.subr.bf16.mxu1 %v9505_v35  ;;  %v853_v23 = vld [vmem:[%s10757_s27 + $0xe28] sm:$0xff]  ;;  %v9336_v34 = vcombine.low %v721_v19, %v725_v21 }
 0x1db   : > { %v9465_v27 = vcombine.high %v849_v22, %v853_v23  ;;  %v969_v29 = vld [vmem:[%s10757_s27 + $0x11c8] sm:$0xff]  ;;  %v9464_v35 = vcombine.low %v849_v22, %v853_v23 }
 0x1dc   : > { %v973_v30 = vld [vmem:[%s10757_s27 + $0x11e8] sm:$0xff] }
 0x1dd   : > { %6975 = vmatpush2.bf16.msra.mxu0 %v9376_v42  ;;  %7016 = vmatpush2.bf16.msra.mxu1 %v9504_v43  ;;  %v1097_v32 = vld [vmem:[%s10757_s27 + $0x15c8] sm:$0xff]  ;;  %v9585_v37 = vcombine.high %v969_v29, %v973_v30 }
 0x1de   : > { %6976 = vmatprep.subr.bf16.mxu0 %v9369_v45  ;;  %7017 = vmatprep.subr.bf16.mxu1 %v9497_v46  ;;  %v1101_v33 = vld [vmem:[%s10757_s27 + $0x15e8] sm:$0xff]  ;;  %v9584_v45 = vcombine.low %v969_v29, %v973_v30 }
 0x1df   : > { %v9713_v38 = vcombine.high %v1097_v32, %v1101_v33  ;;  %v961_v39 = vld [vmem:[%s10757_s27 + $0x1188] sm:$0xff]  ;;  %v9712_v46 = vcombine.low %v1097_v32, %v1101_v33 }
 0x1e0   : > { %v965_v41 = vld [vmem:[%s10757_s27 + $0x11a8] sm:$0xff] }
 0x1e1   : > { %6977 = vmatpush2.bf16.msra.mxu0 %v9368_v54  ;;  %7018 = vmatpush2.bf16.msra.mxu1 %v9496_v55  ;;  %v1089_v42 = vld [vmem:[%s10757_s27 + $0x1588] sm:$0xff]  ;;  %v9577_v49 = vcombine.high %v961_v39, %v965_v41  ;;  %v9576_v61 = vcombine.low %v961_v39, %v965_v41 }
 0x1e2   : > { %6978 = vmatprep.subr.bf16.mxu0 %v9361_v56  ;;  %7019 = vmatprep.subr.bf16.mxu1 %v9489_v57  ;;  %v1093_v43 = vld [vmem:[%s10757_s27 + $0x15a8] sm:$0xff] }
 0x1e3   : > { %v9705_v50 = vcombine.high %v1089_v42, %v1093_v43  ;;  %v953_v52 = vld [vmem:[%s10757_s27 + $0x1148] sm:$0xff]  ;;  %v9704_v0 = vcombine.low %v1089_v42, %v1093_v43 }
 0x1e4   : > { %v957_v53 = vld [vmem:[%s10757_s27 + $0x1168] sm:$0xff] }
 0x1e5   : > { %6979 = vmatpush2.bf16.msra.mxu0 %v9360_v1  ;;  %7020 = vmatpush2.bf16.msra.mxu1 %v9488_v4  ;;  %v1081_v55 = vld [vmem:[%s10757_s27 + $0x1548] sm:$0xff]  ;;  %v9569_v1 = vcombine.high %v953_v52, %v957_v53 }
 0x1e6   : > { %6980 = vmatprep.subr.bf16.mxu0 %v9353_v5  ;;  %7021 = vmatprep.subr.bf16.mxu1 %v9481_v63  ;;  %v1085_v56 = vld [vmem:[%s10757_s27 + $0x1568] sm:$0xff] }
 0x1e7   : > { %v945_v7 = vld [vmem:[%s10757_s27 + $0x1108] sm:$0xff]  ;;  %v9696_v19 = vcombine.low %v1081_v55, %v1085_v56 }
 0x1e8   : > { %v949_v8 = vld [vmem:[%s10757_s27 + $0x1128] sm:$0xff] }
 0x1e9   : > { %6981 = vmatpush2.bf16.msra.mxu0 %v9352_v12  ;;  %7022 = vmatpush2.bf16.msra.mxu1 %v9480_v15  ;;  %v1073_v11 = vld [vmem:[%s10757_s27 + $0x1508] sm:$0xff]  ;;  %v9561_v21 = vcombine.high %v945_v7, %v949_v8  ;;  %v9560_v29 = vcombine.low %v945_v7, %v949_v8 }
 0x1ea   : > { %6982 = vmatprep.subr.bf16.mxu0 %v9345_v9  ;;  %7023 = vmatprep.subr.bf16.mxu1 %v9473_v17  ;;  %v1077_v12 = vld [vmem:[%s10757_s27 + $0x1528] sm:$0xff] }
 0x1eb   : > { %v9689_v23 = vcombine.high %v1073_v11, %v1077_v12  ;;  %v9688_v30 = vcombine.low %v1073_v11, %v1077_v12  ;;  %v1161_v7 = vld [vmem:[%s10757_s27 + $0x17c8] sm:$0xff] }
 0x1ec   : > { %v1165_v8 = vld [vmem:[%s10757_s27 + $0x17e8] sm:$0xff] }
 0x1ed   : > { %6983 = vmatpush2.bf16.msra.mxu0 %v9344_v24  ;;  %7024 = vmatpush2.bf16.msra.mxu1 %v9472_v25  ;;  %v937_v24 = vld [vmem:[%s10757_s27 + $0x10c8] sm:$0xff] }
 0x1ee   : > { %6984 = vmatprep.subr.bf16.mxu0 %v9337_v26  ;;  %7025 = vmatprep.subr.bf16.mxu1 %v9465_v27  ;;  %v941_v25 = vld [vmem:[%s10757_s27 + $0x10e8] sm:$0xff] }
 0x1ef   : > { %v1065_v26 = vld [vmem:[%s10757_s27 + $0x14c8] sm:$0xff]  ;;  %v9553_v32 = vcombine.high %v937_v24, %v941_v25  ;;  %v9552_v39 = vcombine.low %v937_v24, %v941_v25 }
 0x1f0   : > { %v1069_v27 = vld [vmem:[%s10757_s27 + $0x14e8] sm:$0xff] }
 0x1f1   : > { %6985 = vmatpush2.bf16.msra.mxu0 %v9336_v34  ;;  %7026 = vmatpush2.bf16.msra.mxu1 %v9464_v35  ;;  %v9681_v33 = vcombine.high %v1065_v26, %v1069_v27  ;;  %v929_v34 = vld [vmem:[%s10757_s27 + $0x1088] sm:$0xff]  ;;  %v9680_v41 = vcombine.low %v1065_v26, %v1069_v27 }
 0x1f2   : > { %7036 = vmatprep.subr.bf16.mxu0 %v9585_v37  ;;  %7077 = vmatprep.subr.bf16.mxu1 %v9713_v38  ;;  %v933_v35 = vld [vmem:[%s10757_s27 + $0x10a8] sm:$0xff] }
 0x1f3   : > { %v6783_v60 = vpop.f32.mrf.mxu1  ;;  %v1057_v37 = vld [vmem:[%s10757_s27 + $0x1488] sm:$0xff]  ;;  %v9545_v42 = vcombine.high %v929_v34, %v933_v35 }
 0x1f4   : > { %v6742_v54 = vpop.f32.mrf.mxu0  ;;  %6987 = vmatmul.mubr.bf16.vlgmr.msra.gmra.mxu0 %v10931_v36  ;;  %7028 = vmatmul.mubr.bf16.vlgmr.msra.gmra.mxu1 %v10936_v40  ;;  %v1061_v38 = vld [vmem:[%s10757_s27 + $0x14a8] sm:$0xff] }
 0x1f5   : > { %v6743_v57 = vadd.f32 %v6742_v54, %v11176_v3  ;;  %7037 = vmatpush1.bf16.msra.mxu0 %v9584_v45  ;;  %7078 = vmatpush1.bf16.msra.mxu1 %v9712_v46  ;;  %v6785_v63 = vpop.f32.mrf.mxu1  ;;  %v9697_v3 = vcombine.high %v1081_v55, %v1085_v56  ;;  %v9673_v43 = vcombine.high %v1057_v37, %v1061_v38  ;;  %v921_v45 = vld [vmem:[%s10757_s27 + $0x1048] sm:$0xff] }
 0x1f6   : > { %v6744_v62 = vpop.f32.mrf.mxu0  ;;  %7038 = vmatprep.subr.bf16.mxu0 %v9577_v49  ;;  %7079 = vmatprep.subr.bf16.mxu1 %v9705_v50  ;;  %v925_v46 = vld [vmem:[%s10757_s27 + $0x1068] sm:$0xff] }
 0x1f7   : > { %v11250_v4 = vadd.f32 %v6783_v60, %v6743_v57  ;;  %v6745_v5 = vadd.f32 %v6744_v62, %v11185_v13  ;;  %7068 = vmatprep.mubr.bf16.mxu0 %v10941_v48  ;;  %7109 = vmatprep.mubr.bf16.mxu1 %v10946_v51  ;;  %v6787_v9 = vpop.f32.mrf.mxu1  ;;  %v9568_v13 = vcombine.low %v953_v52, %v957_v53  ;;  %v1049_v49 = vld [vmem:[%s10757_s27 + $0x1448] sm:$0xff] }
 0x1f8   : > { %v6746_v10 = vpop.f32.mrf.mxu0  ;;  %v1053_v50 = vld [vmem:[%s10757_s27 + $0x1468] sm:$0xff]  ;;  %v9544_v52 = vcombine.low %v929_v34, %v933_v35  ;;  %v9672_v53 = vcombine.low %v1057_v37, %v1061_v38  ;;  %v9537_v54 = vcombine.high %v921_v45, %v925_v46  ;;  %v9536_v62 = vcombine.low %v921_v45, %v925_v46 }
 0x1f9   : > { %v11259_v15 = vadd.f32 %v6785_v63, %v6745_v5  ;;  %7039 = vmatpush1.bf16.msra.mxu0 %v9576_v61  ;;  %7080 = vmatpush1.bf16.msra.mxu1 %v9704_v0  ;;  %v6788_v22 = vpop.f32.mrf.mxu1  ;;  %v9665_v55 = vcombine.high %v1049_v49, %v1053_v50  ;;  %v913_v56 = vld [vmem:[%s10757_s27 + $0x1008] sm:$0xff]  ;;  %v9664_v0 = vcombine.low %v1049_v49, %v1053_v50 }
 0x1fa   : > { %v6747_v17 = vpop.f32.mrf.mxu0  ;;  %7040 = vmatprep.subr.bf16.mxu0 %v9569_v1  ;;  %7081 = vmatprep.subr.bf16.mxu1 %v9697_v3  ;;  %v917_v57 = vld [vmem:[%s10757_s27 + $0x1028] sm:$0xff]  ;;  %v9777_v9 = vcombine.high %v1161_v7, %v1165_v8 }
 0x1fb   : > { %v1041_v60 = vld [vmem:[%s10757_s27 + $0x1408] sm:$0xff]  ;;  %v9529_v1 = vcombine.high %v913_v56, %v917_v57  ;;  %v9528_v10 = vcombine.low %v913_v56, %v917_v57 }
 0x1fc   : > { %v1045_v61 = vld [vmem:[%s10757_s27 + $0x1428] sm:$0xff] }
 0x1fd   : > { %7041 = vmatpush1.bf16.msra.mxu0 %v9568_v13  ;;  %7082 = vmatpush1.bf16.msra.mxu1 %v9696_v19  ;;  %v9657_v5 = vcombine.high %v1041_v60, %v1045_v61  ;;  %v1033_v63 = vld [vmem:[%s10757_s27 + $0x13c8] sm:$0xff]  ;;  %v9656_v11 = vcombine.low %v1041_v60, %v1045_v61 }
 0x1fe   : > { %7042 = vmatprep.subr.bf16.mxu0 %v9561_v21  ;;  %7083 = vmatprep.subr.bf16.mxu1 %v9689_v23  ;;  %v1037_v3 = vld [vmem:[%s10757_s27 + $0x13e8] sm:$0xff]  ;;  %v9776_v23 = vcombine.low %v1161_v7, %v1165_v8 }
 0x1ff   : > { %v9649_v12 = vcombine.high %v1033_v63, %v1037_v3  ;;  %v1025_v13 = vld [vmem:[%s10757_s27 + $0x1388] sm:$0xff]  ;;  %v9648_v22 = vcombine.low %v1033_v63, %v1037_v3 }
 0x200   : > { %v1029_v17 = vld [vmem:[%s10757_s27 + $0x13a8] sm:$0xff] }
 0x201   : > { %7043 = vmatpush1.bf16.msra.mxu0 %v9560_v29  ;;  %7084 = vmatpush1.bf16.msra.mxu1 %v9688_v30  ;;  %v1153_v19 = vld [vmem:[%s10757_s27 + $0x1788] sm:$0xff]  ;;  %v9641_v24 = vcombine.high %v1025_v13, %v1029_v17 }
 0x202   : > { %7044 = vmatprep.subr.bf16.mxu0 %v9553_v32  ;;  %7085 = vmatprep.subr.bf16.mxu1 %v9681_v33  ;;  %v1157_v21 = vld [vmem:[%s10757_s27 + $0x17a8] sm:$0xff]  ;;  %v9640_v32 = vcombine.low %v1025_v13, %v1029_v17 }
 0x203   : > { %v9769_v25 = vcombine.high %v1153_v19, %v1157_v21  ;;  %v1017_v26 = vld [vmem:[%s10757_s27 + $0x1348] sm:$0xff]  ;;  %v9768_v33 = vcombine.low %v1153_v19, %v1157_v21 }
 0x204   : > { %v1021_v27 = vld [vmem:[%s10757_s27 + $0x1368] sm:$0xff] }
 0x205   : > { %7045 = vmatpush1.bf16.msra.mxu0 %v9552_v39  ;;  %7086 = vmatpush1.bf16.msra.mxu1 %v9680_v41  ;;  %v1145_v29 = vld [vmem:[%s10757_s27 + $0x1748] sm:$0xff]  ;;  %v9633_v34 = vcombine.high %v1017_v26, %v1021_v27 }
 0x206   : > { %7046 = vmatprep.subr.bf16.mxu0 %v9545_v42  ;;  %7087 = vmatprep.subr.bf16.mxu1 %v9673_v43  ;;  %v1149_v30 = vld [vmem:[%s10757_s27 + $0x1768] sm:$0xff]  ;;  %v9632_v42 = vcombine.low %v1017_v26, %v1021_v27 }
 0x207   : > { %v9761_v35 = vcombine.high %v1145_v29, %v1149_v30  ;;  %v1009_v37 = vld [vmem:[%s10757_s27 + $0x1308] sm:$0xff]  ;;  %v9760_v43 = vcombine.low %v1145_v29, %v1149_v30 }
 0x208   : > { %v1013_v38 = vld [vmem:[%s10757_s27 + $0x1328] sm:$0xff] }
 0x209   : > { %7047 = vmatpush1.bf16.msra.mxu0 %v9544_v52  ;;  %7088 = vmatpush1.bf16.msra.mxu1 %v9672_v53  ;;  %v1137_v39 = vld [vmem:[%s10757_s27 + $0x1708] sm:$0xff]  ;;  %v9625_v45 = vcombine.high %v1009_v37, %v1013_v38 }
 0x20a   : > { %7048 = vmatprep.subr.bf16.mxu0 %v9537_v54  ;;  %7089 = vmatprep.subr.bf16.mxu1 %v9665_v55  ;;  %v1141_v41 = vld [vmem:[%s10757_s27 + $0x1728] sm:$0xff]  ;;  %v9624_v54 = vcombine.low %v1009_v37, %v1013_v38 }
 0x20b   : > { %v9753_v46 = vcombine.high %v1137_v39, %v1141_v41  ;;  %v1001_v49 = vld [vmem:[%s10757_s27 + $0x12c8] sm:$0xff]  ;;  %v9752_v55 = vcombine.low %v1137_v39, %v1141_v41 }
 0x20c   : > { %v1005_v50 = vld [vmem:[%s10757_s27 + $0x12e8] sm:$0xff] }
 0x20d   : > { %7049 = vmatpush1.bf16.msra.mxu0 %v9536_v62  ;;  %7090 = vmatpush1.bf16.msra.mxu1 %v9664_v0  ;;  %v1129_v52 = vld [vmem:[%s10757_s27 + $0x16c8] sm:$0xff]  ;;  %v9617_v56 = vcombine.high %v1001_v49, %v1005_v50 }
 0x20e   : > { %7050 = vmatprep.subr.bf16.mxu0 %v9529_v1  ;;  %7091 = vmatprep.subr.bf16.mxu1 %v9657_v5  ;;  %v1133_v53 = vld [vmem:[%s10757_s27 + $0x16e8] sm:$0xff]  ;;  %v9616_v1 = vcombine.low %v1001_v49, %v1005_v50 }
 0x20f   : > { %v9745_v57 = vcombine.high %v1129_v52, %v1133_v53  ;;  %v993_v60 = vld [vmem:[%s10757_s27 + $0x1288] sm:$0xff]  ;;  %v9744_v5 = vcombine.low %v1129_v52, %v1133_v53 }
 0x210   : > { %v997_v61 = vld [vmem:[%s10757_s27 + $0x12a8] sm:$0xff] }
 0x211   : > { %7051 = vmatpush1.bf16.msra.mxu0 %v9528_v10  ;;  %7092 = vmatpush1.bf16.msra.mxu1 %v9656_v11  ;;  %v1121_v62 = vld [vmem:[%s10757_s27 + $0x1688] sm:$0xff]  ;;  %v9609_v63 = vcombine.high %v993_v60, %v997_v61 }
 0x212   : > { %7052 = vmatprep.subr.bf16.mxu0 %v9649_v12  ;;  %7093 = vmatprep.subr.bf16.mxu1 %v9777_v9  ;;  %v1125_v0 = vld [vmem:[%s10757_s27 + $0x16a8] sm:$0xff]  ;;  %v9608_v12 = vcombine.low %v993_v60, %v997_v61 }
 0x213   : > { %v9737_v3 = vcombine.high %v1121_v62, %v1125_v0  ;;  %v985_v7 = vld [vmem:[%s10757_s27 + $0x1248] sm:$0xff]  ;;  %v9736_v9 = vcombine.low %v1121_v62, %v1125_v0 }
 0x214   : > { %v989_v8 = vld [vmem:[%s10757_s27 + $0x1268] sm:$0xff] }
 0x215   : > { %7053 = vmatpush2.bf16.msra.mxu0 %v9648_v22  ;;  %7094 = vmatpush2.bf16.msra.mxu1 %v9776_v23  ;;  %v1113_v10 = vld [vmem:[%s10757_s27 + $0x1648] sm:$0xff]  ;;  %v9601_v13 = vcombine.high %v985_v7, %v989_v8 }
 0x216   : > { %7054 = vmatprep.subr.bf16.mxu0 %v9641_v24  ;;  %7095 = vmatprep.subr.bf16.mxu1 %v9769_v25  ;;  %v1117_v11 = vld [vmem:[%s10757_s27 + $0x1668] sm:$0xff]  ;;  %v9600_v24 = vcombine.low %v985_v7, %v989_v8 }
 0x217   : > { %v9729_v17 = vcombine.high %v1113_v10, %v1117_v11  ;;  %v977_v19 = vld [vmem:[%s10757_s27 + $0x1208] sm:$0xff]  ;;  %v9728_v25 = vcombine.low %v1113_v10, %v1117_v11 }
 0x218   : > { %v981_v21 = vld [vmem:[%s10757_s27 + $0x1228] sm:$0xff] }
 0x219   : > { %7055 = vmatpush2.bf16.msra.mxu0 %v9640_v32  ;;  %7096 = vmatpush2.bf16.msra.mxu1 %v9768_v33  ;;  %v1105_v22 = vld [vmem:[%s10757_s27 + $0x1608] sm:$0xff]  ;;  %v9593_v26 = vcombine.high %v977_v19, %v981_v21 }
 0x21a   : > { %7056 = vmatprep.subr.bf16.mxu0 %v9633_v34  ;;  %7097 = vmatprep.subr.bf16.mxu1 %v9761_v35  ;;  %v1109_v23 = vld [vmem:[%s10757_s27 + $0x1628] sm:$0xff]  ;;  %v9592_v34 = vcombine.low %v977_v19, %v981_v21 }
 0x21b   : > { %v9721_v27 = vcombine.high %v1105_v22, %v1109_v23  ;;  %v1225_v29 = vld [vmem:[%s10757_s27 + $0x19c8] sm:$0xff]  ;;  %v9720_v35 = vcombine.low %v1105_v22, %v1109_v23 }
 0x21c   : > { %v1229_v30 = vld [vmem:[%s10757_s27 + $0x19e8] sm:$0xff] }
 0x21d   : > { %7057 = vmatpush2.bf16.msra.mxu0 %v9632_v42  ;;  %7098 = vmatpush2.bf16.msra.mxu1 %v9760_v43  ;;  %v1353_v32 = vld [vmem:[%s10757_s27 + $0x1dc8] sm:$0xff]  ;;  %v9841_v37 = vcombine.high %v1225_v29, %v1229_v30 }
 0x21e   : > { %7058 = vmatprep.subr.bf16.mxu0 %v9625_v45  ;;  %7099 = vmatprep.subr.bf16.mxu1 %v9753_v46  ;;  %v1357_v33 = vld [vmem:[%s10757_s27 + $0x1de8] sm:$0xff]  ;;  %v9840_v45 = vcombine.low %v1225_v29, %v1229_v30 }
 0x21f   : > { %v9969_v38 = vcombine.high %v1353_v32, %v1357_v33  ;;  %v1217_v39 = vld [vmem:[%s10757_s27 + $0x1988] sm:$0xff]  ;;  %v9968_v46 = vcombine.low %v1353_v32, %v1357_v33 }
 0x220   : > { %v1221_v41 = vld [vmem:[%s10757_s27 + $0x19a8] sm:$0xff] }
 0x221   : > { %7059 = vmatpush2.bf16.msra.mxu0 %v9624_v54  ;;  %7100 = vmatpush2.bf16.msra.mxu1 %v9752_v55  ;;  %v1345_v42 = vld [vmem:[%s10757_s27 + $0x1d88] sm:$0xff]  ;;  %v9833_v49 = vcombine.high %v1217_v39, %v1221_v41  ;;  %v9832_v61 = vcombine.low %v1217_v39, %v1221_v41 }
 0x222   : > { %7060 = vmatprep.subr.bf16.mxu0 %v9617_v56  ;;  %7101 = vmatprep.subr.bf16.mxu1 %v9745_v57  ;;  %v1349_v43 = vld [vmem:[%s10757_s27 + $0x1da8] sm:$0xff] }
 0x223   : > { %v9961_v50 = vcombine.high %v1345_v42, %v1349_v43  ;;  %v1209_v52 = vld [vmem:[%s10757_s27 + $0x1948] sm:$0xff]  ;;  %v9960_v0 = vcombine.low %v1345_v42, %v1349_v43 }
 0x224   : > { %v1213_v53 = vld [vmem:[%s10757_s27 + $0x1968] sm:$0xff] }
 0x225   : > { %7061 = vmatpush2.bf16.msra.mxu0 %v9616_v1  ;;  %7102 = vmatpush2.bf16.msra.mxu1 %v9744_v5  ;;  %v1337_v55 = vld [vmem:[%s10757_s27 + $0x1d48] sm:$0xff]  ;;  %v9825_v1 = vcombine.high %v1209_v52, %v1213_v53 }
 0x226   : > { %7062 = vmatprep.subr.bf16.mxu0 %v9609_v63  ;;  %7103 = vmatprep.subr.bf16.mxu1 %v9737_v3  ;;  %v1341_v56 = vld [vmem:[%s10757_s27 + $0x1d68] sm:$0xff] }
 0x227   : > { %v1201_v7 = vld [vmem:[%s10757_s27 + $0x1908] sm:$0xff]  ;;  %v9952_v19 = vcombine.low %v1337_v55, %v1341_v56 }
 0x228   : > { %v1205_v8 = vld [vmem:[%s10757_s27 + $0x1928] sm:$0xff] }
 0x229   : > { %7063 = vmatpush2.bf16.msra.mxu0 %v9608_v12  ;;  %7104 = vmatpush2.bf16.msra.mxu1 %v9736_v9  ;;  %v1329_v11 = vld [vmem:[%s10757_s27 + $0x1d08] sm:$0xff]  ;;  %v9817_v21 = vcombine.high %v1201_v7, %v1205_v8  ;;  %v9816_v29 = vcombine.low %v1201_v7, %v1205_v8 }
 0x22a   : > { %7064 = vmatprep.subr.bf16.mxu0 %v9601_v13  ;;  %7105 = vmatprep.subr.bf16.mxu1 %v9729_v17  ;;  %v1333_v12 = vld [vmem:[%s10757_s27 + $0x1d28] sm:$0xff] }
 0x22b   : > { %v9945_v23 = vcombine.high %v1329_v11, %v1333_v12  ;;  %v9944_v30 = vcombine.low %v1329_v11, %v1333_v12  ;;  %v1417_v7 = vld [vmem:[%s10757_s27 + $0x1fc8] sm:$0xff] }
 0x22c   : > { %v1421_v8 = vld [vmem:[%s10757_s27 + $0x1fe8] sm:$0xff] }
 0x22d   : > { %7065 = vmatpush2.bf16.msra.mxu0 %v9600_v24  ;;  %7106 = vmatpush2.bf16.msra.mxu1 %v9728_v25  ;;  %v1193_v24 = vld [vmem:[%s10757_s27 + $0x18c8] sm:$0xff] }
 0x22e   : > { %7066 = vmatprep.subr.bf16.mxu0 %v9593_v26  ;;  %7107 = vmatprep.subr.bf16.mxu1 %v9721_v27  ;;  %v1197_v25 = vld [vmem:[%s10757_s27 + $0x18e8] sm:$0xff] }
 0x22f   : > { %v1321_v26 = vld [vmem:[%s10757_s27 + $0x1cc8] sm:$0xff]  ;;  %v9809_v32 = vcombine.high %v1193_v24, %v1197_v25  ;;  %v9808_v39 = vcombine.low %v1193_v24, %v1197_v25 }
 0x230   : > { %v1325_v27 = vld [vmem:[%s10757_s27 + $0x1ce8] sm:$0xff] }
 0x231   : > { %7067 = vmatpush2.bf16.msra.mxu0 %v9592_v34  ;;  %7108 = vmatpush2.bf16.msra.mxu1 %v9720_v35  ;;  %v9937_v33 = vcombine.high %v1321_v26, %v1325_v27  ;;  %v1185_v34 = vld [vmem:[%s10757_s27 + $0x1888] sm:$0xff]  ;;  %v9936_v41 = vcombine.low %v1321_v26, %v1325_v27 }
 0x232   : > { %7118 = vmatprep.subr.bf16.mxu0 %v9841_v37  ;;  %7159 = vmatprep.subr.bf16.mxu1 %v9969_v38  ;;  %v1189_v35 = vld [vmem:[%s10757_s27 + $0x18a8] sm:$0xff] }
 0x233   : > { %v1313_v37 = vld [vmem:[%s10757_s27 + $0x1c88] sm:$0xff]  ;;  %v9801_v42 = vcombine.high %v1185_v34, %v1189_v35 }
 0x234   : > { %v6824_v54 = vpop.f32.mrf.mxu0  ;;  %7069 = vmatmul.mubr.bf16.vlgmr.msra.gmra.mxu0 %v11011_v2  ;;  %v6865_v60 = vpop.f32.mrf.mxu1  ;;  %7110 = vmatmul.mubr.bf16.vlgmr.msra.gmra.mxu1 %v11016_v6  ;;  %v1317_v38 = vld [vmem:[%s10757_s27 + $0x1ca8] sm:$0xff] }
 0x235   : > { %v6825_v57 = vadd.f32 %v6824_v54, %v11250_v4  ;;  %7119 = vmatpush1.bf16.msra.mxu0 %v9840_v45  ;;  %7160 = vmatpush1.bf16.msra.mxu1 %v9968_v46  ;;  %v9953_v4 = vcombine.high %v1337_v55, %v1341_v56  ;;  %v9929_v43 = vcombine.high %v1313_v37, %v1317_v38  ;;  %v1177_v45 = vld [vmem:[%s10757_s27 + $0x1848] sm:$0xff] }
 0x236   : > { %v6826_v62 = vpop.f32.mrf.mxu0  ;;  %7120 = vmatprep.subr.bf16.mxu0 %v9833_v49  ;;  %v6867_v3 = vpop.f32.mrf.mxu1  ;;  %7161 = vmatprep.subr.bf16.mxu1 %v9961_v50  ;;  %v1181_v46 = vld [vmem:[%s10757_s27 + $0x1868] sm:$0xff] }
 0x237   : > { %v11324_v5 = vadd.f32 %v6865_v60, %v6825_v57  ;;  %v6827_v63 = vadd.f32 %v6826_v62, %v11259_v15  ;;  %7150 = vmatprep.mubr.bf16.mxu0 %v11021_v14  ;;  %7191 = vmatprep.mubr.bf16.mxu1 %v11026_v18  ;;  %v9824_v15 = vcombine.low %v1209_v52, %v1213_v53  ;;  %v1305_v49 = vld [vmem:[%s10757_s27 + $0x1c48] sm:$0xff] }
 0x238   : > { %v6828_v10 = vpop.f32.mrf.mxu0  ;;  %v6869_v13 = vpop.f32.mrf.mxu1  ;;  %v1309_v50 = vld [vmem:[%s10757_s27 + $0x1c68] sm:$0xff]  ;;  %v9800_v52 = vcombine.low %v1185_v34, %v1189_v35  ;;  %v9928_v53 = vcombine.low %v1313_v37, %v1317_v38  ;;  %v9793_v54 = vcombine.high %v1177_v45, %v1181_v46  ;;  %v9792_v62 = vcombine.low %v1177_v45, %v1181_v46 }
 0x239   : > { %v11333_v9 = vadd.f32 %v6867_v3, %v6827_v63  ;;  %7121 = vmatpush1.bf16.msra.mxu0 %v9832_v61  ;;  %7162 = vmatpush1.bf16.msra.mxu1 %v9960_v0  ;;  %v9921_v55 = vcombine.high %v1305_v49, %v1309_v50  ;;  %v1169_v56 = vld [vmem:[%s10757_s27 + $0x1808] sm:$0xff]  ;;  %v9920_v0 = vcombine.low %v1305_v49, %v1309_v50 }
 0x23a   : > { %v6829_v17 = vpop.f32.mrf.mxu0  ;;  %7122 = vmatprep.subr.bf16.mxu0 %v9825_v1  ;;  %v6870_v22 = vpop.f32.mrf.mxu1  ;;  %7163 = vmatprep.subr.bf16.mxu1 %v9953_v4  ;;  %v1173_v57 = vld [vmem:[%s10757_s27 + $0x1828] sm:$0xff]  ;;  %v10033_v13 = vcombine.high %v1417_v7, %v1421_v8 }
 0x23b   : > { %v1297_v60 = vld [vmem:[%s10757_s27 + $0x1c08] sm:$0xff]  ;;  %v9785_v1 = vcombine.high %v1169_v56, %v1173_v57  ;;  %v9784_v10 = vcombine.low %v1169_v56, %v1173_v57 }
 0x23c   : > { %v1301_v61 = vld [vmem:[%s10757_s27 + $0x1c28] sm:$0xff] }
 0x23d   : > { %7123 = vmatpush1.bf16.msra.mxu0 %v9824_v15  ;;  %7164 = vmatpush1.bf16.msra.mxu1 %v9952_v19  ;;  %v9913_v63 = vcombine.high %v1297_v60, %v1301_v61  ;;  %v1289_v3 = vld [vmem:[%s10757_s27 + $0x1bc8] sm:$0xff]  ;;  %v9912_v11 = vcombine.low %v1297_v60, %v1301_v61 }
 0x23e   : > { %7124 = vmatprep.subr.bf16.mxu0 %v9817_v21  ;;  %7165 = vmatprep.subr.bf16.mxu1 %v9945_v23  ;;  %v1293_v4 = vld [vmem:[%s10757_s27 + $0x1be8] sm:$0xff]  ;;  %v10032_v23 = vcombine.low %v1417_v7, %v1421_v8 }
 0x23f   : > { %v9905_v12 = vcombine.high %v1289_v3, %v1293_v4  ;;  %v1281_v15 = vld [vmem:[%s10757_s27 + $0x1b88] sm:$0xff]  ;;  %v9904_v22 = vcombine.low %v1289_v3, %v1293_v4 }
 0x240   : > { %v1285_v17 = vld [vmem:[%s10757_s27 + $0x1ba8] sm:$0xff] }
 0x241   : > { %7125 = vmatpush1.bf16.msra.mxu0 %v9816_v29  ;;  %7166 = vmatpush1.bf16.msra.mxu1 %v9944_v30  ;;  %v1409_v19 = vld [vmem:[%s10757_s27 + $0x1f88] sm:$0xff]  ;;  %v9897_v24 = vcombine.high %v1281_v15, %v1285_v17 }
 0x242   : > { %7126 = vmatprep.subr.bf16.mxu0 %v9809_v32  ;;  %7167 = vmatprep.subr.bf16.mxu1 %v9937_v33  ;;  %v1413_v21 = vld [vmem:[%s10757_s27 + $0x1fa8] sm:$0xff]  ;;  %v9896_v32 = vcombine.low %v1281_v15, %v1285_v17 }
 0x243   : > { %v10025_v25 = vcombine.high %v1409_v19, %v1413_v21  ;;  %v1273_v26 = vld [vmem:[%s10757_s27 + $0x1b48] sm:$0xff]  ;;  %v10024_v33 = vcombine.low %v1409_v19, %v1413_v21 }
 0x244   : > { %v1277_v27 = vld [vmem:[%s10757_s27 + $0x1b68] sm:$0xff] }
 0x245   : > { %7127 = vmatpush1.bf16.msra.mxu0 %v9808_v39  ;;  %7168 = vmatpush1.bf16.msra.mxu1 %v9936_v41  ;;  %v1401_v29 = vld [vmem:[%s10757_s27 + $0x1f48] sm:$0xff]  ;;  %v9889_v34 = vcombine.high %v1273_v26, %v1277_v27 }
 0x246   : > { %7128 = vmatprep.subr.bf16.mxu0 %v9801_v42  ;;  %7169 = vmatprep.subr.bf16.mxu1 %v9929_v43  ;;  %v1405_v30 = vld [vmem:[%s10757_s27 + $0x1f68] sm:$0xff]  ;;  %v9888_v42 = vcombine.low %v1273_v26, %v1277_v27 }
 0x247   : > { %v10017_v35 = vcombine.high %v1401_v29, %v1405_v30  ;;  %v1265_v37 = vld [vmem:[%s10757_s27 + $0x1b08] sm:$0xff]  ;;  %v10016_v43 = vcombine.low %v1401_v29, %v1405_v30  ;;  %v458_v29 = vld [vmem:[%s10757_s27 + $0x1d0] sm:$0xff] }
 0x248   : > { %v1269_v38 = vld [vmem:[%s10757_s27 + $0x1b28] sm:$0xff]  ;;  %v462_v30 = vld [vmem:[%s10757_s27 + $0x1f0] sm:$0xff] }
 0x249   : > { %7129 = vmatpush1.bf16.msra.mxu0 %v9800_v52  ;;  %7170 = vmatpush1.bf16.msra.mxu1 %v9928_v53  ;;  %v1393_v39 = vld [vmem:[%s10757_s27 + $0x1f08] sm:$0xff]  ;;  %v9881_v45 = vcombine.high %v1265_v37, %v1269_v38 }
 0x24a   : > { %7130 = vmatprep.subr.bf16.mxu0 %v9793_v54  ;;  %7171 = vmatprep.subr.bf16.mxu1 %v9921_v55  ;;  %v1397_v41 = vld [vmem:[%s10757_s27 + $0x1f28] sm:$0xff]  ;;  %v9880_v54 = vcombine.low %v1265_v37, %v1269_v38  ;;  %v9075_v37 = vcombine.high %v458_v29, %v462_v30 }
 0x24b   : > { %v10009_v46 = vcombine.high %v1393_v39, %v1397_v41  ;;  %v1257_v49 = vld [vmem:[%s10757_s27 + $0x1ac8] sm:$0xff]  ;;  %v10008_v55 = vcombine.low %v1393_v39, %v1397_v41  ;;  %v450_v39 = vld [vmem:[%s10757_s27 + $0x190] sm:$0xff] }
 0x24c   : > { %v1261_v50 = vld [vmem:[%s10757_s27 + $0x1ae8] sm:$0xff]  ;;  %v454_v41 = vld [vmem:[%s10757_s27 + $0x1b0] sm:$0xff] }
 0x24d   : > { %7131 = vmatpush1.bf16.msra.mxu0 %v9792_v62  ;;  %7172 = vmatpush1.bf16.msra.mxu1 %v9920_v0  ;;  %v1385_v52 = vld [vmem:[%s10757_s27 + $0x1ec8] sm:$0xff]  ;;  %v9873_v56 = vcombine.high %v1257_v49, %v1261_v50 }
 0x24e   : > { %7132 = vmatprep.subr.bf16.mxu0 %v9785_v1  ;;  %7173 = vmatprep.subr.bf16.mxu1 %v9913_v63  ;;  %v1389_v53 = vld [vmem:[%s10757_s27 + $0x1ee8] sm:$0xff]  ;;  %v9872_v1 = vcombine.low %v1257_v49, %v1261_v50  ;;  %v9067_v49 = vcombine.high %v450_v39, %v454_v41 }
 0x24f   : > { %v10001_v57 = vcombine.high %v1385_v52, %v1389_v53  ;;  %v1249_v60 = vld [vmem:[%s10757_s27 + $0x1a88] sm:$0xff]  ;;  %v10000_v63 = vcombine.low %v1385_v52, %v1389_v53  ;;  %v442_v52 = vld [vmem:[%s10757_s27 + $0x150] sm:$0xff] }
 0x250   : > { %v1253_v61 = vld [vmem:[%s10757_s27 + $0x1aa8] sm:$0xff]  ;;  %v446_v53 = vld [vmem:[%s10757_s27 + $0x170] sm:$0xff] }
 0x251   : > { %7133 = vmatpush1.bf16.msra.mxu0 %v9784_v10  ;;  %7174 = vmatpush1.bf16.msra.mxu1 %v9912_v11  ;;  %v1377_v62 = vld [vmem:[%s10757_s27 + $0x1e88] sm:$0xff]  ;;  %v9865_v3 = vcombine.high %v1249_v60, %v1253_v61 }
 0x252   : > { %7134 = vmatprep.subr.bf16.mxu0 %v9905_v12  ;;  %7175 = vmatprep.subr.bf16.mxu1 %v10033_v13  ;;  %v1381_v0 = vld [vmem:[%s10757_s27 + $0x1ea8] sm:$0xff]  ;;  %v9864_v12 = vcombine.low %v1249_v60, %v1253_v61  ;;  %v9066_v60 = vcombine.low %v450_v39, %v454_v41 }
 0x253   : > { %v9993_v4 = vcombine.high %v1377_v62, %v1381_v0  ;;  %v1241_v7 = vld [vmem:[%s10757_s27 + $0x1a48] sm:$0xff]  ;;  %v9992_v13 = vcombine.low %v1377_v62, %v1381_v0 }
 0x254   : > { %v1245_v8 = vld [vmem:[%s10757_s27 + $0x1a68] sm:$0xff] }
 0x255   : > { %7135 = vmatpush2.bf16.msra.mxu0 %v9904_v22  ;;  %7176 = vmatpush2.bf16.msra.mxu1 %v10032_v23  ;;  %v1369_v10 = vld [vmem:[%s10757_s27 + $0x1e48] sm:$0xff]  ;;  %v9857_v15 = vcombine.high %v1241_v7, %v1245_v8 }
 0x256   : > { %7136 = vmatprep.subr.bf16.mxu0 %v9897_v24  ;;  %7177 = vmatprep.subr.bf16.mxu1 %v10025_v25  ;;  %v1373_v11 = vld [vmem:[%s10757_s27 + $0x1e68] sm:$0xff]  ;;  %v9856_v24 = vcombine.low %v1241_v7, %v1245_v8  ;;  %v438_v7 = vld [vmem:[%s10757_s27 + $0x130] sm:$0xff] }
 0x257   : > { %v9985_v17 = vcombine.high %v1369_v10, %v1373_v11  ;;  %v1233_v19 = vld [vmem:[%s10757_s27 + $0x1a08] sm:$0xff]  ;;  %v9984_v25 = vcombine.low %v1369_v10, %v1373_v11  ;;  %v562_v11 = vld [vmem:[%s10757_s27 + $0x510] sm:$0xff] }
 0x258   : > { %v1237_v21 = vld [vmem:[%s10757_s27 + $0x1a28] sm:$0xff] }
 0x259   : > { %7137 = vmatpush2.bf16.msra.mxu0 %v9896_v32  ;;  %7178 = vmatpush2.bf16.msra.mxu1 %v10024_v33  ;;  %v1361_v22 = vld [vmem:[%s10757_s27 + $0x1e08] sm:$0xff]  ;;  %v9849_v26 = vcombine.high %v1233_v19, %v1237_v21  ;;  %v586_v32 = vld [vmem:[%s10757_s27 + $0x5d0] sm:$0xff] }
 0x25a   : > { %7138 = vmatprep.subr.bf16.mxu0 %v9889_v34  ;;  %7179 = vmatprep.subr.bf16.mxu1 %v10017_v35  ;;  %v1365_v23 = vld [vmem:[%s10757_s27 + $0x1e28] sm:$0xff]  ;;  %v590_v33 = vld [vmem:[%s10757_s27 + $0x5f0] sm:$0xff]  ;;  %v9848_v34 = vcombine.low %v1233_v19, %v1237_v21 }
 0x25b   : > { %v9977_v27 = vcombine.high %v1361_v22, %v1365_v23  ;;  %v9976_v35 = vcombine.low %v1361_v22, %v1365_v23  ;;  %v9203_v38 = vcombine.high %v586_v32, %v590_v33 }
 0x25d   : > { %7139 = vmatpush2.bf16.msra.mxu0 %v9888_v42  ;;  %7180 = vmatpush2.bf16.msra.mxu1 %v10016_v43  ;;  %v578_v42 = vld [vmem:[%s10757_s27 + $0x590] sm:$0xff] }
 0x25e   : > { %7140 = vmatprep.subr.bf16.mxu0 %v9881_v45  ;;  %7181 = vmatprep.subr.bf16.mxu1 %v10009_v46  ;;  %v582_v43 = vld [vmem:[%s10757_s27 + $0x5b0] sm:$0xff]  ;;  %v9074_v45 = vcombine.low %v458_v29, %v462_v30  ;;  %v9202_v46 = vcombine.low %v586_v32, %v590_v33 }
 0x25f   : > { %v9195_v50 = vcombine.high %v578_v42, %v582_v43  ;;  %v9194_v0 = vcombine.low %v578_v42, %v582_v43 }
 0x261   : > { %7141 = vmatpush2.bf16.msra.mxu0 %v9880_v54  ;;  %7182 = vmatpush2.bf16.msra.mxu1 %v10008_v55  ;;  %v570_v55 = vld [vmem:[%s10757_s27 + $0x550] sm:$0xff] }
 0x262   : > { %7142 = vmatprep.subr.bf16.mxu0 %v9873_v56  ;;  %7183 = vmatprep.subr.bf16.mxu1 %v10001_v57  ;;  %v574_v56 = vld [vmem:[%s10757_s27 + $0x570] sm:$0xff] }
 0x263   : > { %v9186_v19 = vcombine.low %v570_v55, %v574_v56 }
 0x265   : > { %7143 = vmatpush2.bf16.msra.mxu0 %v9872_v1  ;;  %7184 = vmatpush2.bf16.msra.mxu1 %v10000_v63  ;;  %v9059_v1 = vcombine.high %v442_v52, %v446_v53 }
 0x266   : > { %7144 = vmatprep.subr.bf16.mxu0 %v9865_v3  ;;  %7185 = vmatprep.subr.bf16.mxu1 %v9993_v4  ;;  %v9187_v3 = vcombine.high %v570_v55, %v574_v56  ;;  %v434_v4 = vld [vmem:[%s10757_s27 + $0x110] sm:$0xff] }
 0x267   : > { %v9051_v21 = vcombine.high %v434_v4, %v438_v7  ;;  %v9050_v29 = vcombine.low %v434_v4, %v438_v7  ;;  %v402_v56 = vld [vmem:[%s10757_s27 + $0x10] sm:$0xff] }
 0x268   : > { %v522_v4 = vld [vmem:[%s10757_s27 + $0x3d0] sm:$0xff] }
 0x269   : > { %7145 = vmatpush2.bf16.msra.mxu0 %v9864_v12  ;;  %7186 = vmatpush2.bf16.msra.mxu1 %v9992_v13  ;;  %v566_v12 = vld [vmem:[%s10757_s27 + $0x530] sm:$0xff] }
 0x26a   : > { %7146 = vmatprep.subr.bf16.mxu0 %v9857_v15  ;;  %7187 = vmatprep.subr.bf16.mxu1 %v9985_v17  ;;  %v9058_v15 = vcombine.low %v442_v52, %v446_v53  ;;  %v9179_v23 = vcombine.high %v562_v11, %v566_v12  ;;  %v9178_v30 = vcombine.low %v562_v11, %v566_v12  ;;  %v526_v7 = vld [vmem:[%s10757_s27 + $0x3f0] sm:$0xff] }
 0x26b   : > { %v654_v11 = vld [vmem:[%s10757_s27 + $0x7f0] sm:$0xff] }
 0x26d   : > { %7147 = vmatpush2.bf16.msra.mxu0 %v9856_v24  ;;  %7188 = vmatpush2.bf16.msra.mxu1 %v9984_v25  ;;  %v426_v24 = vld [vmem:[%s10757_s27 + $0xd0] sm:$0xff] }
 0x26e   : > { %7148 = vmatprep.subr.bf16.mxu0 %v9849_v26  ;;  %7189 = vmatprep.subr.bf16.mxu1 %v9977_v27  ;;  %v430_v25 = vld [vmem:[%s10757_s27 + $0xf0] sm:$0xff] }
 0x26f   : > { %v554_v26 = vld [vmem:[%s10757_s27 + $0x4d0] sm:$0xff]  ;;  %v9043_v32 = vcombine.high %v426_v24, %v430_v25  ;;  %v9042_v39 = vcombine.low %v426_v24, %v430_v25  ;;  %v9138_v24 = vcombine.low %v522_v4, %v526_v7 }
 0x270   : > { %v558_v27 = vld [vmem:[%s10757_s27 + $0x4f0] sm:$0xff] }
 0x271   : > { %7149 = vmatpush2.bf16.msra.mxu0 %v9848_v34  ;;  %7190 = vmatpush2.bf16.msra.mxu1 %v9976_v35  ;;  %v9171_v33 = vcombine.high %v554_v26, %v558_v27  ;;  %v418_v34 = vld [vmem:[%s10757_s27 + $0x90] sm:$0xff]  ;;  %v9170_v41 = vcombine.low %v554_v26, %v558_v27 }
 0x272   : > { %7200 = vmatprep.subr.bf16.mxu0 %v9075_v37  ;;  %7241 = vmatprep.subr.bf16.mxu1 %v9203_v38  ;;  %v422_v35 = vld [vmem:[%s10757_s27 + $0xb0] sm:$0xff] }
 0x273   : > { %v546_v37 = vld [vmem:[%s10757_s27 + $0x490] sm:$0xff]  ;;  %v9035_v42 = vcombine.high %v418_v34, %v422_v35  ;;  %v9034_v52 = vcombine.low %v418_v34, %v422_v35 }
 0x274   : > { %v6906_v54 = vpop.f32.mrf.mxu0  ;;  %7151 = vmatmul.mubr.bf16.vlgmr.msra.gmra.mxu0 %v11091_v44  ;;  %v6947_v57 = vpop.f32.mrf.mxu1  ;;  %7192 = vmatmul.mubr.bf16.vlgmr.msra.gmra.mxu1 %v11095_v47  ;;  %v550_v38 = vld [vmem:[%s10757_s27 + $0x4b0] sm:$0xff] }
 0x275   : > { %7201 = vmatpush1.bf16.msra.mxu0 %v9074_v45  ;;  %v11397_v61 = vadd.f32 %v6947_v57, %v6906_v54  ;;  %7242 = vmatpush1.bf16.msra.mxu1 %v9202_v46  ;;  %v9163_v43 = vcombine.high %v546_v37, %v550_v38  ;;  %v410_v45 = vld [vmem:[%s10757_s27 + $0x50] sm:$0xff]  ;;  %v9162_v53 = vcombine.low %v546_v37, %v550_v38 }
 0x276   : > { %v6908_v62 = vpop.f32.mrf.mxu0  ;;  %7202 = vmatprep.subr.bf16.mxu0 %v9067_v49  ;;  %v6949_v63 = vpop.f32.mrf.mxu1  ;;  %7243 = vmatprep.subr.bf16.mxu1 %v9195_v50  ;;  %v414_v46 = vld [vmem:[%s10757_s27 + $0x70] sm:$0xff] }
 0x277   : > { %7232 = vmatprep.mubr.bf16.mxu0 %v10803_v58  ;;  %v11402_v8 = vadd.f32 %v6949_v63, %v6908_v62  ;;  %7273 = vmatprep.mubr.bf16.mxu1 %v10805_v59  ;;  %v538_v49 = vld [vmem:[%s10757_s27 + $0x450] sm:$0xff]  ;;  %v9027_v54 = vcombine.high %v410_v45, %v414_v46 }
 0x278   : > { %v6910_v10 = vpop.f32.mrf.mxu0  ;;  %v6951_v13 = vpop.f32.mrf.mxu1  ;;  %v542_v50 = vld [vmem:[%s10757_s27 + $0x470] sm:$0xff] }
 0x279   : > { %7203 = vmatpush1.bf16.msra.mxu0 %v9066_v60  ;;  %7244 = vmatpush1.bf16.msra.mxu1 %v9194_v0  ;;  %v9155_v55 = vcombine.high %v538_v49, %v542_v50  ;;  %v406_v57 = vld [vmem:[%s10757_s27 + $0x30] sm:$0xff]  ;;  %v9026_v0 = vcombine.low %v410_v45, %v414_v46 }
 0x27a   : > { %v6911_v17 = vpop.f32.mrf.mxu0  ;;  %7204 = vmatprep.subr.bf16.mxu0 %v9059_v1  ;;  %v6952_v22 = vpop.f32.mrf.mxu1  ;;  %7245 = vmatprep.subr.bf16.mxu1 %v9187_v3  ;;  %v530_v60 = vld [vmem:[%s10757_s27 + $0x410] sm:$0xff]  ;;  %v9154_v1 = vcombine.low %v538_v49, %v542_v50  ;;  %v9019_v63 = vcombine.high %v402_v56, %v406_v57  ;;  %v9018_v12 = vcombine.low %v402_v56, %v406_v57 }
 0x27b   : > { %v534_v62 = vld [vmem:[%s10757_s27 + $0x430] sm:$0xff] }
 0x27c   : > { %v9147_v3 = vcombine.high %v530_v60, %v534_v62  ;;  %v650_v10 = vld [vmem:[%s10757_s27 + $0x7d0] sm:$0xff]  ;;  %v9146_v13 = vcombine.low %v530_v60, %v534_v62 }
 0x27d   : > { %7205 = vmatpush1.bf16.msra.mxu0 %v9058_v15  ;;  %7246 = vmatpush1.bf16.msra.mxu1 %v9186_v19  ;;  %v9139_v15 = vcombine.high %v522_v4, %v526_v7  ;;  %v9267_v17 = vcombine.high %v650_v10, %v654_v11  ;;  %v514_v19 = vld [vmem:[%s10757_s27 + $0x390] sm:$0xff]  ;;  %v9266_v25 = vcombine.low %v650_v10, %v654_v11 }
 0x27e   : > { %7206 = vmatprep.subr.bf16.mxu0 %v9051_v21  ;;  %7247 = vmatprep.subr.bf16.mxu1 %v9179_v23  ;;  %v518_v21 = vld [vmem:[%s10757_s27 + $0x3b0] sm:$0xff] }
 0x27f   : > { %v642_v22 = vld [vmem:[%s10757_s27 + $0x790] sm:$0xff]  ;;  %v9131_v26 = vcombine.high %v514_v19, %v518_v21  ;;  %v9130_v34 = vcombine.low %v514_v19, %v518_v21 }
 0x280   : > { %v646_v23 = vld [vmem:[%s10757_s27 + $0x7b0] sm:$0xff] }
 0x281   : > { %7207 = vmatpush1.bf16.msra.mxu0 %v9050_v29  ;;  %7248 = vmatpush1.bf16.msra.mxu1 %v9178_v30  ;;  %v9259_v27 = vcombine.high %v642_v22, %v646_v23  ;;  %v506_v29 = vld [vmem:[%s10757_s27 + $0x350] sm:$0xff]  ;;  %v9258_v35 = vcombine.low %v642_v22, %v646_v23 }
 0x282   : > { %7208 = vmatprep.subr.bf16.mxu0 %v9043_v32  ;;  %7249 = vmatprep.subr.bf16.mxu1 %v9171_v33  ;;  %v510_v30 = vld [vmem:[%s10757_s27 + $0x370] sm:$0xff] }
 0x283   : > { %v634_v32 = vld [vmem:[%s10757_s27 + $0x750] sm:$0xff]  ;;  %v9123_v37 = vcombine.high %v506_v29, %v510_v30  ;;  %v9122_v45 = vcombine.low %v506_v29, %v510_v30 }
 0x284   : > { %v638_v33 = vld [vmem:[%s10757_s27 + $0x770] sm:$0xff] }
 0x285   : > { %7209 = vmatpush1.bf16.msra.mxu0 %v9042_v39  ;;  %7250 = vmatpush1.bf16.msra.mxu1 %v9170_v41  ;;  %v9251_v38 = vcombine.high %v634_v32, %v638_v33  ;;  %v498_v39 = vld [vmem:[%s10757_s27 + $0x310] sm:$0xff]  ;;  %v9250_v46 = vcombine.low %v634_v32, %v638_v33 }
 0x286   : > { %7210 = vmatprep.subr.bf16.mxu0 %v9035_v42  ;;  %7251 = vmatprep.subr.bf16.mxu1 %v9163_v43  ;;  %v502_v41 = vld [vmem:[%s10757_s27 + $0x330] sm:$0xff] }
 0x287   : > { %v626_v42 = vld [vmem:[%s10757_s27 + $0x710] sm:$0xff]  ;;  %v9115_v49 = vcombine.high %v498_v39, %v502_v41  ;;  %v9114_v56 = vcombine.low %v498_v39, %v502_v41 }
 0x288   : > { %v630_v43 = vld [vmem:[%s10757_s27 + $0x730] sm:$0xff] }
 0x289   : > { %7211 = vmatpush1.bf16.msra.mxu0 %v9034_v52  ;;  %7252 = vmatpush1.bf16.msra.mxu1 %v9162_v53  ;;  %v9243_v50 = vcombine.high %v626_v42, %v630_v43  ;;  %v490_v52 = vld [vmem:[%s10757_s27 + $0x2d0] sm:$0xff]  ;;  %v9242_v57 = vcombine.low %v626_v42, %v630_v43 }
 0x28a   : > { %7212 = vmatprep.subr.bf16.mxu0 %v9027_v54  ;;  %7253 = vmatprep.subr.bf16.mxu1 %v9155_v55  ;;  %v494_v53 = vld [vmem:[%s10757_s27 + $0x2f0] sm:$0xff] }
 0x28b   : > { %v618_v54 = vld [vmem:[%s10757_s27 + $0x6d0] sm:$0xff]  ;;  %v9107_v60 = vcombine.high %v490_v52, %v494_v53  ;;  %v9106_v4 = vcombine.low %v490_v52, %v494_v53 }
 0x28c   : > { %v622_v55 = vld [vmem:[%s10757_s27 + $0x6f0] sm:$0xff] }
 0x28d   : > { %7213 = vmatpush1.bf16.msra.mxu0 %v9026_v0  ;;  %7254 = vmatpush1.bf16.msra.mxu1 %v9154_v1  ;;  %v9235_v62 = vcombine.high %v618_v54, %v622_v55  ;;  %v482_v0 = vld [vmem:[%s10757_s27 + $0x290] sm:$0xff]  ;;  %v9234_v7 = vcombine.low %v618_v54, %v622_v55 }
 0x28e   : > { %7214 = vmatprep.subr.bf16.mxu0 %v9019_v63  ;;  %7255 = vmatprep.subr.bf16.mxu1 %v9147_v3  ;;  %v486_v1 = vld [vmem:[%s10757_s27 + $0x2b0] sm:$0xff] }
 0x28f   : > { %v610_v63 = vld [vmem:[%s10757_s27 + $0x690] sm:$0xff]  ;;  %v9099_v10 = vcombine.high %v482_v0, %v486_v1  ;;  %v9098_v19 = vcombine.low %v482_v0, %v486_v1 }
 0x290   : > { %v614_v3 = vld [vmem:[%s10757_s27 + $0x6b0] sm:$0xff] }
 0x291   : > { %7215 = vmatpush1.bf16.msra.mxu0 %v9018_v12  ;;  %7256 = vmatpush1.bf16.msra.mxu1 %v9146_v13  ;;  %v9227_v11 = vcombine.high %v610_v63, %v614_v3  ;;  %v474_v12 = vld [vmem:[%s10757_s27 + $0x250] sm:$0xff]  ;;  %v9226_v21 = vcombine.low %v610_v63, %v614_v3 }
 0x292   : > { %7216 = vmatprep.subr.bf16.mxu0 %v9139_v15  ;;  %7257 = vmatprep.subr.bf16.mxu1 %v9267_v17  ;;  %v478_v13 = vld [vmem:[%s10757_s27 + $0x270] sm:$0xff] }
 0x293   : > { %v602_v15 = vld [vmem:[%s10757_s27 + $0x650] sm:$0xff]  ;;  %v9091_v22 = vcombine.high %v474_v12, %v478_v13  ;;  %v9090_v29 = vcombine.low %v474_v12, %v478_v13 }
 0x294   : > { %v606_v17 = vld [vmem:[%s10757_s27 + $0x670] sm:$0xff] }
 0x295   : > { %7217 = vmatpush2.bf16.msra.mxu0 %v9138_v24  ;;  %7258 = vmatpush2.bf16.msra.mxu1 %v9266_v25  ;;  %v9219_v23 = vcombine.high %v602_v15, %v606_v17  ;;  %v466_v24 = vld [vmem:[%s10757_s27 + $0x210] sm:$0xff]  ;;  %v9218_v30 = vcombine.low %v602_v15, %v606_v17 }
 0x296   : > { %7218 = vmatprep.subr.bf16.mxu0 %v9131_v26  ;;  %7259 = vmatprep.subr.bf16.mxu1 %v9259_v27  ;;  %v470_v25 = vld [vmem:[%s10757_s27 + $0x230] sm:$0xff] }
 0x297   : > { %v594_v26 = vld [vmem:[%s10757_s27 + $0x610] sm:$0xff]  ;;  %v9083_v32 = vcombine.high %v466_v24, %v470_v25  ;;  %v9082_v39 = vcombine.low %v466_v24, %v470_v25 }
 0x298   : > { %v598_v27 = vld [vmem:[%s10757_s27 + $0x630] sm:$0xff] }
 0x299   : > { %7219 = vmatpush2.bf16.msra.mxu0 %v9130_v34  ;;  %7260 = vmatpush2.bf16.msra.mxu1 %v9258_v35  ;;  %v9211_v33 = vcombine.high %v594_v26, %v598_v27  ;;  %v714_v34 = vld [vmem:[%s10757_s27 + $0x9d0] sm:$0xff]  ;;  %v9210_v41 = vcombine.low %v594_v26, %v598_v27 }
 0x29a   : > { %7220 = vmatprep.subr.bf16.mxu0 %v9123_v37  ;;  %7261 = vmatprep.subr.bf16.mxu1 %v9251_v38  ;;  %v718_v35 = vld [vmem:[%s10757_s27 + $0x9f0] sm:$0xff] }
 0x29b   : > { %v842_v37 = vld [vmem:[%s10757_s27 + $0xdd0] sm:$0xff]  ;;  %v9331_v42 = vcombine.high %v714_v34, %v718_v35  ;;  %v9330_v52 = vcombine.low %v714_v34, %v718_v35 }
 0x29c   : > { %v846_v38 = vld [vmem:[%s10757_s27 + $0xdf0] sm:$0xff] }
 0x29d   : > { %7221 = vmatpush2.bf16.msra.mxu0 %v9122_v45  ;;  %7262 = vmatpush2.bf16.msra.mxu1 %v9250_v46  ;;  %v9459_v43 = vcombine.high %v842_v37, %v846_v38  ;;  %v706_v45 = vld [vmem:[%s10757_s27 + $0x990] sm:$0xff]  ;;  %v9458_v53 = vcombine.low %v842_v37, %v846_v38 }
 0x29e   : > { %7222 = vmatprep.subr.bf16.mxu0 %v9115_v49  ;;  %7263 = vmatprep.subr.bf16.mxu1 %v9243_v50  ;;  %v710_v46 = vld [vmem:[%s10757_s27 + $0x9b0] sm:$0xff] }
 0x29f   : > { %v834_v49 = vld [vmem:[%s10757_s27 + $0xd90] sm:$0xff]  ;;  %v9323_v54 = vcombine.high %v706_v45, %v710_v46  ;;  %v9322_v3 = vcombine.low %v706_v45, %v710_v46 }
 0x2a0   : > { %v838_v50 = vld [vmem:[%s10757_s27 + $0xdb0] sm:$0xff] }
 0x2a1   : > { %7223 = vmatpush2.bf16.msra.mxu0 %v9114_v56  ;;  %7264 = vmatpush2.bf16.msra.mxu1 %v9242_v57  ;;  %v9451_v55 = vcombine.high %v834_v49, %v838_v50  ;;  %v698_v56 = vld [vmem:[%s10757_s27 + $0x950] sm:$0xff] }
 0x2a2   : > { %7224 = vmatprep.subr.bf16.mxu0 %v9107_v60  ;;  %7265 = vmatprep.subr.bf16.mxu1 %v9235_v62  ;;  %v702_v57 = vld [vmem:[%s10757_s27 + $0x970] sm:$0xff] }
 0x2a3   : > { %v826_v62 = vld [vmem:[%s10757_s27 + $0xd50] sm:$0xff] }
 0x2a4   : > { %v830_v0 = vld [vmem:[%s10757_s27 + $0xd70] sm:$0xff] }
 0x2a5   : > { %7225 = vmatpush2.bf16.msra.mxu0 %v9106_v4  ;;  %7266 = vmatpush2.bf16.msra.mxu1 %v9234_v7  ;;  %v9450_v7 = vcombine.low %v834_v49, %v838_v50  ;;  %v690_v15 = vld [vmem:[%s10757_s27 + $0x910] sm:$0xff]  ;;  %v9442_v26 = vcombine.low %v826_v62, %v830_v0 }
 0x2a6   : > { %7226 = vmatprep.subr.bf16.mxu0 %v9099_v10  ;;  %7267 = vmatprep.subr.bf16.mxu1 %v9227_v11  ;;  %v9315_v10 = vcombine.high %v698_v56, %v702_v57  ;;  %v694_v17 = vld [vmem:[%s10757_s27 + $0x930] sm:$0xff] }
 0x2a7   : > { %v9307_v27 = vcombine.high %v690_v15, %v694_v17  ;;  %v810_v34 = vld [vmem:[%s10757_s27 + $0xcd0] sm:$0xff]  ;;  %v9306_v37 = vcombine.low %v690_v15, %v694_v17 }
 0x2a8   : > { %v814_v35 = vld [vmem:[%s10757_s27 + $0xcf0] sm:$0xff] }
 0x2a9   : > { %7227 = vmatpush2.bf16.msra.mxu0 %v9098_v19  ;;  %7268 = vmatpush2.bf16.msra.mxu1 %v9226_v21  ;;  %v818_v21 = vld [vmem:[%s10757_s27 + $0xd10] sm:$0xff]  ;;  %v9426_v50 = vcombine.low %v810_v34, %v814_v35 }
 0x2aa   : > { %7228 = vmatprep.subr.bf16.mxu0 %v9091_v22  ;;  %7269 = vmatprep.subr.bf16.mxu1 %v9219_v23  ;;  %v822_v22 = vld [vmem:[%s10757_s27 + $0xd30] sm:$0xff] }
 0x2ab   : > { %v9434_v38 = vcombine.low %v818_v21, %v822_v22  ;;  %v802_v45 = vld [vmem:[%s10757_s27 + $0xc90] sm:$0xff] }
 0x2ac   : > { %v806_v46 = vld [vmem:[%s10757_s27 + $0xcb0] sm:$0xff] }
 0x2ad   : > { %7229 = vmatpush2.bf16.msra.mxu0 %v9090_v29  ;;  %7270 = vmatpush2.bf16.msra.mxu1 %v9218_v30  ;;  %v9435_v30 = vcombine.high %v818_v21, %v822_v22  ;;  %v778_v15 = vld [vmem:[%s10757_s27 + $0xbd0] sm:$0xff] }
 0x2ae   : > { %7230 = vmatprep.subr.bf16.mxu0 %v9083_v32  ;;  %7271 = vmatprep.subr.bf16.mxu1 %v9211_v33  ;;  %v682_v32 = vld [vmem:[%s10757_s27 + $0x8d0] sm:$0xff] }
 0x2af   : > { %v686_v33 = vld [vmem:[%s10757_s27 + $0x8f0] sm:$0xff] }
 0x2b0   : > { %v9298_v49 = vcombine.low %v682_v32, %v686_v33  ;;  %v782_v17 = vld [vmem:[%s10757_s27 + $0xbf0] sm:$0xff] }
 0x2b1   : > { %7231 = vmatpush2.bf16.msra.mxu0 %v9082_v39  ;;  %7272 = vmatpush2.bf16.msra.mxu1 %v9210_v41  ;;  %v9299_v39 = vcombine.high %v682_v32, %v686_v33  ;;  %v9427_v41 = vcombine.high %v810_v34, %v814_v35  ;;  %v910_v21 = vld [vmem:[%s10757_s27 + $0xff0] sm:$0xff]  ;;  %v9394_v32 = vcombine.low %v778_v15, %v782_v17 }
 0x2b2   : > { %7282 = vmatprep.subr.bf16.mxu0 %v9331_v42  ;;  %7323 = vmatprep.subr.bf16.mxu1 %v9459_v43  ;;  %v674_v42 = vld [vmem:[%s10757_s27 + $0x890] sm:$0xff] }
 0x2b3   : > { %v678_v43 = vld [vmem:[%s10757_s27 + $0x8b0] sm:$0xff] }
 0x2b4   : > { %v6988_v60 = vpop.f32.mrf.mxu0  ;;  %7233 = vmatmul.mubr.bf16.vlgmr.msra.gmra.mxu0 %v10851_v16  ;;  %v7029_v63 = vpop.f32.mrf.mxu1  ;;  %7274 = vmatmul.mubr.bf16.vlgmr.msra.gmra.mxu1 %v10856_v20 }
 0x2b5   : > { %v6989_v1 = vadd.f32 %v6988_v60, %v11397_v61  ;;  %7283 = vmatpush1.bf16.msra.mxu0 %v9330_v52  ;;  %7324 = vmatpush1.bf16.msra.mxu1 %v9458_v53  ;;  %v9443_v61 = vcombine.high %v826_v62, %v830_v0  ;;  %v9291_v52 = vcombine.high %v674_v42, %v678_v43 }
 0x2b6   : > { %v6990_v4 = vpop.f32.mrf.mxu0  ;;  %7284 = vmatprep.subr.bf16.mxu0 %v9323_v54  ;;  %v7031_v13 = vpop.f32.mrf.mxu1  ;;  %7325 = vmatprep.subr.bf16.mxu1 %v9451_v55  ;;  %v9419_v53 = vcombine.high %v802_v45, %v806_v46  ;;  %v666_v54 = vld [vmem:[%s10757_s27 + $0x850] sm:$0xff]  ;;  %v9290_v60 = vcombine.low %v674_v42, %v678_v43  ;;  %v9418_v62 = vcombine.low %v802_v45, %v806_v46 }
 0x2b7   : > { %v11470_v11 = vadd.f32 %v7029_v63, %v6989_v1  ;;  %v6991_v12 = vadd.f32 %v6990_v4, %v11402_v8  ;;  %7314 = vmatprep.mubr.bf16.mxu0 %v10861_v28  ;;  %7355 = vmatprep.mubr.bf16.mxu1 %v10866_v31  ;;  %v9314_v8 = vcombine.low %v698_v56, %v702_v57  ;;  %v670_v55 = vld [vmem:[%s10757_s27 + $0x870] sm:$0xff] }
 0x2b8   : > { %v6992_v19 = vpop.f32.mrf.mxu0  ;;  %v7033_v24 = vpop.f32.mrf.mxu1  ;;  %v794_v56 = vld [vmem:[%s10757_s27 + $0xc50] sm:$0xff]  ;;  %v9283_v0 = vcombine.high %v666_v54, %v670_v55 }
 0x2b9   : > { %v11479_v23 = vadd.f32 %v7031_v13, %v6991_v12  ;;  %7285 = vmatpush1.bf16.msra.mxu0 %v9322_v3  ;;  %7326 = vmatpush1.bf16.msra.mxu1 %v9450_v7  ;;  %v798_v57 = vld [vmem:[%s10757_s27 + $0xc70] sm:$0xff] }
 0x2ba   : > { %v6993_v25 = vpop.f32.mrf.mxu0  ;;  %7286 = vmatprep.subr.bf16.mxu0 %v9315_v10  ;;  %v7034_v29 = vpop.f32.mrf.mxu1  ;;  %7327 = vmatprep.subr.bf16.mxu1 %v9443_v61  ;;  %v9411_v1 = vcombine.high %v794_v56, %v798_v57  ;;  %v658_v63 = vld [vmem:[%s10757_s27 + $0x810] sm:$0xff]  ;;  %v9282_v10 = vcombine.low %v666_v54, %v670_v55  ;;  %v9410_v12 = vcombine.low %v794_v56, %v798_v57 }
 0x2bb   : > { %v662_v3 = vld [vmem:[%s10757_s27 + $0x830] sm:$0xff] }
 0x2bc   : > { %v786_v4 = vld [vmem:[%s10757_s27 + $0xc10] sm:$0xff]  ;;  %v9275_v13 = vcombine.high %v658_v63, %v662_v3  ;;  %v9274_v22 = vcombine.low %v658_v63, %v662_v3 }
 0x2bd   : > { %7287 = vmatpush1.bf16.msra.mxu0 %v9314_v8  ;;  %7328 = vmatpush1.bf16.msra.mxu1 %v9442_v26  ;;  %v790_v7 = vld [vmem:[%s10757_s27 + $0xc30] sm:$0xff]  ;;  %v9395_v8 = vcombine.high %v778_v15, %v782_v17 }
 0x2be   : > { %7288 = vmatprep.subr.bf16.mxu0 %v9307_v27  ;;  %7329 = vmatprep.subr.bf16.mxu1 %v9435_v30  ;;  %v9403_v61 = vcombine.high %v786_v4, %v790_v7  ;;  %v906_v19 = vld [vmem:[%s10757_s27 + $0xfd0] sm:$0xff]  ;;  %v9402_v24 = vcombine.low %v786_v4, %v790_v7 }
 0x2bf   : > { %v9523_v25 = vcombine.high %v906_v19, %v910_v21  ;;  %v770_v26 = vld [vmem:[%s10757_s27 + $0xb90] sm:$0xff]  ;;  %v9522_v33 = vcombine.low %v906_v19, %v910_v21 }
 0x2c0   : > { %v774_v27 = vld [vmem:[%s10757_s27 + $0xbb0] sm:$0xff] }
 0x2c1   : > { %7289 = vmatpush1.bf16.msra.mxu0 %v9306_v37  ;;  %7330 = vmatpush1.bf16.msra.mxu1 %v9434_v38  ;;  %v898_v29 = vld [vmem:[%s10757_s27 + $0xf90] sm:$0xff]  ;;  %v9387_v34 = vcombine.high %v770_v26, %v774_v27  ;;  %v9386_v42 = vcombine.low %v770_v26, %v774_v27 }
 0x2c2   : > { %7290 = vmatprep.subr.bf16.mxu0 %v9299_v39  ;;  %7331 = vmatprep.subr.bf16.mxu1 %v9427_v41  ;;  %v902_v30 = vld [vmem:[%s10757_s27 + $0xfb0] sm:$0xff] }
 0x2c3   : > { %v9515_v35 = vcombine.high %v898_v29, %v902_v30  ;;  %v762_v37 = vld [vmem:[%s10757_s27 + $0xb50] sm:$0xff]  ;;  %v9514_v43 = vcombine.low %v898_v29, %v902_v30 }
 0x2c4   : > { %v766_v38 = vld [vmem:[%s10757_s27 + $0xb70] sm:$0xff] }
 0x2c5   : > { %7291 = vmatpush1.bf16.msra.mxu0 %v9298_v49  ;;  %7332 = vmatpush1.bf16.msra.mxu1 %v9426_v50  ;;  %v890_v39 = vld [vmem:[%s10757_s27 + $0xf50] sm:$0xff]  ;;  %v9379_v45 = vcombine.high %v762_v37, %v766_v38  ;;  %v9378_v54 = vcombine.low %v762_v37, %v766_v38 }
 0x2c6   : > { %7292 = vmatprep.subr.bf16.mxu0 %v9291_v52  ;;  %7333 = vmatprep.subr.bf16.mxu1 %v9419_v53  ;;  %v894_v41 = vld [vmem:[%s10757_s27 + $0xf70] sm:$0xff] }
 0x2c7   : > { %v9507_v46 = vcombine.high %v890_v39, %v894_v41  ;;  %v754_v49 = vld [vmem:[%s10757_s27 + $0xb10] sm:$0xff]  ;;  %v9506_v55 = vcombine.low %v890_v39, %v894_v41 }
 0x2c8   : > { %v758_v50 = vld [vmem:[%s10757_s27 + $0xb30] sm:$0xff] }
 0x2c9   : > { %7293 = vmatpush1.bf16.msra.mxu0 %v9290_v60  ;;  %7334 = vmatpush1.bf16.msra.mxu1 %v9418_v62  ;;  %v882_v52 = vld [vmem:[%s10757_s27 + $0xf10] sm:$0xff]  ;;  %v9371_v56 = vcombine.high %v754_v49, %v758_v50  ;;  %v9370_v63 = vcombine.low %v754_v49, %v758_v50 }
 0x2ca   : > { %7294 = vmatprep.subr.bf16.mxu0 %v9283_v0  ;;  %7335 = vmatprep.subr.bf16.mxu1 %v9411_v1  ;;  %v886_v53 = vld [vmem:[%s10757_s27 + $0xf30] sm:$0xff] }
 0x2cb   : > { %v9499_v57 = vcombine.high %v882_v52, %v886_v53  ;;  %v746_v60 = vld [vmem:[%s10757_s27 + $0xad0] sm:$0xff]  ;;  %v9498_v3 = vcombine.low %v882_v52, %v886_v53 }
 0x2cc   : > { %v750_v62 = vld [vmem:[%s10757_s27 + $0xaf0] sm:$0xff] }
 0x2cd   : > { %7295 = vmatpush1.bf16.msra.mxu0 %v9282_v10  ;;  %7336 = vmatpush1.bf16.msra.mxu1 %v9410_v12  ;;  %v874_v0 = vld [vmem:[%s10757_s27 + $0xed0] sm:$0xff]  ;;  %v9363_v4 = vcombine.high %v746_v60, %v750_v62  ;;  %v9362_v15 = vcombine.low %v746_v60, %v750_v62 }
 0x2ce   : > { %7296 = vmatprep.subr.bf16.mxu0 %v9275_v13  ;;  %7337 = vmatprep.subr.bf16.mxu1 %v9403_v61  ;;  %v878_v1 = vld [vmem:[%s10757_s27 + $0xef0] sm:$0xff] }
 0x2cf   : > { %v9491_v7 = vcombine.high %v874_v0, %v878_v1  ;;  %v738_v10 = vld [vmem:[%s10757_s27 + $0xa90] sm:$0xff]  ;;  %v9490_v17 = vcombine.low %v874_v0, %v878_v1 }
 0x2d0   : > { %v742_v12 = vld [vmem:[%s10757_s27 + $0xab0] sm:$0xff] }
 0x2d1   : > { %7297 = vmatpush1.bf16.msra.mxu0 %v9274_v22  ;;  %7338 = vmatpush1.bf16.msra.mxu1 %v9402_v24  ;;  %v866_v13 = vld [vmem:[%s10757_s27 + $0xe90] sm:$0xff]  ;;  %v9355_v19 = vcombine.high %v738_v10, %v742_v12  ;;  %v9354_v26 = vcombine.low %v738_v10, %v742_v12 }
 0x2d2   : > { %7298 = vmatprep.subr.bf16.mxu0 %v9395_v8  ;;  %7339 = vmatprep.subr.bf16.mxu1 %v9523_v25  ;;  %v870_v61 = vld [vmem:[%s10757_s27 + $0xeb0] sm:$0xff] }
 0x2d3   : > { %v9483_v21 = vcombine.high %v866_v13, %v870_v61  ;;  %v730_v22 = vld [vmem:[%s10757_s27 + $0xa50] sm:$0xff]  ;;  %v9482_v27 = vcombine.low %v866_v13, %v870_v61 }
 0x2d4   : > { %v734_v24 = vld [vmem:[%s10757_s27 + $0xa70] sm:$0xff] }
 0x2d5   : > { %7299 = vmatpush2.bf16.msra.mxu0 %v9394_v32  ;;  %7340 = vmatpush2.bf16.msra.mxu1 %v9522_v33  ;;  %v858_v8 = vld [vmem:[%s10757_s27 + $0xe50] sm:$0xff]  ;;  %v9347_v29 = vcombine.high %v730_v22, %v734_v24  ;;  %v9346_v37 = vcombine.low %v730_v22, %v734_v24 }
 0x2d6   : > { %7300 = vmatprep.subr.bf16.mxu0 %v9387_v34  ;;  %7341 = vmatprep.subr.bf16.mxu1 %v9515_v35  ;;  %v862_v25 = vld [vmem:[%s10757_s27 + $0xe70] sm:$0xff] }
 0x2d7   : > { %v9475_v30 = vcombine.high %v858_v8, %v862_v25  ;;  %v722_v32 = vld [vmem:[%s10757_s27 + $0xa10] sm:$0xff]  ;;  %v9474_v38 = vcombine.low %v858_v8, %v862_v25 }
 0x2d8   : > { %v726_v33 = vld [vmem:[%s10757_s27 + $0xa30] sm:$0xff] }
 0x2d9   : > { %7301 = vmatpush2.bf16.msra.mxu0 %v9386_v42  ;;  %7342 = vmatpush2.bf16.msra.mxu1 %v9514_v43  ;;  %v850_v34 = vld [vmem:[%s10757_s27 + $0xe10] sm:$0xff]  ;;  %v9339_v39 = vcombine.high %v722_v32, %v726_v33  ;;  %v9338_v49 = vcombine.low %v722_v32, %v726_v33 }
 0x2da   : > { %7302 = vmatprep.subr.bf16.mxu0 %v9379_v45  ;;  %7343 = vmatprep.subr.bf16.mxu1 %v9507_v46  ;;  %v854_v35 = vld [vmem:[%s10757_s27 + $0xe30] sm:$0xff] }
 0x2db   : > { %v9467_v41 = vcombine.high %v850_v34, %v854_v35  ;;  %v970_v42 = vld [vmem:[%s10757_s27 + $0x11d0] sm:$0xff]  ;;  %v9466_v50 = vcombine.low %v850_v34, %v854_v35 }
 0x2dc   : > { %v974_v43 = vld [vmem:[%s10757_s27 + $0x11f0] sm:$0xff] }
 0x2dd   : > { %7303 = vmatpush2.bf16.msra.mxu0 %v9378_v54  ;;  %7344 = vmatpush2.bf16.msra.mxu1 %v9506_v55  ;;  %v1098_v45 = vld [vmem:[%s10757_s27 + $0x15d0] sm:$0xff]  ;;  %v9587_v52 = vcombine.high %v970_v42, %v974_v43  ;;  %v9586_v60 = vcombine.low %v970_v42, %v974_v43 }
 0x2de   : > { %7304 = vmatprep.subr.bf16.mxu0 %v9371_v56  ;;  %7345 = vmatprep.subr.bf16.mxu1 %v9499_v57  ;;  %v1102_v46 = vld [vmem:[%s10757_s27 + $0x15f0] sm:$0xff] }
 0x2df   : > { %v9715_v53 = vcombine.high %v1098_v45, %v1102_v46  ;;  %v962_v54 = vld [vmem:[%s10757_s27 + $0x1190] sm:$0xff]  ;;  %v9714_v62 = vcombine.low %v1098_v45, %v1102_v46 }
 0x2e0   : > { %v966_v55 = vld [vmem:[%s10757_s27 + $0x11b0] sm:$0xff] }
 0x2e1   : > { %7305 = vmatpush2.bf16.msra.mxu0 %v9370_v63  ;;  %7346 = vmatpush2.bf16.msra.mxu1 %v9498_v3  ;;  %v1090_v56 = vld [vmem:[%s10757_s27 + $0x1590] sm:$0xff]  ;;  %v9579_v0 = vcombine.high %v962_v54, %v966_v55  ;;  %v9578_v61 = vcombine.low %v962_v54, %v966_v55 }
 0x2e2   : > { %7306 = vmatprep.subr.bf16.mxu0 %v9363_v4  ;;  %7347 = vmatprep.subr.bf16.mxu1 %v9491_v7  ;;  %v1094_v57 = vld [vmem:[%s10757_s27 + $0x15b0] sm:$0xff] }
 0x2e3   : > { %v9707_v1 = vcombine.high %v1090_v56, %v1094_v57  ;;  %v954_v63 = vld [vmem:[%s10757_s27 + $0x1150] sm:$0xff] }
 0x2e4   : > { %v958_v3 = vld [vmem:[%s10757_s27 + $0x1170] sm:$0xff] }
 0x2e5   : > { %7307 = vmatpush2.bf16.msra.mxu0 %v9362_v15  ;;  %7348 = vmatpush2.bf16.msra.mxu1 %v9490_v17  ;;  %v1082_v7 = vld [vmem:[%s10757_s27 + $0x1550] sm:$0xff]  ;;  %v9706_v17 = vcombine.low %v1090_v56, %v1094_v57 }
 0x2e6   : > { %7308 = vmatprep.subr.bf16.mxu0 %v9355_v19  ;;  %7349 = vmatprep.subr.bf16.mxu1 %v9483_v21  ;;  %v1086_v10 = vld [vmem:[%s10757_s27 + $0x1570] sm:$0xff]  ;;  %v9571_v19 = vcombine.high %v954_v63, %v958_v3 }
 0x2e7   : > { %v946_v8 = vld [vmem:[%s10757_s27 + $0x1110] sm:$0xff]  ;;  %v9698_v34 = vcombine.low %v1082_v7, %v1086_v10 }
 0x2e8   : > { %v950_v25 = vld [vmem:[%s10757_s27 + $0x1130] sm:$0xff] }
 0x2e9   : > { %7309 = vmatpush2.bf16.msra.mxu0 %v9354_v26  ;;  %7350 = vmatpush2.bf16.msra.mxu1 %v9482_v27  ;;  %v1074_v27 = vld [vmem:[%s10757_s27 + $0x1510] sm:$0xff]  ;;  %v9563_v35 = vcombine.high %v946_v8, %v950_v25  ;;  %v9562_v45 = vcombine.low %v946_v8, %v950_v25 }
 0x2ea   : > { %7310 = vmatprep.subr.bf16.mxu0 %v9347_v29  ;;  %7351 = vmatprep.subr.bf16.mxu1 %v9475_v30  ;;  %v1078_v29 = vld [vmem:[%s10757_s27 + $0x1530] sm:$0xff] }
 0x2eb   : > { %v1066_v42 = vld [vmem:[%s10757_s27 + $0x14d0] sm:$0xff]  ;;  %v9690_v46 = vcombine.low %v1074_v27, %v1078_v29 }
 0x2ec   : > { %v1070_v43 = vld [vmem:[%s10757_s27 + $0x14f0] sm:$0xff] }
 0x2ed   : > { %7311 = vmatpush2.bf16.msra.mxu0 %v9346_v37  ;;  %7352 = vmatpush2.bf16.msra.mxu1 %v9474_v38  ;;  %v9691_v38 = vcombine.high %v1074_v27, %v1078_v29  ;;  %v1058_v54 = vld [vmem:[%s10757_s27 + $0x1490] sm:$0xff]  ;;  %v9682_v57 = vcombine.low %v1066_v42, %v1070_v43 }
 0x2ee   : > { %7312 = vmatprep.subr.bf16.mxu0 %v9339_v39  ;;  %7353 = vmatprep.subr.bf16.mxu1 %v9467_v41  ;;  %v938_v39 = vld [vmem:[%s10757_s27 + $0x10d0] sm:$0xff] }
 0x2ef   : > { %v942_v41 = vld [vmem:[%s10757_s27 + $0x10f0] sm:$0xff] }
 0x2f0   : > { %v1062_v55 = vld [vmem:[%s10757_s27 + $0x14b0] sm:$0xff]  ;;  %v9554_v56 = vcombine.low %v938_v39, %v942_v41 }
 0x2f1   : > { %7313 = vmatpush2.bf16.msra.mxu0 %v9338_v49  ;;  %7354 = vmatpush2.bf16.msra.mxu1 %v9466_v50  ;;  %v9555_v49 = vcombine.high %v938_v39, %v942_v41  ;;  %v9683_v50 = vcombine.high %v1066_v42, %v1070_v43  ;;  %v1034_v8 = vld [vmem:[%s10757_s27 + $0x13d0] sm:$0xff] }
 0x2f2   : > { %7364 = vmatprep.subr.bf16.mxu0 %v9587_v52  ;;  %7405 = vmatprep.subr.bf16.mxu1 %v9715_v53  ;;  %v930_v52 = vld [vmem:[%s10757_s27 + $0x1090] sm:$0xff] }
 0x2f3   : > { %v934_v53 = vld [vmem:[%s10757_s27 + $0x10b0] sm:$0xff] }
 0x2f4   : > { %v7070_v4 = vpop.f32.mrf.mxu0  ;;  %7315 = vmatmul.mubr.bf16.vlgmr.msra.gmra.mxu0 %v10931_v36  ;;  %v7111_v13 = vpop.f32.mrf.mxu1  ;;  %7356 = vmatmul.mubr.bf16.vlgmr.msra.gmra.mxu1 %v10936_v40  ;;  %v1038_v25 = vld [vmem:[%s10757_s27 + $0x13f0] sm:$0xff] }
 0x2f5   : > { %v7071_v12 = vadd.f32 %v7070_v4, %v11470_v11  ;;  %7365 = vmatpush1.bf16.msra.mxu0 %v9586_v60  ;;  %7406 = vmatpush1.bf16.msra.mxu1 %v9714_v62  ;;  %v9699_v11 = vcombine.high %v1082_v7, %v1086_v10  ;;  %v9547_v60 = vcombine.high %v930_v52, %v934_v53  ;;  %v1166_v27 = vld [vmem:[%s10757_s27 + $0x17f0] sm:$0xff] }
 0x2f6   : > { %v7072_v15 = vpop.f32.mrf.mxu0  ;;  %7366 = vmatprep.subr.bf16.mxu0 %v9579_v0  ;;  %v7113_v24 = vpop.f32.mrf.mxu1  ;;  %7407 = vmatprep.subr.bf16.mxu1 %v9707_v1  ;;  %v9675_v62 = vcombine.high %v1058_v54, %v1062_v55  ;;  %v922_v0 = vld [vmem:[%s10757_s27 + $0x1050] sm:$0xff]  ;;  %v9546_v4 = vcombine.low %v930_v52, %v934_v53  ;;  %v9674_v7 = vcombine.low %v1058_v54, %v1062_v55 }
 0x2f7   : > { %v11544_v21 = vadd.f32 %v7111_v13, %v7071_v12  ;;  %v7073_v22 = vadd.f32 %v7072_v15, %v11479_v23  ;;  %7396 = vmatprep.mubr.bf16.mxu0 %v10941_v48  ;;  %7437 = vmatprep.mubr.bf16.mxu1 %v10946_v51  ;;  %v9570_v23 = vcombine.low %v954_v63, %v958_v3  ;;  %v926_v1 = vld [vmem:[%s10757_s27 + $0x1070] sm:$0xff] }
 0x2f8   : > { %v7074_v26 = vpop.f32.mrf.mxu0  ;;  %v7115_v32 = vpop.f32.mrf.mxu1  ;;  %v1050_v63 = vld [vmem:[%s10757_s27 + $0x1450] sm:$0xff]  ;;  %v9539_v10 = vcombine.high %v922_v0, %v926_v1  ;;  %v9650_v39 = vcombine.low %v1034_v8, %v1038_v25 }
 0x2f9   : > { %v11553_v30 = vadd.f32 %v7113_v24, %v7073_v22  ;;  %7367 = vmatpush1.bf16.msra.mxu0 %v9578_v61  ;;  %7408 = vmatpush1.bf16.msra.mxu1 %v9706_v17  ;;  %v1054_v3 = vld [vmem:[%s10757_s27 + $0x1470] sm:$0xff] }
 0x2fa   : > { %v7075_v33 = vpop.f32.mrf.mxu0  ;;  %7368 = vmatprep.subr.bf16.mxu0 %v9571_v19  ;;  %v7116_v37 = vpop.f32.mrf.mxu1  ;;  %7409 = vmatprep.subr.bf16.mxu1 %v9699_v11  ;;  %v9667_v12 = vcombine.high %v1050_v63, %v1054_v3  ;;  %v914_v13 = vld [vmem:[%s10757_s27 + $0x1010] sm:$0xff]  ;;  %v9538_v19 = vcombine.low %v922_v0, %v926_v1  ;;  %v9666_v22 = vcombine.low %v1050_v63, %v1054_v3 }
 0x2fb   : > { %v918_v61 = vld [vmem:[%s10757_s27 + $0x1030] sm:$0xff] }
 0x2fc   : > { %v1042_v15 = vld [vmem:[%s10757_s27 + $0x1410] sm:$0xff]  ;;  %v9531_v24 = vcombine.high %v914_v13, %v918_v61  ;;  %v9530_v29 = vcombine.low %v914_v13, %v918_v61 }
 0x2fd   : > { %7369 = vmatpush1.bf16.msra.mxu0 %v9570_v23  ;;  %7410 = vmatpush1.bf16.msra.mxu1 %v9698_v34  ;;  %v1046_v17 = vld [vmem:[%s10757_s27 + $0x1430] sm:$0xff]  ;;  %v9651_v23 = vcombine.high %v1034_v8, %v1038_v25 }
 0x2fe   : > { %7370 = vmatprep.subr.bf16.mxu0 %v9563_v35  ;;  %7411 = vmatprep.subr.bf16.mxu1 %v9691_v38  ;;  %v9659_v11 = vcombine.high %v1042_v15, %v1046_v17  ;;  %v1162_v26 = vld [vmem:[%s10757_s27 + $0x17d0] sm:$0xff]  ;;  %v9658_v32 = vcombine.low %v1042_v15, %v1046_v17 }
 0x2ff   : > { %v9779_v33 = vcombine.high %v1162_v26, %v1166_v27  ;;  %v1026_v34 = vld [vmem:[%s10757_s27 + $0x1390] sm:$0xff]  ;;  %v9778_v41 = vcombine.low %v1162_v26, %v1166_v27 }
 0x300   : > { %v1030_v35 = vld [vmem:[%s10757_s27 + $0x13b0] sm:$0xff] }
 0x301   : > { %7371 = vmatpush1.bf16.msra.mxu0 %v9562_v45  ;;  %7412 = vmatpush1.bf16.msra.mxu1 %v9690_v46  ;;  %v1154_v37 = vld [vmem:[%s10757_s27 + $0x1790] sm:$0xff]  ;;  %v9643_v42 = vcombine.high %v1026_v34, %v1030_v35  ;;  %v9642_v52 = vcombine.low %v1026_v34, %v1030_v35 }
 0x302   : > { %7372 = vmatprep.subr.bf16.mxu0 %v9555_v49  ;;  %7413 = vmatprep.subr.bf16.mxu1 %v9683_v50  ;;  %v1158_v38 = vld [vmem:[%s10757_s27 + $0x17b0] sm:$0xff] }
 0x303   : > { %v9771_v43 = vcombine.high %v1154_v37, %v1158_v38  ;;  %v1018_v45 = vld [vmem:[%s10757_s27 + $0x1350] sm:$0xff]  ;;  %v9770_v53 = vcombine.low %v1154_v37, %v1158_v38 }
 0x304   : > { %v1022_v46 = vld [vmem:[%s10757_s27 + $0x1370] sm:$0xff] }
 0x305   : > { %7373 = vmatpush1.bf16.msra.mxu0 %v9554_v56  ;;  %7414 = vmatpush1.bf16.msra.mxu1 %v9682_v57  ;;  %v1146_v49 = vld [vmem:[%s10757_s27 + $0x1750] sm:$0xff]  ;;  %v9635_v54 = vcombine.high %v1018_v45, %v1022_v46  ;;  %v9634_v0 = vcombine.low %v1018_v45, %v1022_v46 }
 0x306   : > { %7374 = vmatprep.subr.bf16.mxu0 %v9547_v60  ;;  %7415 = vmatprep.subr.bf16.mxu1 %v9675_v62  ;;  %v1150_v50 = vld [vmem:[%s10757_s27 + $0x1770] sm:$0xff] }
 0x307   : > { %v9763_v55 = vcombine.high %v1146_v49, %v1150_v50  ;;  %v1010_v56 = vld [vmem:[%s10757_s27 + $0x1310] sm:$0xff]  ;;  %v9762_v1 = vcombine.low %v1146_v49, %v1150_v50 }
 0x308   : > { %v1014_v57 = vld [vmem:[%s10757_s27 + $0x1330] sm:$0xff] }
 0x309   : > { %7375 = vmatpush1.bf16.msra.mxu0 %v9546_v4  ;;  %7416 = vmatpush1.bf16.msra.mxu1 %v9674_v7  ;;  %v1138_v60 = vld [vmem:[%s10757_s27 + $0x1710] sm:$0xff]  ;;  %v9627_v63 = vcombine.high %v1010_v56, %v1014_v57  ;;  %v9626_v13 = vcombine.low %v1010_v56, %v1014_v57 }
 0x30a   : > { %7376 = vmatprep.subr.bf16.mxu0 %v9539_v10  ;;  %7417 = vmatprep.subr.bf16.mxu1 %v9667_v12  ;;  %v1142_v62 = vld [vmem:[%s10757_s27 + $0x1730] sm:$0xff] }
 0x30b   : > { %v9755_v3 = vcombine.high %v1138_v60, %v1142_v62  ;;  %v1002_v4 = vld [vmem:[%s10757_s27 + $0x12d0] sm:$0xff]  ;;  %v9754_v61 = vcombine.low %v1138_v60, %v1142_v62 }
 0x30c   : > { %v1006_v7 = vld [vmem:[%s10757_s27 + $0x12f0] sm:$0xff] }
 0x30d   : > { %7377 = vmatpush1.bf16.msra.mxu0 %v9538_v19  ;;  %7418 = vmatpush1.bf16.msra.mxu1 %v9666_v22  ;;  %v1130_v10 = vld [vmem:[%s10757_s27 + $0x16d0] sm:$0xff]  ;;  %v9619_v15 = vcombine.high %v1002_v4, %v1006_v7  ;;  %v9618_v8 = vcombine.low %v1002_v4, %v1006_v7 }
 0x30e   : > { %7378 = vmatprep.subr.bf16.mxu0 %v9531_v24  ;;  %7419 = vmatprep.subr.bf16.mxu1 %v9659_v11  ;;  %v1134_v12 = vld [vmem:[%s10757_s27 + $0x16f0] sm:$0xff] }
 0x30f   : > { %v9747_v17 = vcombine.high %v1130_v10, %v1134_v12  ;;  %v994_v19 = vld [vmem:[%s10757_s27 + $0x1290] sm:$0xff]  ;;  %v9746_v25 = vcombine.low %v1130_v10, %v1134_v12 }
 0x310   : > { %v998_v22 = vld [vmem:[%s10757_s27 + $0x12b0] sm:$0xff] }
 0x311   : > { %7379 = vmatpush1.bf16.msra.mxu0 %v9530_v29  ;;  %7420 = vmatpush1.bf16.msra.mxu1 %v9658_v32  ;;  %v1122_v24 = vld [vmem:[%s10757_s27 + $0x1690] sm:$0xff]  ;;  %v9611_v26 = vcombine.high %v994_v19, %v998_v22  ;;  %v9610_v34 = vcombine.low %v994_v19, %v998_v22 }
 0x312   : > { %7380 = vmatprep.subr.bf16.mxu0 %v9651_v23  ;;  %7421 = vmatprep.subr.bf16.mxu1 %v9779_v33  ;;  %v1126_v11 = vld [vmem:[%s10757_s27 + $0x16b0] sm:$0xff] }
 0x313   : > { %v9739_v27 = vcombine.high %v1122_v24, %v1126_v11  ;;  %v986_v29 = vld [vmem:[%s10757_s27 + $0x1250] sm:$0xff]  ;;  %v9738_v35 = vcombine.low %v1122_v24, %v1126_v11 }
 0x314   : > { %v990_v32 = vld [vmem:[%s10757_s27 + $0x1270] sm:$0xff] }
 0x315   : > { %7381 = vmatpush2.bf16.msra.mxu0 %v9650_v39  ;;  %7422 = vmatpush2.bf16.msra.mxu1 %v9778_v41  ;;  %v1114_v23 = vld [vmem:[%s10757_s27 + $0x1650] sm:$0xff]  ;;  %v9603_v37 = vcombine.high %v986_v29, %v990_v32  ;;  %v9602_v45 = vcombine.low %v986_v29, %v990_v32 }
 0x316   : > { %7382 = vmatprep.subr.bf16.mxu0 %v9643_v42  ;;  %7423 = vmatprep.subr.bf16.mxu1 %v9771_v43  ;;  %v1118_v33 = vld [vmem:[%s10757_s27 + $0x1670] sm:$0xff] }
 0x317   : > { %v9731_v38 = vcombine.high %v1114_v23, %v1118_v33  ;;  %v978_v39 = vld [vmem:[%s10757_s27 + $0x1210] sm:$0xff]  ;;  %v9730_v46 = vcombine.low %v1114_v23, %v1118_v33 }
 0x318   : > { %v982_v41 = vld [vmem:[%s10757_s27 + $0x1230] sm:$0xff] }
 0x319   : > { %7383 = vmatpush2.bf16.msra.mxu0 %v9642_v52  ;;  %7424 = vmatpush2.bf16.msra.mxu1 %v9770_v53  ;;  %v1106_v42 = vld [vmem:[%s10757_s27 + $0x1610] sm:$0xff]  ;;  %v9595_v49 = vcombine.high %v978_v39, %v982_v41  ;;  %v9594_v56 = vcombine.low %v978_v39, %v982_v41 }
 0x31a   : > { %7384 = vmatprep.subr.bf16.mxu0 %v9635_v54  ;;  %7425 = vmatprep.subr.bf16.mxu1 %v9763_v55  ;;  %v1110_v43 = vld [vmem:[%s10757_s27 + $0x1630] sm:$0xff] }
 0x31b   : > { %v9723_v50 = vcombine.high %v1106_v42, %v1110_v43  ;;  %v1226_v52 = vld [vmem:[%s10757_s27 + $0x19d0] sm:$0xff]  ;;  %v9722_v57 = vcombine.low %v1106_v42, %v1110_v43 }
 0x31c   : > { %v1230_v53 = vld [vmem:[%s10757_s27 + $0x19f0] sm:$0xff] }
 0x31d   : > { %7385 = vmatpush2.bf16.msra.mxu0 %v9634_v0  ;;  %7426 = vmatpush2.bf16.msra.mxu1 %v9762_v1  ;;  %v1354_v54 = vld [vmem:[%s10757_s27 + $0x1dd0] sm:$0xff]  ;;  %v9843_v60 = vcombine.high %v1226_v52, %v1230_v53  ;;  %v9842_v4 = vcombine.low %v1226_v52, %v1230_v53 }
 0x31e   : > { %7386 = vmatprep.subr.bf16.mxu0 %v9627_v63  ;;  %7427 = vmatprep.subr.bf16.mxu1 %v9755_v3  ;;  %v1358_v55 = vld [vmem:[%s10757_s27 + $0x1df0] sm:$0xff] }
 0x31f   : > { %v9971_v62 = vcombine.high %v1354_v54, %v1358_v55  ;;  %v1218_v0 = vld [vmem:[%s10757_s27 + $0x1990] sm:$0xff]  ;;  %v9970_v7 = vcombine.low %v1354_v54, %v1358_v55 }
 0x320   : > { %v1222_v1 = vld [vmem:[%s10757_s27 + $0x19b0] sm:$0xff] }
 0x321   : > { %7387 = vmatpush2.bf16.msra.mxu0 %v9626_v13  ;;  %7428 = vmatpush2.bf16.msra.mxu1 %v9754_v61  ;;  %v1346_v63 = vld [vmem:[%s10757_s27 + $0x1d90] sm:$0xff]  ;;  %v9835_v10 = vcombine.high %v1218_v0, %v1222_v1  ;;  %v9834_v11 = vcombine.low %v1218_v0, %v1222_v1 }
 0x322   : > { %7388 = vmatprep.subr.bf16.mxu0 %v9619_v15  ;;  %7429 = vmatprep.subr.bf16.mxu1 %v9747_v17  ;;  %v1350_v3 = vld [vmem:[%s10757_s27 + $0x1db0] sm:$0xff] }
 0x323   : > { %v9963_v12 = vcombine.high %v1346_v63, %v1350_v3  ;;  %v1210_v13 = vld [vmem:[%s10757_s27 + $0x1950] sm:$0xff] }
 0x324   : > { %v1214_v61 = vld [vmem:[%s10757_s27 + $0x1970] sm:$0xff] }
 0x325   : > { %7389 = vmatpush2.bf16.msra.mxu0 %v9618_v8  ;;  %7430 = vmatpush2.bf16.msra.mxu1 %v9746_v25  ;;  %v1338_v17 = vld [vmem:[%s10757_s27 + $0x1d50] sm:$0xff]  ;;  %v9962_v25 = vcombine.low %v1346_v63, %v1350_v3 }
 0x326   : > { %7390 = vmatprep.subr.bf16.mxu0 %v9611_v26  ;;  %7431 = vmatprep.subr.bf16.mxu1 %v9739_v27  ;;  %v1342_v19 = vld [vmem:[%s10757_s27 + $0x1d70] sm:$0xff]  ;;  %v9827_v26 = vcombine.high %v1210_v13, %v1214_v61 }
 0x327   : > { %v1202_v23 = vld [vmem:[%s10757_s27 + $0x1910] sm:$0xff]  ;;  %v9954_v42 = vcombine.low %v1338_v17, %v1342_v19 }
 0x328   : > { %v1206_v33 = vld [vmem:[%s10757_s27 + $0x1930] sm:$0xff] }
 0x329   : > { %7391 = vmatpush2.bf16.msra.mxu0 %v9610_v34  ;;  %7432 = vmatpush2.bf16.msra.mxu1 %v9738_v35  ;;  %v1330_v35 = vld [vmem:[%s10757_s27 + $0x1d10] sm:$0xff]  ;;  %v9819_v43 = vcombine.high %v1202_v23, %v1206_v33  ;;  %v9818_v54 = vcombine.low %v1202_v23, %v1206_v33 }
 0x32a   : > { %7392 = vmatprep.subr.bf16.mxu0 %v9603_v37  ;;  %7433 = vmatprep.subr.bf16.mxu1 %v9731_v38  ;;  %v1334_v37 = vld [vmem:[%s10757_s27 + $0x1d30] sm:$0xff] }
 0x32b   : > { %v1322_v52 = vld [vmem:[%s10757_s27 + $0x1cd0] sm:$0xff]  ;;  %v9946_v55 = vcombine.low %v1330_v35, %v1334_v37 }
 0x32c   : > { %v1326_v53 = vld [vmem:[%s10757_s27 + $0x1cf0] sm:$0xff] }
 0x32d   : > { %7393 = vmatpush2.bf16.msra.mxu0 %v9602_v45  ;;  %7434 = vmatpush2.bf16.msra.mxu1 %v9730_v46  ;;  %v9947_v46 = vcombine.high %v1330_v35, %v1334_v37  ;;  %v1314_v0 = vld [vmem:[%s10757_s27 + $0x1c90] sm:$0xff]  ;;  %v9938_v3 = vcombine.low %v1322_v52, %v1326_v53 }
 0x32e   : > { %7394 = vmatprep.subr.bf16.mxu0 %v9595_v49  ;;  %7435 = vmatprep.subr.bf16.mxu1 %v9723_v50  ;;  %v1194_v49 = vld [vmem:[%s10757_s27 + $0x18d0] sm:$0xff] }
 0x32f   : > { %v1198_v50 = vld [vmem:[%s10757_s27 + $0x18f0] sm:$0xff] }
 0x330   : > { %v1318_v1 = vld [vmem:[%s10757_s27 + $0x1cb0] sm:$0xff]  ;;  %v9810_v63 = vcombine.low %v1194_v49, %v1198_v50 }
 0x331   : > { %7395 = vmatpush2.bf16.msra.mxu0 %v9594_v56  ;;  %7436 = vmatpush2.bf16.msra.mxu1 %v9722_v57  ;;  %v9811_v56 = vcombine.high %v1194_v49, %v1198_v50  ;;  %v9939_v57 = vcombine.high %v1322_v52, %v1326_v53  ;;  %v1290_v23 = vld [vmem:[%s10757_s27 + $0x1bd0] sm:$0xff] }
 0x332   : > { %7446 = vmatprep.subr.bf16.mxu0 %v9843_v60  ;;  %7487 = vmatprep.subr.bf16.mxu1 %v9971_v62  ;;  %v1186_v60 = vld [vmem:[%s10757_s27 + $0x1890] sm:$0xff] }
 0x333   : > { %v1190_v62 = vld [vmem:[%s10757_s27 + $0x18b0] sm:$0xff] }
 0x334   : > { %v7152_v15 = vpop.f32.mrf.mxu0  ;;  %7397 = vmatmul.mubr.bf16.vlgmr.msra.gmra.mxu0 %v11011_v2  ;;  %v7193_v24 = vpop.f32.mrf.mxu1  ;;  %7438 = vmatmul.mubr.bf16.vlgmr.msra.gmra.mxu1 %v11016_v6  ;;  %v1294_v33 = vld [vmem:[%s10757_s27 + $0x1bf0] sm:$0xff] }
 0x335   : > { %v7153_v22 = vadd.f32 %v7152_v15, %v11544_v21  ;;  %7447 = vmatpush1.bf16.msra.mxu0 %v9842_v4  ;;  %7488 = vmatpush1.bf16.msra.mxu1 %v9970_v7  ;;  %v9955_v21 = vcombine.high %v1338_v17, %v1342_v19  ;;  %v9803_v4 = vcombine.high %v1186_v60, %v1190_v62  ;;  %v1422_v35 = vld [vmem:[%s10757_s27 + $0x1ff0] sm:$0xff] }
 0x336   : > { %v7154_v8 = vpop.f32.mrf.mxu0  ;;  %7448 = vmatprep.subr.bf16.mxu0 %v9835_v10  ;;  %v7195_v32 = vpop.f32.mrf.mxu1  ;;  %7489 = vmatprep.subr.bf16.mxu1 %v9963_v12  ;;  %v9931_v7 = vcombine.high %v1314_v0, %v1318_v1  ;;  %v1178_v10 = vld [vmem:[%s10757_s27 + $0x1850] sm:$0xff]  ;;  %v9802_v15 = vcombine.low %v1186_v60, %v1190_v62  ;;  %v9930_v17 = vcombine.low %v1314_v0, %v1318_v1 }
 0x337   : > { %v11618_v27 = vadd.f32 %v7193_v24, %v7153_v22  ;;  %v7155_v29 = vadd.f32 %v7154_v8, %v11553_v30  ;;  %7478 = vmatprep.mubr.bf16.mxu0 %v11021_v14  ;;  %7519 = vmatprep.mubr.bf16.mxu1 %v11026_v18  ;;  %v9826_v30 = vcombine.low %v1210_v13, %v1214_v61  ;;  %v1182_v12 = vld [vmem:[%s10757_s27 + $0x1870] sm:$0xff] }
 0x338   : > { %v7156_v34 = vpop.f32.mrf.mxu0  ;;  %v7197_v39 = vpop.f32.mrf.mxu1  ;;  %v1306_v13 = vld [vmem:[%s10757_s27 + $0x1c50] sm:$0xff]  ;;  %v9795_v19 = vcombine.high %v1178_v10, %v1182_v12  ;;  %v9906_v49 = vcombine.low %v1290_v23, %v1294_v33 }
 0x339   : > { %v11627_v38 = vadd.f32 %v7195_v32, %v7155_v29  ;;  %7449 = vmatpush1.bf16.msra.mxu0 %v9834_v11  ;;  %7490 = vmatpush1.bf16.msra.mxu1 %v9962_v25  ;;  %v1310_v61 = vld [vmem:[%s10757_s27 + $0x1c70] sm:$0xff] }
 0x33a   : > { %v7157_v41 = vpop.f32.mrf.mxu0  ;;  %7450 = vmatprep.subr.bf16.mxu0 %v9827_v26  ;;  %v7198_v45 = vpop.f32.mrf.mxu1  ;;  %7491 = vmatprep.subr.bf16.mxu1 %v9955_v21  ;;  %v9923_v22 = vcombine.high %v1306_v13, %v1310_v61  ;;  %v1170_v24 = vld [vmem:[%s10757_s27 + $0x1810] sm:$0xff]  ;;  %v9794_v26 = vcombine.low %v1178_v10, %v1182_v12  ;;  %v9922_v29 = vcombine.low %v1306_v13, %v1310_v61 }
 0x33b   : > { %v1174_v11 = vld [vmem:[%s10757_s27 + $0x1830] sm:$0xff] }
 0x33c   : > { %v1298_v8 = vld [vmem:[%s10757_s27 + $0x1c10] sm:$0xff]  ;;  %v9787_v32 = vcombine.high %v1170_v24, %v1174_v11  ;;  %v9786_v37 = vcombine.low %v1170_v24, %v1174_v11 }
 0x33d   : > { %7451 = vmatpush1.bf16.msra.mxu0 %v9826_v30  ;;  %7492 = vmatpush1.bf16.msra.mxu1 %v9954_v42  ;;  %v1302_v25 = vld [vmem:[%s10757_s27 + $0x1c30] sm:$0xff]  ;;  %v9907_v30 = vcombine.high %v1290_v23, %v1294_v33 }
 0x33e   : > { %7452 = vmatprep.subr.bf16.mxu0 %v9819_v43  ;;  %7493 = vmatprep.subr.bf16.mxu1 %v9947_v46  ;;  %v9915_v21 = vcombine.high %v1298_v8, %v1302_v25  ;;  %v1418_v34 = vld [vmem:[%s10757_s27 + $0x1fd0] sm:$0xff]  ;;  %v9914_v39 = vcombine.low %v1298_v8, %v1302_v25 }
 0x33f   : > { %v10035_v41 = vcombine.high %v1418_v34, %v1422_v35  ;;  %v1282_v42 = vld [vmem:[%s10757_s27 + $0x1b90] sm:$0xff]  ;;  %v10034_v50 = vcombine.low %v1418_v34, %v1422_v35 }
 0x340   : > { %v1286_v43 = vld [vmem:[%s10757_s27 + $0x1bb0] sm:$0xff] }
 0x341   : > { %7453 = vmatpush1.bf16.msra.mxu0 %v9818_v54  ;;  %7494 = vmatpush1.bf16.msra.mxu1 %v9946_v55  ;;  %v1410_v45 = vld [vmem:[%s10757_s27 + $0x1f90] sm:$0xff]  ;;  %v9899_v52 = vcombine.high %v1282_v42, %v1286_v43  ;;  %v9898_v60 = vcombine.low %v1282_v42, %v1286_v43 }
 0x342   : > { %7454 = vmatprep.subr.bf16.mxu0 %v9811_v56  ;;  %7495 = vmatprep.subr.bf16.mxu1 %v9939_v57  ;;  %v1414_v46 = vld [vmem:[%s10757_s27 + $0x1fb0] sm:$0xff] }
 0x343   : > { %v10027_v53 = vcombine.high %v1410_v45, %v1414_v46  ;;  %v1274_v54 = vld [vmem:[%s10757_s27 + $0x1b50] sm:$0xff]  ;;  %v10026_v62 = vcombine.low %v1410_v45, %v1414_v46 }
 0x344   : > { %v1278_v55 = vld [vmem:[%s10757_s27 + $0x1b70] sm:$0xff] }
 0x345   : > { %7455 = vmatpush1.bf16.msra.mxu0 %v9810_v63  ;;  %7496 = vmatpush1.bf16.msra.mxu1 %v9938_v3  ;;  %v1402_v56 = vld [vmem:[%s10757_s27 + $0x1f50] sm:$0xff]  ;;  %v9891_v0 = vcombine.high %v1274_v54, %v1278_v55  ;;  %v9890_v10 = vcombine.low %v1274_v54, %v1278_v55 }
 0x346   : > { %7456 = vmatprep.subr.bf16.mxu0 %v9803_v4  ;;  %7497 = vmatprep.subr.bf16.mxu1 %v9931_v7  ;;  %v1406_v57 = vld [vmem:[%s10757_s27 + $0x1f70] sm:$0xff] }
 0x347   : > { %v10019_v1 = vcombine.high %v1402_v56, %v1406_v57  ;;  %v1266_v63 = vld [vmem:[%s10757_s27 + $0x1b10] sm:$0xff]  ;;  %v10018_v12 = vcombine.low %v1402_v56, %v1406_v57 }
 0x348   : > { %v1270_v3 = vld [vmem:[%s10757_s27 + $0x1b30] sm:$0xff] }
 0x349   : > { %7457 = vmatpush1.bf16.msra.mxu0 %v9802_v15  ;;  %7498 = vmatpush1.bf16.msra.mxu1 %v9930_v17  ;;  %v1394_v4 = vld [vmem:[%s10757_s27 + $0x1f10] sm:$0xff]  ;;  %v9883_v13 = vcombine.high %v1266_v63, %v1270_v3  ;;  %v9882_v24 = vcombine.low %v1266_v63, %v1270_v3 }
 0x34a   : > { %7458 = vmatprep.subr.bf16.mxu0 %v9795_v19  ;;  %7499 = vmatprep.subr.bf16.mxu1 %v9923_v22  ;;  %v1398_v7 = vld [vmem:[%s10757_s27 + $0x1f30] sm:$0xff] }
 0x34b   : > { %v10011_v61 = vcombine.high %v1394_v4, %v1398_v7  ;;  %v1258_v15 = vld [vmem:[%s10757_s27 + $0x1ad0] sm:$0xff]  ;;  %v10010_v11 = vcombine.low %v1394_v4, %v1398_v7 }
 0x34c   : > { %v1262_v17 = vld [vmem:[%s10757_s27 + $0x1af0] sm:$0xff] }
 0x34d   : > { %7459 = vmatpush1.bf16.msra.mxu0 %v9794_v26  ;;  %7500 = vmatpush1.bf16.msra.mxu1 %v9922_v29  ;;  %v1386_v19 = vld [vmem:[%s10757_s27 + $0x1ed0] sm:$0xff]  ;;  %v9875_v8 = vcombine.high %v1258_v15, %v1262_v17  ;;  %v9874_v23 = vcombine.low %v1258_v15, %v1262_v17 }
 0x34e   : > { %7460 = vmatprep.subr.bf16.mxu0 %v9787_v32  ;;  %7501 = vmatprep.subr.bf16.mxu1 %v9915_v21  ;;  %v1390_v22 = vld [vmem:[%s10757_s27 + $0x1ef0] sm:$0xff] }
 0x34f   : > { %v10003_v25 = vcombine.high %v1386_v19, %v1390_v22  ;;  %v1250_v26 = vld [vmem:[%s10757_s27 + $0x1a90] sm:$0xff]  ;;  %v10002_v33 = vcombine.low %v1386_v19, %v1390_v22 }
 0x350   : > { %v1254_v29 = vld [vmem:[%s10757_s27 + $0x1ab0] sm:$0xff] }
 0x351   : > { %7461 = vmatpush1.bf16.msra.mxu0 %v9786_v37  ;;  %7502 = vmatpush1.bf16.msra.mxu1 %v9914_v39  ;;  %v1378_v32 = vld [vmem:[%s10757_s27 + $0x1e90] sm:$0xff]  ;;  %v9867_v34 = vcombine.high %v1250_v26, %v1254_v29  ;;  %v9866_v42 = vcombine.low %v1250_v26, %v1254_v29  ;;  %v575_v26 = vld [vmem:[%s10757_s27 + $0x578] sm:$0xff] }
 0x352   : > { %7462 = vmatprep.subr.bf16.mxu0 %v9907_v30  ;;  %7503 = vmatprep.subr.bf16.mxu1 %v10035_v41  ;;  %v1382_v21 = vld [vmem:[%s10757_s27 + $0x1eb0] sm:$0xff] }
 0x353   : > { %v9995_v35 = vcombine.high %v1378_v32, %v1382_v21  ;;  %v1242_v37 = vld [vmem:[%s10757_s27 + $0x1a50] sm:$0xff]  ;;  %v9994_v43 = vcombine.low %v1378_v32, %v1382_v21 }
 0x354   : > { %v1246_v39 = vld [vmem:[%s10757_s27 + $0x1a70] sm:$0xff] }
 0x355   : > { %7463 = vmatpush2.bf16.msra.mxu0 %v9906_v49  ;;  %7504 = vmatpush2.bf16.msra.mxu1 %v10034_v50  ;;  %v1370_v30 = vld [vmem:[%s10757_s27 + $0x1e50] sm:$0xff]  ;;  %v9859_v45 = vcombine.high %v1242_v37, %v1246_v39  ;;  %v9858_v54 = vcombine.low %v1242_v37, %v1246_v39  ;;  %v435_v39 = vld [vmem:[%s10757_s27 + $0x118] sm:$0xff] }
 0x356   : > { %7464 = vmatprep.subr.bf16.mxu0 %v9899_v52  ;;  %7505 = vmatprep.subr.bf16.mxu1 %v10027_v53  ;;  %v1374_v41 = vld [vmem:[%s10757_s27 + $0x1e70] sm:$0xff] }
 0x357   : > { %v9987_v46 = vcombine.high %v1370_v30, %v1374_v41  ;;  %v1234_v49 = vld [vmem:[%s10757_s27 + $0x1a10] sm:$0xff]  ;;  %v9986_v55 = vcombine.low %v1370_v30, %v1374_v41  ;;  %v439_v30 = vld [vmem:[%s10757_s27 + $0x138] sm:$0xff] }
 0x358   : > { %v1238_v50 = vld [vmem:[%s10757_s27 + $0x1a30] sm:$0xff] }
 0x359   : > { %7465 = vmatpush2.bf16.msra.mxu0 %v9898_v60  ;;  %7506 = vmatpush2.bf16.msra.mxu1 %v10026_v62  ;;  %v1362_v52 = vld [vmem:[%s10757_s27 + $0x1e10] sm:$0xff]  ;;  %v9851_v56 = vcombine.high %v1234_v49, %v1238_v50  ;;  %v459_v60 = vld [vmem:[%s10757_s27 + $0x1d8] sm:$0xff]  ;;  %v9850_v63 = vcombine.low %v1234_v49, %v1238_v50 }
 0x35a   : > { %7466 = vmatprep.subr.bf16.mxu0 %v9891_v0  ;;  %7507 = vmatprep.subr.bf16.mxu1 %v10019_v1  ;;  %v1366_v53 = vld [vmem:[%s10757_s27 + $0x1e30] sm:$0xff]  ;;  %v463_v62 = vld [vmem:[%s10757_s27 + $0x1f8] sm:$0xff] }
 0x35b   : > { %v9979_v57 = vcombine.high %v1362_v52, %v1366_v53  ;;  %v587_v0 = vld [vmem:[%s10757_s27 + $0x5d8] sm:$0xff]  ;;  %v9978_v3 = vcombine.low %v1362_v52, %v1366_v53  ;;  %v9077_v4 = vcombine.high %v459_v60, %v463_v62  ;;  %v9076_v15 = vcombine.low %v459_v60, %v463_v62 }
 0x35c   : > { %v591_v1 = vld [vmem:[%s10757_s27 + $0x5f8] sm:$0xff]  ;;  %v9053_v53 = vcombine.high %v435_v39, %v439_v30 }
 0x35d   : > { %7467 = vmatpush2.bf16.msra.mxu0 %v9890_v10  ;;  %7508 = vmatpush2.bf16.msra.mxu1 %v10018_v12  ;;  %v9205_v7 = vcombine.high %v587_v0, %v591_v1  ;;  %v451_v10 = vld [vmem:[%s10757_s27 + $0x198] sm:$0xff]  ;;  %v9204_v17 = vcombine.low %v587_v0, %v591_v1 }
 0x35e   : > { %7468 = vmatprep.subr.bf16.mxu0 %v9883_v13  ;;  %7509 = vmatprep.subr.bf16.mxu1 %v10011_v61  ;;  %v455_v12 = vld [vmem:[%s10757_s27 + $0x1b8] sm:$0xff] }
 0x35f   : > { %v579_v13 = vld [vmem:[%s10757_s27 + $0x598] sm:$0xff]  ;;  %v9069_v19 = vcombine.high %v451_v10, %v455_v12  ;;  %v9068_v32 = vcombine.low %v451_v10, %v455_v12 }
 0x360   : > { %v583_v61 = vld [vmem:[%s10757_s27 + $0x5b8] sm:$0xff] }
 0x361   : > { %7469 = vmatpush2.bf16.msra.mxu0 %v9882_v24  ;;  %7510 = vmatpush2.bf16.msra.mxu1 %v10010_v11  ;;  %v9197_v22 = vcombine.high %v579_v13, %v583_v61  ;;  %v443_v24 = vld [vmem:[%s10757_s27 + $0x158] sm:$0xff] }
 0x362   : > { %7470 = vmatprep.subr.bf16.mxu0 %v9875_v8  ;;  %7511 = vmatprep.subr.bf16.mxu1 %v10003_v25  ;;  %v447_v11 = vld [vmem:[%s10757_s27 + $0x178] sm:$0xff] }
 0x363   : > { %v571_v25 = vld [vmem:[%s10757_s27 + $0x558] sm:$0xff]  ;;  %v9060_v49 = vcombine.low %v443_v24, %v447_v11 }
 0x364   : > { %v9189_v37 = vcombine.high %v571_v25, %v575_v26  ;;  %v9188_v52 = vcombine.low %v571_v25, %v575_v26  ;;  %v559_v60 = vld [vmem:[%s10757_s27 + $0x4f8] sm:$0xff] }
 0x365   : > { %7471 = vmatpush2.bf16.msra.mxu0 %v9874_v23  ;;  %7512 = vmatpush2.bf16.msra.mxu1 %v10002_v33  ;;  %v9196_v33 = vcombine.low %v579_v13, %v583_v61  ;;  %v403_v26 = vld [vmem:[%s10757_s27 + $0x18] sm:$0xff] }
 0x366   : > { %7472 = vmatprep.subr.bf16.mxu0 %v9867_v34  ;;  %7513 = vmatprep.subr.bf16.mxu1 %v9995_v35  ;;  %v9061_v34 = vcombine.high %v443_v24, %v447_v11 }
 0x369   : > { %7473 = vmatpush2.bf16.msra.mxu0 %v9866_v42  ;;  %7514 = vmatpush2.bf16.msra.mxu1 %v9994_v43  ;;  %v563_v43 = vld [vmem:[%s10757_s27 + $0x518] sm:$0xff] }
 0x36a   : > { %7474 = vmatprep.subr.bf16.mxu0 %v9859_v45  ;;  %7515 = vmatprep.subr.bf16.mxu1 %v9987_v46  ;;  %v567_v45 = vld [vmem:[%s10757_s27 + $0x538] sm:$0xff] }
 0x36b   : > { %v9180_v62 = vcombine.low %v563_v43, %v567_v45 }
 0x36d   : > { %7475 = vmatpush2.bf16.msra.mxu0 %v9858_v54  ;;  %7516 = vmatpush2.bf16.msra.mxu1 %v9986_v55  ;;  %v9181_v54 = vcombine.high %v563_v43, %v567_v45  ;;  %v427_v55 = vld [vmem:[%s10757_s27 + $0xd8] sm:$0xff] }
 0x36e   : > { %7476 = vmatprep.subr.bf16.mxu0 %v9851_v56  ;;  %7517 = vmatprep.subr.bf16.mxu1 %v9979_v57  ;;  %v431_v56 = vld [vmem:[%s10757_s27 + $0xf8] sm:$0xff] }
 0x36f   : > { %v555_v57 = vld [vmem:[%s10757_s27 + $0x4d8] sm:$0xff]  ;;  %v9045_v0 = vcombine.high %v427_v55, %v431_v56  ;;  %v9044_v10 = vcombine.low %v427_v55, %v431_v56 }
 0x370   : > { %v9173_v1 = vcombine.high %v555_v57, %v559_v60  ;;  %v9172_v12 = vcombine.low %v555_v57, %v559_v60  ;;  %v655_v43 = vld [vmem:[%s10757_s27 + $0x7f8] sm:$0xff] }
 0x371   : > { %7477 = vmatpush2.bf16.msra.mxu0 %v9850_v63  ;;  %7518 = vmatpush2.bf16.msra.mxu1 %v9978_v3  ;;  %v419_v63 = vld [vmem:[%s10757_s27 + $0x98] sm:$0xff] }
 0x372   : > { %7528 = vmatprep.subr.bf16.mxu0 %v9077_v4  ;;  %7569 = vmatprep.subr.bf16.mxu1 %v9205_v7  ;;  %v423_v3 = vld [vmem:[%s10757_s27 + $0xb8] sm:$0xff] }
 0x373   : > { %v547_v4 = vld [vmem:[%s10757_s27 + $0x498] sm:$0xff]  ;;  %v9037_v13 = vcombine.high %v419_v63, %v423_v3  ;;  %v9036_v24 = vcombine.low %v419_v63, %v423_v3 }
 0x374   : > { %v7234_v8 = vpop.f32.mrf.mxu0  ;;  %7479 = vmatmul.mubr.bf16.vlgmr.msra.gmra.mxu0 %v11091_v44  ;;  %v7275_v29 = vpop.f32.mrf.mxu1  ;;  %7520 = vmatmul.mubr.bf16.vlgmr.msra.gmra.mxu1 %v11095_v47  ;;  %v551_v7 = vld [vmem:[%s10757_s27 + $0x4b8] sm:$0xff] }
 0x375   : > { %7529 = vmatpush1.bf16.msra.mxu0 %v9076_v15  ;;  %v11691_v21 = vadd.f32 %v7275_v29, %v7234_v8  ;;  %7570 = vmatpush1.bf16.msra.mxu1 %v9204_v17  ;;  %v9165_v61 = vcombine.high %v547_v4, %v551_v7  ;;  %v411_v15 = vld [vmem:[%s10757_s27 + $0x58] sm:$0xff]  ;;  %v9164_v11 = vcombine.low %v547_v4, %v551_v7 }
 0x376   : > { %v7236_v23 = vpop.f32.mrf.mxu0  ;;  %7530 = vmatprep.subr.bf16.mxu0 %v9069_v19  ;;  %v7277_v35 = vpop.f32.mrf.mxu1  ;;  %7571 = vmatprep.subr.bf16.mxu1 %v9197_v22  ;;  %v415_v17 = vld [vmem:[%s10757_s27 + $0x78] sm:$0xff] }
 0x377   : > { %7560 = vmatprep.mubr.bf16.mxu0 %v10803_v58  ;;  %v11696_v41 = vadd.f32 %v7277_v35, %v7236_v23  ;;  %7601 = vmatprep.mubr.bf16.mxu1 %v10805_v59  ;;  %v9052_v59 = vcombine.low %v435_v39, %v439_v30  ;;  %v539_v19 = vld [vmem:[%s10757_s27 + $0x458] sm:$0xff]  ;;  %v9029_v8 = vcombine.high %v411_v15, %v415_v17 }
 0x378   : > { %v7238_v42 = vpop.f32.mrf.mxu0  ;;  %v7279_v46 = vpop.f32.mrf.mxu1  ;;  %v543_v22 = vld [vmem:[%s10757_s27 + $0x478] sm:$0xff] }
 0x379   : > { %7531 = vmatpush1.bf16.msra.mxu0 %v9068_v32  ;;  %7572 = vmatpush1.bf16.msra.mxu1 %v9196_v33  ;;  %v9157_v25 = vcombine.high %v539_v19, %v543_v22  ;;  %v407_v29 = vld [vmem:[%s10757_s27 + $0x38] sm:$0xff]  ;;  %v9028_v33 = vcombine.low %v411_v15, %v415_v17 }
 0x37a   : > { %v7239_v50 = vpop.f32.mrf.mxu0  ;;  %7532 = vmatprep.subr.bf16.mxu0 %v9061_v34  ;;  %v7280_v58 = vpop.f32.mrf.mxu1  ;;  %7573 = vmatprep.subr.bf16.mxu1 %v9189_v37  ;;  %v531_v32 = vld [vmem:[%s10757_s27 + $0x418] sm:$0xff]  ;;  %v9156_v34 = vcombine.low %v539_v19, %v543_v22  ;;  %v9021_v35 = vcombine.high %v403_v26, %v407_v29  ;;  %v9020_v45 = vcombine.low %v403_v26, %v407_v29 }
 0x37b   : > { %v535_v23 = vld [vmem:[%s10757_s27 + $0x438] sm:$0xff] }
 0x37c   : > { %v9149_v37 = vcombine.high %v531_v32, %v535_v23  ;;  %v523_v39 = vld [vmem:[%s10757_s27 + $0x3d8] sm:$0xff]  ;;  %v9148_v46 = vcombine.low %v531_v32, %v535_v23 }
 0x37d   : > { %7533 = vmatpush1.bf16.msra.mxu0 %v9060_v49  ;;  %7574 = vmatpush1.bf16.msra.mxu1 %v9188_v52  ;;  %v527_v30 = vld [vmem:[%s10757_s27 + $0x3f8] sm:$0xff] }
 0x37e   : > { %7534 = vmatprep.subr.bf16.mxu0 %v9053_v53  ;;  %7575 = vmatprep.subr.bf16.mxu1 %v9181_v54  ;;  %v651_v42 = vld [vmem:[%s10757_s27 + $0x7d8] sm:$0xff]  ;;  %v9141_v49 = vcombine.high %v523_v39, %v527_v30  ;;  %v9140_v55 = vcombine.low %v523_v39, %v527_v30 }
 0x37f   : > { %v9269_v50 = vcombine.high %v651_v42, %v655_v43  ;;  %v515_v52 = vld [vmem:[%s10757_s27 + $0x398] sm:$0xff]  ;;  %v9268_v56 = vcombine.low %v651_v42, %v655_v43 }
 0x380   : > { %v519_v53 = vld [vmem:[%s10757_s27 + $0x3b8] sm:$0xff] }
 0x381   : > { %7535 = vmatpush1.bf16.msra.mxu0 %v9052_v59  ;;  %7576 = vmatpush1.bf16.msra.mxu1 %v9180_v62  ;;  %v643_v58 = vld [vmem:[%s10757_s27 + $0x798] sm:$0xff]  ;;  %v9133_v57 = vcombine.high %v515_v52, %v519_v53  ;;  %v9132_v63 = vcombine.low %v515_v52, %v519_v53 }
 0x382   : > { %7536 = vmatprep.subr.bf16.mxu0 %v9045_v0  ;;  %7577 = vmatprep.subr.bf16.mxu1 %v9173_v1  ;;  %v647_v54 = vld [vmem:[%s10757_s27 + $0x7b8] sm:$0xff] }
 0x383   : > { %v9261_v60 = vcombine.high %v643_v58, %v647_v54  ;;  %v507_v59 = vld [vmem:[%s10757_s27 + $0x358] sm:$0xff]  ;;  %v9260_v3 = vcombine.low %v643_v58, %v647_v54 }
 0x384   : > { %v511_v62 = vld [vmem:[%s10757_s27 + $0x378] sm:$0xff] }
 0x385   : > { %7537 = vmatpush1.bf16.msra.mxu0 %v9044_v10  ;;  %7578 = vmatpush1.bf16.msra.mxu1 %v9172_v12  ;;  %v635_v0 = vld [vmem:[%s10757_s27 + $0x758] sm:$0xff]  ;;  %v9125_v4 = vcombine.high %v507_v59, %v511_v62  ;;  %v9124_v15 = vcombine.low %v507_v59, %v511_v62 }
 0x386   : > { %7538 = vmatprep.subr.bf16.mxu0 %v9037_v13  ;;  %7579 = vmatprep.subr.bf16.mxu1 %v9165_v61  ;;  %v639_v1 = vld [vmem:[%s10757_s27 + $0x778] sm:$0xff] }
 0x387   : > { %v9253_v7 = vcombine.high %v635_v0, %v639_v1  ;;  %v499_v10 = vld [vmem:[%s10757_s27 + $0x318] sm:$0xff]  ;;  %v9252_v17 = vcombine.low %v635_v0, %v639_v1 }
 0x388   : > { %v503_v12 = vld [vmem:[%s10757_s27 + $0x338] sm:$0xff] }
 0x389   : > { %7539 = vmatpush1.bf16.msra.mxu0 %v9036_v24  ;;  %7580 = vmatpush1.bf16.msra.mxu1 %v9164_v11  ;;  %v627_v13 = vld [vmem:[%s10757_s27 + $0x718] sm:$0xff]  ;;  %v9117_v19 = vcombine.high %v499_v10, %v503_v12  ;;  %v9116_v26 = vcombine.low %v499_v10, %v503_v12 }
 0x38a   : > { %7540 = vmatprep.subr.bf16.mxu0 %v9029_v8  ;;  %7581 = vmatprep.subr.bf16.mxu1 %v9157_v25  ;;  %v631_v61 = vld [vmem:[%s10757_s27 + $0x738] sm:$0xff] }
 0x38b   : > { %v9245_v22 = vcombine.high %v627_v13, %v631_v61  ;;  %v491_v24 = vld [vmem:[%s10757_s27 + $0x2d8] sm:$0xff]  ;;  %v9244_v29 = vcombine.low %v627_v13, %v631_v61 }
 0x38c   : > { %v495_v11 = vld [vmem:[%s10757_s27 + $0x2f8] sm:$0xff] }
 0x38d   : > { %7541 = vmatpush1.bf16.msra.mxu0 %v9028_v33  ;;  %7582 = vmatpush1.bf16.msra.mxu1 %v9156_v34  ;;  %v619_v8 = vld [vmem:[%s10757_s27 + $0x6d8] sm:$0xff]  ;;  %v9109_v32 = vcombine.high %v491_v24, %v495_v11  ;;  %v9108_v39 = vcombine.low %v491_v24, %v495_v11 }
 0x38e   : > { %7542 = vmatprep.subr.bf16.mxu0 %v9021_v35  ;;  %7583 = vmatprep.subr.bf16.mxu1 %v9149_v37  ;;  %v623_v25 = vld [vmem:[%s10757_s27 + $0x6f8] sm:$0xff] }
 0x38f   : > { %v9237_v23 = vcombine.high %v619_v8, %v623_v25  ;;  %v483_v33 = vld [vmem:[%s10757_s27 + $0x298] sm:$0xff]  ;;  %v9236_v30 = vcombine.low %v619_v8, %v623_v25 }
 0x390   : > { %v487_v34 = vld [vmem:[%s10757_s27 + $0x2b8] sm:$0xff] }
 0x391   : > { %7543 = vmatpush1.bf16.msra.mxu0 %v9020_v45  ;;  %7584 = vmatpush1.bf16.msra.mxu1 %v9148_v46  ;;  %v611_v35 = vld [vmem:[%s10757_s27 + $0x698] sm:$0xff]  ;;  %v9101_v42 = vcombine.high %v483_v33, %v487_v34  ;;  %v9100_v52 = vcombine.low %v483_v33, %v487_v34 }
 0x392   : > { %7544 = vmatprep.subr.bf16.mxu0 %v9141_v49  ;;  %7585 = vmatprep.subr.bf16.mxu1 %v9269_v50  ;;  %v615_v37 = vld [vmem:[%s10757_s27 + $0x6b8] sm:$0xff] }
 0x393   : > { %v9229_v43 = vcombine.high %v611_v35, %v615_v37  ;;  %v475_v45 = vld [vmem:[%s10757_s27 + $0x258] sm:$0xff]  ;;  %v9228_v53 = vcombine.low %v611_v35, %v615_v37 }
 0x394   : > { %v479_v46 = vld [vmem:[%s10757_s27 + $0x278] sm:$0xff] }
 0x395   : > { %7545 = vmatpush2.bf16.msra.mxu0 %v9140_v55  ;;  %7586 = vmatpush2.bf16.msra.mxu1 %v9268_v56  ;;  %v603_v49 = vld [vmem:[%s10757_s27 + $0x658] sm:$0xff]  ;;  %v9093_v58 = vcombine.high %v475_v45, %v479_v46  ;;  %v9092_v59 = vcombine.low %v475_v45, %v479_v46 }
 0x396   : > { %7546 = vmatprep.subr.bf16.mxu0 %v9133_v57  ;;  %7587 = vmatprep.subr.bf16.mxu1 %v9261_v60  ;;  %v607_v50 = vld [vmem:[%s10757_s27 + $0x678] sm:$0xff] }
 0x397   : > { %v9221_v54 = vcombine.high %v603_v49, %v607_v50  ;;  %v467_v55 = vld [vmem:[%s10757_s27 + $0x218] sm:$0xff]  ;;  %v9220_v62 = vcombine.low %v603_v49, %v607_v50 }
 0x398   : > { %v471_v56 = vld [vmem:[%s10757_s27 + $0x238] sm:$0xff] }
 0x399   : > { %7547 = vmatpush2.bf16.msra.mxu0 %v9132_v63  ;;  %7588 = vmatpush2.bf16.msra.mxu1 %v9260_v3  ;;  %v595_v57 = vld [vmem:[%s10757_s27 + $0x618] sm:$0xff]  ;;  %v9085_v0 = vcombine.high %v467_v55, %v471_v56  ;;  %v9084_v10 = vcombine.low %v467_v55, %v471_v56 }
 0x39a   : > { %7548 = vmatprep.subr.bf16.mxu0 %v9125_v4  ;;  %7589 = vmatprep.subr.bf16.mxu1 %v9253_v7  ;;  %v599_v60 = vld [vmem:[%s10757_s27 + $0x638] sm:$0xff] }
 0x39b   : > { %v9213_v1 = vcombine.high %v595_v57, %v599_v60  ;;  %v715_v63 = vld [vmem:[%s10757_s27 + $0x9d8] sm:$0xff]  ;;  %v9212_v12 = vcombine.low %v595_v57, %v599_v60 }
 0x39c   : > { %v719_v3 = vld [vmem:[%s10757_s27 + $0x9f8] sm:$0xff] }
 0x39d   : > { %7549 = vmatpush2.bf16.msra.mxu0 %v9124_v15  ;;  %7590 = vmatpush2.bf16.msra.mxu1 %v9252_v17  ;;  %v843_v4 = vld [vmem:[%s10757_s27 + $0xdd8] sm:$0xff]  ;;  %v9333_v13 = vcombine.high %v715_v63, %v719_v3  ;;  %v9332_v24 = vcombine.low %v715_v63, %v719_v3 }
 0x39e   : > { %7550 = vmatprep.subr.bf16.mxu0 %v9117_v19  ;;  %7591 = vmatprep.subr.bf16.mxu1 %v9245_v22  ;;  %v847_v7 = vld [vmem:[%s10757_s27 + $0xdf8] sm:$0xff] }
 0x39f   : > { %v9461_v61 = vcombine.high %v843_v4, %v847_v7  ;;  %v707_v15 = vld [vmem:[%s10757_s27 + $0x998] sm:$0xff]  ;;  %v9460_v11 = vcombine.low %v843_v4, %v847_v7 }
 0x3a0   : > { %v711_v17 = vld [vmem:[%s10757_s27 + $0x9b8] sm:$0xff] }
 0x3a1   : > { %7551 = vmatpush2.bf16.msra.mxu0 %v9116_v26  ;;  %7592 = vmatpush2.bf16.msra.mxu1 %v9244_v29  ;;  %v835_v19 = vld [vmem:[%s10757_s27 + $0xd98] sm:$0xff]  ;;  %v9325_v8 = vcombine.high %v707_v15, %v711_v17  ;;  %v9324_v37 = vcombine.low %v707_v15, %v711_v17 }
 0x3a2   : > { %7552 = vmatprep.subr.bf16.mxu0 %v9109_v32  ;;  %7593 = vmatprep.subr.bf16.mxu1 %v9237_v23  ;;  %v839_v22 = vld [vmem:[%s10757_s27 + $0xdb8] sm:$0xff] }
 0x3a3   : > { %v9453_v25 = vcombine.high %v835_v19, %v839_v22  ;;  %v699_v26 = vld [vmem:[%s10757_s27 + $0x958] sm:$0xff] }
 0x3a4   : > { %v703_v29 = vld [vmem:[%s10757_s27 + $0x978] sm:$0xff] }
 0x3a5   : > { %7553 = vmatpush2.bf16.msra.mxu0 %v9108_v39  ;;  %7594 = vmatpush2.bf16.msra.mxu1 %v9236_v30  ;;  %v827_v23 = vld [vmem:[%s10757_s27 + $0xd58] sm:$0xff]  ;;  %v9452_v30 = vcombine.low %v835_v19, %v839_v22 }
 0x3a6   : > { %7554 = vmatprep.subr.bf16.mxu0 %v9101_v42  ;;  %7595 = vmatprep.subr.bf16.mxu1 %v9229_v43  ;;  %v831_v33 = vld [vmem:[%s10757_s27 + $0xd78] sm:$0xff]  ;;  %v9317_v42 = vcombine.high %v699_v26, %v703_v29 }
 0x3a7   : > { %v691_v46 = vld [vmem:[%s10757_s27 + $0x918] sm:$0xff]  ;;  %v9444_v55 = vcombine.low %v827_v23, %v831_v33 }
 0x3a8   : > { %v695_v49 = vld [vmem:[%s10757_s27 + $0x938] sm:$0xff] }
 0x3a9   : > { %7555 = vmatpush2.bf16.msra.mxu0 %v9100_v52  ;;  %7596 = vmatpush2.bf16.msra.mxu1 %v9228_v53  ;;  %v819_v50 = vld [vmem:[%s10757_s27 + $0xd18] sm:$0xff]  ;;  %v9309_v56 = vcombine.high %v691_v46, %v695_v49 }
 0x3aa   : > { %7556 = vmatprep.subr.bf16.mxu0 %v9093_v58  ;;  %7597 = vmatprep.subr.bf16.mxu1 %v9221_v54  ;;  %v823_v52 = vld [vmem:[%s10757_s27 + $0xd38] sm:$0xff] }
 0x3ab   : > { %v9437_v57 = vcombine.high %v819_v50, %v823_v52  ;;  %v683_v60 = vld [vmem:[%s10757_s27 + $0x8d8] sm:$0xff] }
 0x3ac   : > { %v675_v4 = vld [vmem:[%s10757_s27 + $0x898] sm:$0xff] }
 0x3ad   : > { %7557 = vmatpush2.bf16.msra.mxu0 %v9092_v59  ;;  %7598 = vmatpush2.bf16.msra.mxu1 %v9220_v62  ;;  %v811_v59 = vld [vmem:[%s10757_s27 + $0xcd8] sm:$0xff] }
 0x3ae   : > { %7558 = vmatprep.subr.bf16.mxu0 %v9085_v0  ;;  %7599 = vmatprep.subr.bf16.mxu1 %v9213_v1  ;;  %v815_v62 = vld [vmem:[%s10757_s27 + $0xcf8] sm:$0xff]  ;;  %v9308_v0 = vcombine.low %v691_v46, %v695_v49  ;;  %v9436_v1 = vcombine.low %v819_v50, %v823_v52 }
 0x3af   : > { %v9429_v3 = vcombine.high %v811_v59, %v815_v62  ;;  %v679_v7 = vld [vmem:[%s10757_s27 + $0x8b8] sm:$0xff] }
 0x3b0   : > { %v9293_v15 = vcombine.high %v675_v4, %v679_v7  ;;  %v667_v19 = vld [vmem:[%s10757_s27 + $0x858] sm:$0xff] }
 0x3b1   : > { %7559 = vmatpush2.bf16.msra.mxu0 %v9084_v10  ;;  %7600 = vmatpush2.bf16.msra.mxu1 %v9212_v12  ;;  %v803_v10 = vld [vmem:[%s10757_s27 + $0xc98] sm:$0xff] }
 0x3b2   : > { %7610 = vmatprep.subr.bf16.mxu0 %v9333_v13  ;;  %7651 = vmatprep.subr.bf16.mxu1 %v9461_v61  ;;  %v807_v12 = vld [vmem:[%s10757_s27 + $0xcb8] sm:$0xff]  ;;  %v9428_v61 = vcombine.low %v811_v59, %v815_v62 }
 0x3b3   : > { %v9421_v17 = vcombine.high %v803_v10, %v807_v12  ;;  %v671_v22 = vld [vmem:[%s10757_s27 + $0x878] sm:$0xff] }
 0x3b4   : > { %v7316_v32 = vpop.f32.mrf.mxu0  ;;  %7561 = vmatmul.mubr.bf16.vlgmr.msra.gmra.mxu0 %v10851_v16  ;;  %v7357_v35 = vpop.f32.mrf.mxu1  ;;  %7602 = vmatmul.mubr.bf16.vlgmr.msra.gmra.mxu1 %v10856_v20  ;;  %v771_v52 = vld [vmem:[%s10757_s27 + $0xb98] sm:$0xff] }
 0x3b5   : > { %v7317_v34 = vadd.f32 %v7316_v32, %v11691_v21  ;;  %7611 = vmatpush1.bf16.msra.mxu0 %v9332_v24  ;;  %7652 = vmatpush1.bf16.msra.mxu1 %v9460_v11  ;;  %v9445_v21 = vcombine.high %v827_v23, %v831_v33  ;;  %v795_v24 = vld [vmem:[%s10757_s27 + $0xc58] sm:$0xff] }
 0x3b6   : > { %v7318_v39 = vpop.f32.mrf.mxu0  ;;  %7612 = vmatprep.subr.bf16.mxu0 %v9325_v8  ;;  %v7359_v45 = vpop.f32.mrf.mxu1  ;;  %7653 = vmatprep.subr.bf16.mxu1 %v9453_v25  ;;  %v799_v11 = vld [vmem:[%s10757_s27 + $0xc78] sm:$0xff]  ;;  %v9292_v8 = vcombine.low %v675_v4, %v679_v7  ;;  %v9420_v25 = vcombine.low %v803_v10, %v807_v12 }
 0x3b7   : > { %v11764_v43 = vadd.f32 %v7357_v35, %v7317_v34  ;;  %v7319_v16 = vadd.f32 %v7318_v39, %v11696_v41  ;;  %7642 = vmatprep.mubr.bf16.mxu0 %v10861_v28  ;;  %7683 = vmatprep.mubr.bf16.mxu1 %v10866_v31  ;;  %v9316_v41 = vcombine.low %v699_v26, %v703_v29  ;;  %v687_v31 = vld [vmem:[%s10757_s27 + $0x8f8] sm:$0xff] }
 0x3b8   : > { %v7320_v20 = vpop.f32.mrf.mxu0  ;;  %v7361_v58 = vpop.f32.mrf.mxu1  ;;  %v9301_v63 = vcombine.high %v683_v60, %v687_v31  ;;  %v9300_v13 = vcombine.low %v683_v60, %v687_v31  ;;  %v9285_v26 = vcombine.high %v667_v19, %v671_v22  ;;  %v9413_v29 = vcombine.high %v795_v24, %v799_v11  ;;  %v659_v32 = vld [vmem:[%s10757_s27 + $0x818] sm:$0xff] }
 0x3b9   : > { %v11773_v53 = vadd.f32 %v7359_v45, %v7319_v16  ;;  %7613 = vmatpush1.bf16.msra.mxu0 %v9324_v37  ;;  %7654 = vmatpush1.bf16.msra.mxu1 %v9452_v30  ;;  %v663_v23 = vld [vmem:[%s10757_s27 + $0x838] sm:$0xff]  ;;  %v9284_v35 = vcombine.low %v667_v19, %v671_v22  ;;  %v9412_v37 = vcombine.low %v795_v24, %v799_v11 }
 0x3ba   : > { %v7321_v54 = vpop.f32.mrf.mxu0  ;;  %7614 = vmatprep.subr.bf16.mxu0 %v9317_v42  ;;  %v7362_v28 = vpop.f32.mrf.mxu1  ;;  %7655 = vmatprep.subr.bf16.mxu1 %v9445_v21  ;;  %v787_v33 = vld [vmem:[%s10757_s27 + $0xc18] sm:$0xff]  ;;  %v9277_v39 = vcombine.high %v659_v32, %v663_v23  ;;  %v9276_v46 = vcombine.low %v659_v32, %v663_v23 }
 0x3bb   : > { %v791_v34 = vld [vmem:[%s10757_s27 + $0xc38] sm:$0xff] }
 0x3bc   : > { %v9405_v30 = vcombine.high %v787_v33, %v791_v34  ;;  %v779_v42 = vld [vmem:[%s10757_s27 + $0xbd8] sm:$0xff]  ;;  %v9404_v49 = vcombine.low %v787_v33, %v791_v34 }
 0x3bd   : > { %7615 = vmatpush1.bf16.msra.mxu0 %v9316_v41  ;;  %7656 = vmatpush1.bf16.msra.mxu1 %v9444_v55  ;;  %v783_v16 = vld [vmem:[%s10757_s27 + $0xbf8] sm:$0xff] }
 0x3be   : > { %7616 = vmatprep.subr.bf16.mxu0 %v9309_v56  ;;  %7657 = vmatprep.subr.bf16.mxu1 %v9437_v57  ;;  %v907_v45 = vld [vmem:[%s10757_s27 + $0xfd8] sm:$0xff]  ;;  %v9397_v20 = vcombine.high %v779_v42, %v783_v16  ;;  %v9396_v55 = vcombine.low %v779_v42, %v783_v16 }
 0x3bf   : > { %v911_v21 = vld [vmem:[%s10757_s27 + $0xff8] sm:$0xff] }
 0x3c0   : > { %v9525_v50 = vcombine.high %v907_v45, %v911_v21  ;;  %v775_v58 = vld [vmem:[%s10757_s27 + $0xbb8] sm:$0xff]  ;;  %v9524_v56 = vcombine.low %v907_v45, %v911_v21 }
 0x3c1   : > { %7617 = vmatpush1.bf16.msra.mxu0 %v9308_v0  ;;  %7658 = vmatpush1.bf16.msra.mxu1 %v9436_v1  ;;  %v899_v41 = vld [vmem:[%s10757_s27 + $0xf98] sm:$0xff]  ;;  %v9389_v28 = vcombine.high %v771_v52, %v775_v58  ;;  %v9388_v0 = vcombine.low %v771_v52, %v775_v58 }
 0x3c2   : > { %7618 = vmatprep.subr.bf16.mxu0 %v9301_v63  ;;  %7659 = vmatprep.subr.bf16.mxu1 %v9429_v3  ;;  %v903_v54 = vld [vmem:[%s10757_s27 + $0xfb8] sm:$0xff] }
 0x3c3   : > { %v9517_v57 = vcombine.high %v899_v41, %v903_v54  ;;  %v763_v60 = vld [vmem:[%s10757_s27 + $0xb58] sm:$0xff]  ;;  %v9516_v1 = vcombine.low %v899_v41, %v903_v54 }
 0x3c4   : > { %v767_v31 = vld [vmem:[%s10757_s27 + $0xb78] sm:$0xff] }
 0x3c5   : > { %7619 = vmatpush1.bf16.msra.mxu0 %v9300_v13  ;;  %7660 = vmatpush1.bf16.msra.mxu1 %v9428_v61  ;;  %v891_v59 = vld [vmem:[%s10757_s27 + $0xf58] sm:$0xff]  ;;  %v9381_v63 = vcombine.high %v763_v60, %v767_v31  ;;  %v9380_v13 = vcombine.low %v763_v60, %v767_v31 }
 0x3c6   : > { %7620 = vmatprep.subr.bf16.mxu0 %v9293_v15  ;;  %7661 = vmatprep.subr.bf16.mxu1 %v9421_v17  ;;  %v895_v62 = vld [vmem:[%s10757_s27 + $0xf78] sm:$0xff] }
 0x3c7   : > { %v9509_v3 = vcombine.high %v891_v59, %v895_v62  ;;  %v755_v4 = vld [vmem:[%s10757_s27 + $0xb18] sm:$0xff]  ;;  %v9508_v61 = vcombine.low %v891_v59, %v895_v62 }
 0x3c8   : > { %v759_v7 = vld [vmem:[%s10757_s27 + $0xb38] sm:$0xff] }
 0x3c9   : > { %7621 = vmatpush1.bf16.msra.mxu0 %v9292_v8  ;;  %7662 = vmatpush1.bf16.msra.mxu1 %v9420_v25  ;;  %v883_v10 = vld [vmem:[%s10757_s27 + $0xf18] sm:$0xff]  ;;  %v9373_v15 = vcombine.high %v755_v4, %v759_v7  ;;  %v9372_v8 = vcombine.low %v755_v4, %v759_v7 }
 0x3ca   : > { %7622 = vmatprep.subr.bf16.mxu0 %v9285_v26  ;;  %7663 = vmatprep.subr.bf16.mxu1 %v9413_v29  ;;  %v887_v12 = vld [vmem:[%s10757_s27 + $0xf38] sm:$0xff] }
 0x3cb   : > { %v9501_v17 = vcombine.high %v883_v10, %v887_v12  ;;  %v747_v19 = vld [vmem:[%s10757_s27 + $0xad8] sm:$0xff]  ;;  %v9500_v25 = vcombine.low %v883_v10, %v887_v12 }
 0x3cc   : > { %v751_v22 = vld [vmem:[%s10757_s27 + $0xaf8] sm:$0xff] }
 0x3cd   : > { %7623 = vmatpush1.bf16.msra.mxu0 %v9284_v35  ;;  %7664 = vmatpush1.bf16.msra.mxu1 %v9412_v37  ;;  %v875_v24 = vld [vmem:[%s10757_s27 + $0xed8] sm:$0xff]  ;;  %v9365_v26 = vcombine.high %v747_v19, %v751_v22  ;;  %v9364_v35 = vcombine.low %v747_v19, %v751_v22 }
 0x3ce   : > { %7624 = vmatprep.subr.bf16.mxu0 %v9277_v39  ;;  %7665 = vmatprep.subr.bf16.mxu1 %v9405_v30  ;;  %v879_v11 = vld [vmem:[%s10757_s27 + $0xef8] sm:$0xff] }
 0x3cf   : > { %v9493_v29 = vcombine.high %v875_v24, %v879_v11  ;;  %v739_v32 = vld [vmem:[%s10757_s27 + $0xa98] sm:$0xff]  ;;  %v9492_v37 = vcombine.low %v875_v24, %v879_v11 }
 0x3d0   : > { %v743_v23 = vld [vmem:[%s10757_s27 + $0xab8] sm:$0xff] }
 0x3d1   : > { %7625 = vmatpush1.bf16.msra.mxu0 %v9276_v46  ;;  %7666 = vmatpush1.bf16.msra.mxu1 %v9404_v49  ;;  %v867_v33 = vld [vmem:[%s10757_s27 + $0xe98] sm:$0xff]  ;;  %v9357_v39 = vcombine.high %v739_v32, %v743_v23  ;;  %v9356_v46 = vcombine.low %v739_v32, %v743_v23 }
 0x3d2   : > { %7626 = vmatprep.subr.bf16.mxu0 %v9397_v20  ;;  %7667 = vmatprep.subr.bf16.mxu1 %v9525_v50  ;;  %v871_v34 = vld [vmem:[%s10757_s27 + $0xeb8] sm:$0xff] }
 0x3d3   : > { %v9485_v30 = vcombine.high %v867_v33, %v871_v34  ;;  %v731_v42 = vld [vmem:[%s10757_s27 + $0xa58] sm:$0xff]  ;;  %v9484_v49 = vcombine.low %v867_v33, %v871_v34 }
 0x3d4   : > { %v735_v16 = vld [vmem:[%s10757_s27 + $0xa78] sm:$0xff] }
 0x3d5   : > { %7627 = vmatpush2.bf16.msra.mxu0 %v9396_v55  ;;  %7668 = vmatpush2.bf16.msra.mxu1 %v9524_v56  ;;  %v859_v45 = vld [vmem:[%s10757_s27 + $0xe58] sm:$0xff]  ;;  %v9349_v20 = vcombine.high %v731_v42, %v735_v16  ;;  %v9348_v55 = vcombine.low %v731_v42, %v735_v16 }
 0x3d6   : > { %7628 = vmatprep.subr.bf16.mxu0 %v9389_v28  ;;  %7669 = vmatprep.subr.bf16.mxu1 %v9517_v57  ;;  %v863_v21 = vld [vmem:[%s10757_s27 + $0xe78] sm:$0xff] }
 0x3d7   : > { %v9477_v50 = vcombine.high %v859_v45, %v863_v21  ;;  %v723_v52 = vld [vmem:[%s10757_s27 + $0xa18] sm:$0xff]  ;;  %v9476_v56 = vcombine.low %v859_v45, %v863_v21 }
 0x3d8   : > { %v727_v58 = vld [vmem:[%s10757_s27 + $0xa38] sm:$0xff] }
 0x3d9   : > { %7629 = vmatpush2.bf16.msra.mxu0 %v9388_v0  ;;  %7670 = vmatpush2.bf16.msra.mxu1 %v9516_v1  ;;  %v851_v41 = vld [vmem:[%s10757_s27 + $0xe18] sm:$0xff]  ;;  %v9341_v28 = vcombine.high %v723_v52, %v727_v58  ;;  %v9340_v0 = vcombine.low %v723_v52, %v727_v58 }
 0x3da   : > { %7630 = vmatprep.subr.bf16.mxu0 %v9381_v63  ;;  %7671 = vmatprep.subr.bf16.mxu1 %v9509_v3  ;;  %v855_v54 = vld [vmem:[%s10757_s27 + $0xe38] sm:$0xff] }
 0x3db   : > { %v9469_v57 = vcombine.high %v851_v41, %v855_v54  ;;  %v971_v60 = vld [vmem:[%s10757_s27 + $0x11d8] sm:$0xff]  ;;  %v9468_v1 = vcombine.low %v851_v41, %v855_v54 }
 0x3dc   : > { %v975_v31 = vld [vmem:[%s10757_s27 + $0x11f8] sm:$0xff] }
 0x3dd   : > { %7631 = vmatpush2.bf16.msra.mxu0 %v9380_v13  ;;  %7672 = vmatpush2.bf16.msra.mxu1 %v9508_v61  ;;  %v1099_v59 = vld [vmem:[%s10757_s27 + $0x15d8] sm:$0xff]  ;;  %v9589_v63 = vcombine.high %v971_v60, %v975_v31  ;;  %v9588_v13 = vcombine.low %v971_v60, %v975_v31 }
 0x3de   : > { %7632 = vmatprep.subr.bf16.mxu0 %v9373_v15  ;;  %7673 = vmatprep.subr.bf16.mxu1 %v9501_v17  ;;  %v1103_v62 = vld [vmem:[%s10757_s27 + $0x15f8] sm:$0xff] }
 0x3df   : > { %v9717_v3 = vcombine.high %v1099_v59, %v1103_v62  ;;  %v963_v4 = vld [vmem:[%s10757_s27 + $0x1198] sm:$0xff]  ;;  %v9716_v61 = vcombine.low %v1099_v59, %v1103_v62 }
 0x3e0   : > { %v967_v7 = vld [vmem:[%s10757_s27 + $0x11b8] sm:$0xff] }
 0x3e1   : > { %7633 = vmatpush2.bf16.msra.mxu0 %v9372_v8  ;;  %7674 = vmatpush2.bf16.msra.mxu1 %v9500_v25  ;;  %v1091_v10 = vld [vmem:[%s10757_s27 + $0x1598] sm:$0xff]  ;;  %v9581_v15 = vcombine.high %v963_v4, %v967_v7 }
 0x3e2   : > { %7634 = vmatprep.subr.bf16.mxu0 %v9365_v26  ;;  %7675 = vmatprep.subr.bf16.mxu1 %v9493_v29  ;;  %v1095_v12 = vld [vmem:[%s10757_s27 + $0x15b8] sm:$0xff]  ;;  %v9580_v29 = vcombine.low %v963_v4, %v967_v7 }
 0x3e3   : > { %v9709_v17 = vcombine.high %v1091_v10, %v1095_v12  ;;  %v955_v19 = vld [vmem:[%s10757_s27 + $0x1158] sm:$0xff]  ;;  %v9708_v23 = vcombine.low %v1091_v10, %v1095_v12 }
 0x3e4   : > { %v959_v22 = vld [vmem:[%s10757_s27 + $0x1178] sm:$0xff] }
 0x3e5   : > { %7635 = vmatpush2.bf16.msra.mxu0 %v9364_v35  ;;  %7676 = vmatpush2.bf16.msra.mxu1 %v9492_v37  ;;  %v1083_v11 = vld [vmem:[%s10757_s27 + $0x1558] sm:$0xff]  ;;  %v9573_v33 = vcombine.high %v955_v19, %v959_v22 }
 0x3e6   : > { %7636 = vmatprep.subr.bf16.mxu0 %v9357_v39  ;;  %7677 = vmatprep.subr.bf16.mxu1 %v9485_v30  ;;  %v1087_v8 = vld [vmem:[%s10757_s27 + $0x1578] sm:$0xff] }
 0x3e7   : > { %v947_v37 = vld [vmem:[%s10757_s27 + $0x1118] sm:$0xff] }
 0x3e8   : > { %v951_v39 = vld [vmem:[%s10757_s27 + $0x1138] sm:$0xff] }
 0x3e9   : > { %7637 = vmatpush2.bf16.msra.mxu0 %v9356_v46  ;;  %7678 = vmatpush2.bf16.msra.mxu1 %v9484_v49  ;;  %v1075_v30 = vld [vmem:[%s10757_s27 + $0x1518] sm:$0xff]  ;;  %v9700_v46 = vcombine.low %v1083_v11, %v1087_v8  ;;  %v9565_v49 = vcombine.high %v947_v37, %v951_v39  ;;  %v9564_v41 = vcombine.low %v947_v37, %v951_v39 }
 0x3ea   : > { %7638 = vmatprep.subr.bf16.mxu0 %v9349_v20  ;;  %7679 = vmatprep.subr.bf16.mxu1 %v9477_v50  ;;  %v1079_v42 = vld [vmem:[%s10757_s27 + $0x1538] sm:$0xff] }
 0x3eb   : > { %v9693_v20 = vcombine.high %v1075_v30, %v1079_v42  ;;  %v939_v50 = vld [vmem:[%s10757_s27 + $0x10d8] sm:$0xff]  ;;  %v9692_v54 = vcombine.low %v1075_v30, %v1079_v42 }
 0x3ec   : > { %v1067_v52 = vld [vmem:[%s10757_s27 + $0x14d8] sm:$0xff] }
 0x3ed   : > { %7639 = vmatpush2.bf16.msra.mxu0 %v9348_v55  ;;  %7680 = vmatpush2.bf16.msra.mxu1 %v9476_v56  ;;  %v1071_v58 = vld [vmem:[%s10757_s27 + $0x14f8] sm:$0xff] }
 0x3ee   : > { %7640 = vmatprep.subr.bf16.mxu0 %v9341_v28  ;;  %7681 = vmatprep.subr.bf16.mxu1 %v9469_v57  ;;  %v9685_v56 = vcombine.high %v1067_v52, %v1071_v58  ;;  %v931_v28 = vld [vmem:[%s10757_s27 + $0x1098] sm:$0xff]  ;;  %v9684_v62 = vcombine.low %v1067_v52, %v1071_v58 }
 0x3ef   : > { %v935_v57 = vld [vmem:[%s10757_s27 + $0x10b8] sm:$0xff] }
 0x3f0   : > { %v1059_v60 = vld [vmem:[%s10757_s27 + $0x1498] sm:$0xff]  ;;  %v9548_v10 = vcombine.low %v931_v28, %v935_v57 }
 0x3f1   : > { %7641 = vmatpush2.bf16.msra.mxu0 %v9340_v0  ;;  %7682 = vmatpush2.bf16.msra.mxu1 %v9468_v1  ;;  %v1063_v31 = vld [vmem:[%s10757_s27 + $0x14b8] sm:$0xff]  ;;  %v9549_v0 = vcombine.high %v931_v28, %v935_v57 }
 0x3f2   : > { %7692 = vmatprep.subr.bf16.mxu0 %v9589_v63  ;;  %7733 = vmatprep.subr.bf16.mxu1 %v9717_v3  ;;  %v9677_v1 = vcombine.high %v1059_v60, %v1063_v31  ;;  %v923_v63 = vld [vmem:[%s10757_s27 + $0x1058] sm:$0xff]  ;;  %v9676_v12 = vcombine.low %v1059_v60, %v1063_v31 }
 0x3f3   : > { %v927_v3 = vld [vmem:[%s10757_s27 + $0x1078] sm:$0xff] }
 0x3f4   : > { %v7398_v24 = vpop.f32.mrf.mxu0  ;;  %7643 = vmatmul.mubr.bf16.vlgmr.msra.gmra.mxu0 %v10931_v36  ;;  %v7439_v26 = vpop.f32.mrf.mxu1  ;;  %7684 = vmatmul.mubr.bf16.vlgmr.msra.gmra.mxu1 %v10936_v40  ;;  %v1051_v4 = vld [vmem:[%s10757_s27 + $0x1458] sm:$0xff] }
 0x3f5   : > { %v7399_v25 = vadd.f32 %v7398_v24, %v11764_v43  ;;  %7693 = vmatpush1.bf16.msra.mxu0 %v9588_v13  ;;  %7734 = vmatpush1.bf16.msra.mxu1 %v9716_v61  ;;  %v9701_v43 = vcombine.high %v1083_v11, %v1087_v8  ;;  %v1055_v7 = vld [vmem:[%s10757_s27 + $0x1478] sm:$0xff]  ;;  %v9541_v13 = vcombine.high %v923_v63, %v927_v3 }
 0x3f6   : > { %v7400_v32 = vpop.f32.mrf.mxu0  ;;  %7694 = vmatprep.subr.bf16.mxu0 %v9581_v15  ;;  %v7441_v35 = vpop.f32.mrf.mxu1  ;;  %7735 = vmatprep.subr.bf16.mxu1 %v9709_v17  ;;  %v9669_v61 = vcombine.high %v1051_v4, %v1055_v7  ;;  %v915_v15 = vld [vmem:[%s10757_s27 + $0x1018] sm:$0xff]  ;;  %v9540_v24 = vcombine.low %v923_v63, %v927_v3  ;;  %v9668_v11 = vcombine.low %v1051_v4, %v1055_v7 }
 0x3f7   : > { %v11838_v34 = vadd.f32 %v7439_v26, %v7399_v25  ;;  %v7401_v36 = vadd.f32 %v7400_v32, %v11773_v53  ;;  %7724 = vmatprep.mubr.bf16.mxu0 %v10941_v48  ;;  %7765 = vmatprep.mubr.bf16.mxu1 %v10946_v51  ;;  %v9572_v53 = vcombine.low %v955_v19, %v959_v22  ;;  %v943_v51 = vld [vmem:[%s10757_s27 + $0x10f8] sm:$0xff] }
 0x3f8   : > { %v7402_v40 = vpop.f32.mrf.mxu0  ;;  %v7443_v45 = vpop.f32.mrf.mxu1  ;;  %v9557_v55 = vcombine.high %v939_v50, %v943_v51  ;;  %v9556_v59 = vcombine.low %v939_v50, %v943_v51  ;;  %v919_v17 = vld [vmem:[%s10757_s27 + $0x1038] sm:$0xff] }
 0x3f9   : > { %v11847_v16 = vadd.f32 %v7441_v35, %v7401_v36  ;;  %7695 = vmatpush1.bf16.msra.mxu0 %v9580_v29  ;;  %7736 = vmatpush1.bf16.msra.mxu1 %v9708_v23  ;;  %v1043_v19 = vld [vmem:[%s10757_s27 + $0x1418] sm:$0xff]  ;;  %v9533_v8 = vcombine.high %v915_v15, %v919_v17 }
 0x3fa   : > { %v7403_v21 = vpop.f32.mrf.mxu0  ;;  %7696 = vmatprep.subr.bf16.mxu0 %v9573_v33  ;;  %v7444_v48 = vpop.f32.mrf.mxu1  ;;  %7737 = vmatprep.subr.bf16.mxu1 %v9701_v43  ;;  %v1047_v22 = vld [vmem:[%s10757_s27 + $0x1438] sm:$0xff]  ;;  %v9532_v33 = vcombine.low %v915_v15, %v919_v17 }
 0x3fb   : > { %v9661_v25 = vcombine.high %v1043_v19, %v1047_v22  ;;  %v1035_v26 = vld [vmem:[%s10757_s27 + $0x13d8] sm:$0xff]  ;;  %v9660_v36 = vcombine.low %v1043_v19, %v1047_v22 }
 0x3fc   : > { %v1039_v29 = vld [vmem:[%s10757_s27 + $0x13f8] sm:$0xff] }
 0x3fd   : > { %7697 = vmatpush1.bf16.msra.mxu0 %v9572_v53  ;;  %7738 = vmatpush1.bf16.msra.mxu1 %v9700_v46  ;;  %v1163_v32 = vld [vmem:[%s10757_s27 + $0x17d8] sm:$0xff]  ;;  %v9653_v35 = vcombine.high %v1035_v26, %v1039_v29  ;;  %v9652_v42 = vcombine.low %v1035_v26, %v1039_v29 }
 0x3fe   : > { %7698 = vmatprep.subr.bf16.mxu0 %v9565_v49  ;;  %7739 = vmatprep.subr.bf16.mxu1 %v9693_v20  ;;  %v1167_v23 = vld [vmem:[%s10757_s27 + $0x17f8] sm:$0xff] }
 0x3ff   : > { %v9781_v43 = vcombine.high %v1163_v32, %v1167_v23  ;;  %v1027_v37 = vld [vmem:[%s10757_s27 + $0x1398] sm:$0xff]  ;;  %v9780_v45 = vcombine.low %v1163_v32, %v1167_v23 }
 0x400   : > { %v1031_v39 = vld [vmem:[%s10757_s27 + $0x13b8] sm:$0xff] }
 0x401   : > { %7699 = vmatpush1.bf16.msra.mxu0 %v9564_v41  ;;  %7740 = vmatpush1.bf16.msra.mxu1 %v9692_v54  ;;  %v1155_v40 = vld [vmem:[%s10757_s27 + $0x1798] sm:$0xff]  ;;  %v9645_v53 = vcombine.high %v1027_v37, %v1031_v39  ;;  %v9644_v50 = vcombine.low %v1027_v37, %v1031_v39 }
 0x402   : > { %7700 = vmatprep.subr.bf16.mxu0 %v9557_v55  ;;  %7741 = vmatprep.subr.bf16.mxu1 %v9685_v56  ;;  %v1159_v30 = vld [vmem:[%s10757_s27 + $0x17b8] sm:$0xff] }
 0x403   : > { %v9773_v21 = vcombine.high %v1155_v40, %v1159_v30  ;;  %v1019_v46 = vld [vmem:[%s10757_s27 + $0x1358] sm:$0xff]  ;;  %v9772_v51 = vcombine.low %v1155_v40, %v1159_v30 }
 0x404   : > { %v1023_v49 = vld [vmem:[%s10757_s27 + $0x1378] sm:$0xff] }
 0x405   : > { %7701 = vmatpush1.bf16.msra.mxu0 %v9556_v59  ;;  %7742 = vmatpush1.bf16.msra.mxu1 %v9684_v62  ;;  %v1147_v48 = vld [vmem:[%s10757_s27 + $0x1758] sm:$0xff]  ;;  %v9637_v52 = vcombine.high %v1019_v46, %v1023_v49  ;;  %v9636_v28 = vcombine.low %v1019_v46, %v1023_v49 }
 0x406   : > { %7702 = vmatprep.subr.bf16.mxu0 %v9549_v0  ;;  %7743 = vmatprep.subr.bf16.mxu1 %v9677_v1  ;;  %v1151_v20 = vld [vmem:[%s10757_s27 + $0x1778] sm:$0xff] }
 0x407   : > { %v9765_v58 = vcombine.high %v1147_v48, %v1151_v20  ;;  %v1011_v41 = vld [vmem:[%s10757_s27 + $0x1318] sm:$0xff]  ;;  %v9764_v57 = vcombine.low %v1147_v48, %v1151_v20 }
 0x408   : > { %v1015_v54 = vld [vmem:[%s10757_s27 + $0x1338] sm:$0xff] }
 0x409   : > { %7703 = vmatpush1.bf16.msra.mxu0 %v9548_v10  ;;  %7744 = vmatpush1.bf16.msra.mxu1 %v9676_v12  ;;  %v1139_v55 = vld [vmem:[%s10757_s27 + $0x1718] sm:$0xff]  ;;  %v9629_v60 = vcombine.high %v1011_v41, %v1015_v54  ;;  %v9628_v63 = vcombine.low %v1011_v41, %v1015_v54 }
 0x40a   : > { %7704 = vmatprep.subr.bf16.mxu0 %v9541_v13  ;;  %7745 = vmatprep.subr.bf16.mxu1 %v9669_v61  ;;  %v1143_v56 = vld [vmem:[%s10757_s27 + $0x1738] sm:$0xff] }
 0x40b   : > { %v9757_v31 = vcombine.high %v1139_v55, %v1143_v56  ;;  %v1003_v59 = vld [vmem:[%s10757_s27 + $0x12d8] sm:$0xff]  ;;  %v9756_v3 = vcombine.low %v1139_v55, %v1143_v56 }
 0x40c   : > { %v1007_v62 = vld [vmem:[%s10757_s27 + $0x12f8] sm:$0xff] }
 0x40d   : > { %7705 = vmatpush1.bf16.msra.mxu0 %v9540_v24  ;;  %7746 = vmatpush1.bf16.msra.mxu1 %v9668_v11  ;;  %v1131_v0 = vld [vmem:[%s10757_s27 + $0x16d8] sm:$0xff]  ;;  %v9621_v4 = vcombine.high %v1003_v59, %v1007_v62  ;;  %v9620_v15 = vcombine.low %v1003_v59, %v1007_v62 }
 0x40e   : > { %7706 = vmatprep.subr.bf16.mxu0 %v9533_v8  ;;  %7747 = vmatprep.subr.bf16.mxu1 %v9661_v25  ;;  %v1135_v1 = vld [vmem:[%s10757_s27 + $0x16f8] sm:$0xff] }
 0x40f   : > { %v9749_v7 = vcombine.high %v1131_v0, %v1135_v1  ;;  %v995_v10 = vld [vmem:[%s10757_s27 + $0x1298] sm:$0xff]  ;;  %v9748_v17 = vcombine.low %v1131_v0, %v1135_v1 }
 0x410   : > { %v999_v12 = vld [vmem:[%s10757_s27 + $0x12b8] sm:$0xff] }
 0x411   : > { %7707 = vmatpush1.bf16.msra.mxu0 %v9532_v33  ;;  %7748 = vmatpush1.bf16.msra.mxu1 %v9660_v36  ;;  %v1123_v13 = vld [vmem:[%s10757_s27 + $0x1698] sm:$0xff]  ;;  %v9613_v19 = vcombine.high %v995_v10, %v999_v12  ;;  %v9612_v26 = vcombine.low %v995_v10, %v999_v12 }
 0x412   : > { %7708 = vmatprep.subr.bf16.mxu0 %v9653_v35  ;;  %7749 = vmatprep.subr.bf16.mxu1 %v9781_v43  ;;  %v1127_v61 = vld [vmem:[%s10757_s27 + $0x16b8] sm:$0xff] }
 0x413   : > { %v9741_v22 = vcombine.high %v1123_v13, %v1127_v61  ;;  %v987_v24 = vld [vmem:[%s10757_s27 + $0x1258] sm:$0xff]  ;;  %v9740_v29 = vcombine.low %v1123_v13, %v1127_v61 }
 0x414   : > { %v991_v11 = vld [vmem:[%s10757_s27 + $0x1278] sm:$0xff] }
 0x415   : > { %7709 = vmatpush2.bf16.msra.mxu0 %v9652_v42  ;;  %7750 = vmatpush2.bf16.msra.mxu1 %v9780_v45  ;;  %v1115_v8 = vld [vmem:[%s10757_s27 + $0x1658] sm:$0xff]  ;;  %v9605_v32 = vcombine.high %v987_v24, %v991_v11  ;;  %v9604_v37 = vcombine.low %v987_v24, %v991_v11 }
 0x416   : > { %7710 = vmatprep.subr.bf16.mxu0 %v9645_v53  ;;  %7751 = vmatprep.subr.bf16.mxu1 %v9773_v21  ;;  %v1119_v25 = vld [vmem:[%s10757_s27 + $0x1678] sm:$0xff] }
 0x417   : > { %v9733_v23 = vcombine.high %v1115_v8, %v1119_v25  ;;  %v979_v33 = vld [vmem:[%s10757_s27 + $0x1218] sm:$0xff]  ;;  %v9732_v39 = vcombine.low %v1115_v8, %v1119_v25 }
 0x418   : > { %v983_v36 = vld [vmem:[%s10757_s27 + $0x1238] sm:$0xff] }
 0x419   : > { %7711 = vmatpush2.bf16.msra.mxu0 %v9644_v50  ;;  %7752 = vmatpush2.bf16.msra.mxu1 %v9772_v51  ;;  %v1107_v35 = vld [vmem:[%s10757_s27 + $0x1618] sm:$0xff]  ;;  %v9597_v40 = vcombine.high %v979_v33, %v983_v36  ;;  %v9596_v46 = vcombine.low %v979_v33, %v983_v36 }
 0x41a   : > { %7712 = vmatprep.subr.bf16.mxu0 %v9637_v52  ;;  %7753 = vmatprep.subr.bf16.mxu1 %v9765_v58  ;;  %v1111_v43 = vld [vmem:[%s10757_s27 + $0x1638] sm:$0xff] }
 0x41b   : > { %v9725_v30 = vcombine.high %v1107_v35, %v1111_v43  ;;  %v1227_v42 = vld [vmem:[%s10757_s27 + $0x19d8] sm:$0xff]  ;;  %v9724_v49 = vcombine.low %v1107_v35, %v1111_v43 }
 0x41c   : > { %v1231_v45 = vld [vmem:[%s10757_s27 + $0x19f8] sm:$0xff] }
 0x41d   : > { %7713 = vmatpush2.bf16.msra.mxu0 %v9636_v28  ;;  %7754 = vmatpush2.bf16.msra.mxu1 %v9764_v57  ;;  %v1355_v53 = vld [vmem:[%s10757_s27 + $0x1dd8] sm:$0xff]  ;;  %v9845_v48 = vcombine.high %v1227_v42, %v1231_v45  ;;  %v9844_v41 = vcombine.low %v1227_v42, %v1231_v45 }
 0x41e   : > { %7714 = vmatprep.subr.bf16.mxu0 %v9629_v60  ;;  %7755 = vmatprep.subr.bf16.mxu1 %v9757_v31  ;;  %v1359_v21 = vld [vmem:[%s10757_s27 + $0x1df8] sm:$0xff] }
 0x41f   : > { %v9973_v20 = vcombine.high %v1355_v53, %v1359_v21  ;;  %v1219_v50 = vld [vmem:[%s10757_s27 + $0x1998] sm:$0xff]  ;;  %v9972_v54 = vcombine.low %v1355_v53, %v1359_v21 }
 0x420   : > { %v1223_v51 = vld [vmem:[%s10757_s27 + $0x19b8] sm:$0xff] }
 0x421   : > { %7715 = vmatpush2.bf16.msra.mxu0 %v9628_v63  ;;  %7756 = vmatpush2.bf16.msra.mxu1 %v9756_v3  ;;  %v1347_v52 = vld [vmem:[%s10757_s27 + $0x1d98] sm:$0xff]  ;;  %v9837_v55 = vcombine.high %v1219_v50, %v1223_v51  ;;  %v9836_v1 = vcombine.low %v1219_v50, %v1223_v51 }
 0x422   : > { %7716 = vmatprep.subr.bf16.mxu0 %v9621_v4  ;;  %7757 = vmatprep.subr.bf16.mxu1 %v9749_v7  ;;  %v1351_v58 = vld [vmem:[%s10757_s27 + $0x1db8] sm:$0xff] }
 0x423   : > { %v9965_v56 = vcombine.high %v1347_v52, %v1351_v58  ;;  %v1211_v28 = vld [vmem:[%s10757_s27 + $0x1958] sm:$0xff]  ;;  %v9964_v3 = vcombine.low %v1347_v52, %v1351_v58 }
 0x424   : > { %v1215_v57 = vld [vmem:[%s10757_s27 + $0x1978] sm:$0xff] }
 0x425   : > { %7717 = vmatpush2.bf16.msra.mxu0 %v9620_v15  ;;  %7758 = vmatpush2.bf16.msra.mxu1 %v9748_v17  ;;  %v1339_v31 = vld [vmem:[%s10757_s27 + $0x1d58] sm:$0xff]  ;;  %v9829_v4 = vcombine.high %v1211_v28, %v1215_v57 }
 0x426   : > { %7718 = vmatprep.subr.bf16.mxu0 %v9613_v19  ;;  %7759 = vmatprep.subr.bf16.mxu1 %v9741_v22  ;;  %v1343_v59 = vld [vmem:[%s10757_s27 + $0x1d78] sm:$0xff] }
 0x427   : > { %v1203_v12 = vld [vmem:[%s10757_s27 + $0x1918] sm:$0xff]  ;;  %v9956_v24 = vcombine.low %v1339_v31, %v1343_v59 }
 0x428   : > { %v1207_v13 = vld [vmem:[%s10757_s27 + $0x1938] sm:$0xff] }
 0x429   : > { %7719 = vmatpush2.bf16.msra.mxu0 %v9612_v26  ;;  %7760 = vmatpush2.bf16.msra.mxu1 %v9740_v29  ;;  %v1331_v61 = vld [vmem:[%s10757_s27 + $0x1d18] sm:$0xff]  ;;  %v9821_v11 = vcombine.high %v1203_v12, %v1207_v13 }
 0x42a   : > { %7720 = vmatprep.subr.bf16.mxu0 %v9605_v32  ;;  %7761 = vmatprep.subr.bf16.mxu1 %v9733_v23  ;;  %v1335_v15 = vld [vmem:[%s10757_s27 + $0x1d38] sm:$0xff]  ;;  %v9820_v32 = vcombine.low %v1203_v12, %v1207_v13 }
 0x42b   : > { %v9949_v8 = vcombine.high %v1331_v61, %v1335_v15  ;;  %v1195_v25 = vld [vmem:[%s10757_s27 + $0x18d8] sm:$0xff]  ;;  %v9948_v23 = vcombine.low %v1331_v61, %v1335_v15 }
 0x42c   : > { %v1323_v26 = vld [vmem:[%s10757_s27 + $0x1cd8] sm:$0xff] }
 0x42d   : > { %7721 = vmatpush2.bf16.msra.mxu0 %v9604_v37  ;;  %7762 = vmatpush2.bf16.msra.mxu1 %v9732_v39  ;;  %v1327_v29 = vld [vmem:[%s10757_s27 + $0x1cf8] sm:$0xff] }
 0x42e   : > { %7722 = vmatprep.subr.bf16.mxu0 %v9597_v40  ;;  %7763 = vmatprep.subr.bf16.mxu1 %v9725_v30  ;;  %v9941_v36 = vcombine.high %v1323_v26, %v1327_v29  ;;  %v1187_v35 = vld [vmem:[%s10757_s27 + $0x1898] sm:$0xff]  ;;  %v9940_v30 = vcombine.low %v1323_v26, %v1327_v29 }
 0x42f   : > { %v1191_v43 = vld [vmem:[%s10757_s27 + $0x18b8] sm:$0xff] }
 0x430   : > { %v1315_v37 = vld [vmem:[%s10757_s27 + $0x1c98] sm:$0xff]  ;;  %v9805_v42 = vcombine.high %v1187_v35, %v1191_v43 }
 0x431   : > { %7723 = vmatpush2.bf16.msra.mxu0 %v9596_v46  ;;  %7764 = vmatpush2.bf16.msra.mxu1 %v9724_v49  ;;  %v1319_v39 = vld [vmem:[%s10757_s27 + $0x1cb8] sm:$0xff] }
 0x432   : > { %7774 = vmatprep.subr.bf16.mxu0 %v9845_v48  ;;  %7815 = vmatprep.subr.bf16.mxu1 %v9973_v20  ;;  %v9933_v45 = vcombine.high %v1315_v37, %v1319_v39  ;;  %v1179_v53 = vld [vmem:[%s10757_s27 + $0x1858] sm:$0xff]  ;;  %v9804_v48 = vcombine.low %v1187_v35, %v1191_v43  ;;  %v9932_v20 = vcombine.low %v1315_v37, %v1319_v39 }
 0x433   : > { %v1183_v21 = vld [vmem:[%s10757_s27 + $0x1878] sm:$0xff] }
 0x434   : > { %v7480_v60 = vpop.f32.mrf.mxu0  ;;  %7725 = vmatmul.mubr.bf16.vlgmr.msra.gmra.mxu0 %v11011_v2  ;;  %v7521_v0 = vpop.f32.mrf.mxu1  ;;  %7766 = vmatmul.mubr.bf16.vlgmr.msra.gmra.mxu1 %v11016_v6  ;;  %v1307_v46 = vld [vmem:[%s10757_s27 + $0x1c58] sm:$0xff]  ;;  %v9797_v50 = vcombine.high %v1179_v53, %v1183_v21 }
 0x435   : > { %v7481_v62 = vadd.f32 %v7480_v60, %v11838_v34  ;;  %7775 = vmatpush1.bf16.msra.mxu0 %v9844_v41  ;;  %7816 = vmatpush1.bf16.msra.mxu1 %v9972_v54  ;;  %v9957_v34 = vcombine.high %v1339_v31, %v1343_v59  ;;  %v1311_v49 = vld [vmem:[%s10757_s27 + $0x1c78] sm:$0xff] }
 0x436   : > { %v7482_v63 = vpop.f32.mrf.mxu0  ;;  %7776 = vmatprep.subr.bf16.mxu0 %v9837_v55  ;;  %v7523_v10 = vpop.f32.mrf.mxu1  ;;  %7817 = vmatprep.subr.bf16.mxu1 %v9965_v56  ;;  %v9925_v51 = vcombine.high %v1307_v46, %v1311_v49  ;;  %v1171_v52 = vld [vmem:[%s10757_s27 + $0x1818] sm:$0xff]  ;;  %v9796_v55 = vcombine.low %v1179_v53, %v1183_v21  ;;  %v9924_v56 = vcombine.low %v1307_v46, %v1311_v49 }
 0x437   : > { %v11912_v7 = vadd.f32 %v7521_v0, %v7481_v62  ;;  %v7483_v2 = vadd.f32 %v7482_v63, %v11847_v16  ;;  %7806 = vmatprep.mubr.bf16.mxu0 %v11021_v14  ;;  %7847 = vmatprep.mubr.bf16.mxu1 %v11026_v18  ;;  %v9828_v16 = vcombine.low %v1211_v28, %v1215_v57  ;;  %v1199_v18 = vld [vmem:[%s10757_s27 + $0x18f8] sm:$0xff] }
 0x438   : > { %v7484_v6 = vpop.f32.mrf.mxu0  ;;  %v7525_v19 = vpop.f32.mrf.mxu1  ;;  %v9813_v33 = vcombine.high %v1195_v25, %v1199_v18  ;;  %v9812_v40 = vcombine.low %v1195_v25, %v1199_v18  ;;  %v1175_v58 = vld [vmem:[%s10757_s27 + $0x1838] sm:$0xff] }
 0x439   : > { %v11921_v17 = vadd.f32 %v7523_v10, %v7483_v2  ;;  %7777 = vmatpush1.bf16.msra.mxu0 %v9836_v1  ;;  %7818 = vmatpush1.bf16.msra.mxu1 %v9964_v3  ;;  %v1299_v41 = vld [vmem:[%s10757_s27 + $0x1c18] sm:$0xff]  ;;  %v9789_v28 = vcombine.high %v1171_v52, %v1175_v58  ;;  %v9788_v0 = vcombine.low %v1171_v52, %v1175_v58 }
 0x43a   : > { %v7485_v22 = vpop.f32.mrf.mxu0  ;;  %7778 = vmatprep.subr.bf16.mxu0 %v9829_v4  ;;  %v7526_v14 = vpop.f32.mrf.mxu1  ;;  %7819 = vmatprep.subr.bf16.mxu1 %v9957_v34  ;;  %v1303_v54 = vld [vmem:[%s10757_s27 + $0x1c38] sm:$0xff] }
 0x43b   : > { %v9917_v57 = vcombine.high %v1299_v41, %v1303_v54  ;;  %v1291_v60 = vld [vmem:[%s10757_s27 + $0x1bd8] sm:$0xff]  ;;  %v9916_v1 = vcombine.low %v1299_v41, %v1303_v54 }
 0x43c   : > { %v1295_v31 = vld [vmem:[%s10757_s27 + $0x1bf8] sm:$0xff] }
 0x43d   : > { %7779 = vmatpush1.bf16.msra.mxu0 %v9828_v16  ;;  %7820 = vmatpush1.bf16.msra.mxu1 %v9956_v24  ;;  %v1419_v59 = vld [vmem:[%s10757_s27 + $0x1fd8] sm:$0xff]  ;;  %v9909_v63 = vcombine.high %v1291_v60, %v1295_v31  ;;  %v9908_v12 = vcombine.low %v1291_v60, %v1295_v31 }
 0x43e   : > { %7780 = vmatprep.subr.bf16.mxu0 %v9821_v11  ;;  %7821 = vmatprep.subr.bf16.mxu1 %v9949_v8  ;;  %v1423_v62 = vld [vmem:[%s10757_s27 + $0x1ff8] sm:$0xff] }
 0x43f   : > { %v10037_v3 = vcombine.high %v1419_v59, %v1423_v62  ;;  %v1283_v4 = vld [vmem:[%s10757_s27 + $0x1b98] sm:$0xff]  ;;  %v10036_v13 = vcombine.low %v1419_v59, %v1423_v62 }
 0x440   : > { %v1287_v2 = vld [vmem:[%s10757_s27 + $0x1bb8] sm:$0xff] }
 0x441   : > { %7781 = vmatpush1.bf16.msra.mxu0 %v9820_v32  ;;  %7822 = vmatpush1.bf16.msra.mxu1 %v9948_v23  ;;  %v1411_v10 = vld [vmem:[%s10757_s27 + $0x1f98] sm:$0xff]  ;;  %v9901_v6 = vcombine.high %v1283_v4, %v1287_v2  ;;  %v9900_v24 = vcombine.low %v1283_v4, %v1287_v2 }
 0x442   : > { %7782 = vmatprep.subr.bf16.mxu0 %v9813_v33  ;;  %7823 = vmatprep.subr.bf16.mxu1 %v9941_v36  ;;  %v1415_v34 = vld [vmem:[%s10757_s27 + $0x1fb8] sm:$0xff] }
 0x443   : > { %v10029_v61 = vcombine.high %v1411_v10, %v1415_v34  ;;  %v1275_v15 = vld [vmem:[%s10757_s27 + $0x1b58] sm:$0xff]  ;;  %v10028_v11 = vcombine.low %v1411_v10, %v1415_v34 }
 0x444   : > { %v1279_v19 = vld [vmem:[%s10757_s27 + $0x1b78] sm:$0xff] }
 0x445   : > { %7783 = vmatpush1.bf16.msra.mxu0 %v9812_v40  ;;  %7824 = vmatpush1.bf16.msra.mxu1 %v9940_v30  ;;  %v1403_v16 = vld [vmem:[%s10757_s27 + $0x1f58] sm:$0xff]  ;;  %v9893_v14 = vcombine.high %v1275_v15, %v1279_v19  ;;  %v9892_v32 = vcombine.low %v1275_v15, %v1279_v19 }
 0x446   : > { %7784 = vmatprep.subr.bf16.mxu0 %v9805_v42  ;;  %7825 = vmatprep.subr.bf16.mxu1 %v9933_v45  ;;  %v1407_v22 = vld [vmem:[%s10757_s27 + $0x1f78] sm:$0xff] }
 0x447   : > { %v10021_v8 = vcombine.high %v1403_v16, %v1407_v22  ;;  %v1267_v25 = vld [vmem:[%s10757_s27 + $0x1b18] sm:$0xff]  ;;  %v10020_v23 = vcombine.low %v1403_v16, %v1407_v22 }
 0x448   : > { %v1271_v18 = vld [vmem:[%s10757_s27 + $0x1b38] sm:$0xff] }
 0x449   : > { %7785 = vmatpush1.bf16.msra.mxu0 %v9804_v48  ;;  %7826 = vmatpush1.bf16.msra.mxu1 %v9932_v20  ;;  %v1395_v26 = vld [vmem:[%s10757_s27 + $0x1f18] sm:$0xff]  ;;  %v9885_v33 = vcombine.high %v1267_v25, %v1271_v18  ;;  %v9884_v40 = vcombine.low %v1267_v25, %v1271_v18 }
 0x44a   : > { %7786 = vmatprep.subr.bf16.mxu0 %v9797_v50  ;;  %7827 = vmatprep.subr.bf16.mxu1 %v9925_v51  ;;  %v1399_v29 = vld [vmem:[%s10757_s27 + $0x1f38] sm:$0xff] }
 0x44b   : > { %v10013_v36 = vcombine.high %v1395_v26, %v1399_v29  ;;  %v1259_v35 = vld [vmem:[%s10757_s27 + $0x1ad8] sm:$0xff]  ;;  %v10012_v30 = vcombine.low %v1395_v26, %v1399_v29 }
 0x44c   : > { %v1263_v43 = vld [vmem:[%s10757_s27 + $0x1af8] sm:$0xff] }
 0x44d   : > { %7787 = vmatpush1.bf16.msra.mxu0 %v9796_v55  ;;  %7828 = vmatpush1.bf16.msra.mxu1 %v9924_v56  ;;  %v1387_v37 = vld [vmem:[%s10757_s27 + $0x1ed8] sm:$0xff]  ;;  %v9877_v42 = vcombine.high %v1259_v35, %v1263_v43  ;;  %v9876_v48 = vcombine.low %v1259_v35, %v1263_v43 }
 0x44e   : > { %7788 = vmatprep.subr.bf16.mxu0 %v9789_v28  ;;  %7829 = vmatprep.subr.bf16.mxu1 %v9917_v57  ;;  %v1391_v39 = vld [vmem:[%s10757_s27 + $0x1ef8] sm:$0xff] }
 0x44f   : > { %v10005_v45 = vcombine.high %v1387_v37, %v1391_v39  ;;  %v1251_v53 = vld [vmem:[%s10757_s27 + $0x1a98] sm:$0xff]  ;;  %v10004_v20 = vcombine.low %v1387_v37, %v1391_v39 }
 0x450   : > { %v1255_v21 = vld [vmem:[%s10757_s27 + $0x1ab8] sm:$0xff] }
 0x451   : > { %7789 = vmatpush1.bf16.msra.mxu0 %v9788_v0  ;;  %7830 = vmatpush1.bf16.msra.mxu1 %v9916_v1  ;;  %v1379_v46 = vld [vmem:[%s10757_s27 + $0x1e98] sm:$0xff]  ;;  %v9869_v50 = vcombine.high %v1251_v53, %v1255_v21  ;;  %v9868_v55 = vcombine.low %v1251_v53, %v1255_v21 }
 0x452   : > { %7790 = vmatprep.subr.bf16.mxu0 %v9909_v63  ;;  %7831 = vmatprep.subr.bf16.mxu1 %v10037_v3  ;;  %v1383_v49 = vld [vmem:[%s10757_s27 + $0x1eb8] sm:$0xff] }
 0x453   : > { %v9997_v51 = vcombine.high %v1379_v46, %v1383_v49  ;;  %v1243_v52 = vld [vmem:[%s10757_s27 + $0x1a58] sm:$0xff]  ;;  %v9996_v56 = vcombine.low %v1379_v46, %v1383_v49 }
 0x454   : > { %v1247_v58 = vld [vmem:[%s10757_s27 + $0x1a78] sm:$0xff] }
 0x455   : > { %7791 = vmatpush2.bf16.msra.mxu0 %v9908_v12  ;;  %7832 = vmatpush2.bf16.msra.mxu1 %v10036_v13  ;;  %v1371_v41 = vld [vmem:[%s10757_s27 + $0x1e58] sm:$0xff]  ;;  %v9861_v28 = vcombine.high %v1243_v52, %v1247_v58  ;;  %v9860_v0 = vcombine.low %v1243_v52, %v1247_v58 }
 0x456   : > { %7792 = vmatprep.subr.bf16.mxu0 %v9901_v6  ;;  %7833 = vmatprep.subr.bf16.mxu1 %v10029_v61  ;;  %v1375_v54 = vld [vmem:[%s10757_s27 + $0x1e78] sm:$0xff] }
 0x457   : > { %v9989_v57 = vcombine.high %v1371_v41, %v1375_v54  ;;  %v1235_v60 = vld [vmem:[%s10757_s27 + $0x1a18] sm:$0xff]  ;;  %v9988_v1 = vcombine.low %v1371_v41, %v1375_v54 }
 0x458   : > { %v1239_v31 = vld [vmem:[%s10757_s27 + $0x1a38] sm:$0xff] }
 0x459   : > { %7793 = vmatpush2.bf16.msra.mxu0 %v9900_v24  ;;  %7834 = vmatpush2.bf16.msra.mxu1 %v10028_v11  ;;  %v1363_v59 = vld [vmem:[%s10757_s27 + $0x1e18] sm:$0xff]  ;;  %v9853_v63 = vcombine.high %v1235_v60, %v1239_v31  ;;  %v9852_v4 = vcombine.low %v1235_v60, %v1239_v31 }
 0x45a   : > { %7794 = vmatprep.subr.bf16.mxu0 %v9893_v14  ;;  %7835 = vmatprep.subr.bf16.mxu1 %v10021_v8  ;;  %v1367_v62 = vld [vmem:[%s10757_s27 + $0x1e38] sm:$0xff] }
 0x45b   : > { %v9981_v3 = vcombine.high %v1363_v59, %v1367_v62  ;;  %v9980_v2 = vcombine.low %v1363_v59, %v1367_v62 }
 0x45d   : > { %7795 = vmatpush2.bf16.msra.mxu0 %v9892_v32  ;;  %7836 = vmatpush2.bf16.msra.mxu1 %v10020_v23 }
 0x45e   : > { %7796 = vmatprep.subr.bf16.mxu0 %v9885_v33  ;;  %7837 = vmatprep.subr.bf16.mxu1 %v10013_v36 }
 0x461   : > { %7797 = vmatpush2.bf16.msra.mxu0 %v9884_v40  ;;  %7838 = vmatpush2.bf16.msra.mxu1 %v10012_v30 }
 0x462   : > { %7798 = vmatprep.subr.bf16.mxu0 %v9877_v42  ;;  %7839 = vmatprep.subr.bf16.mxu1 %v10005_v45 }
 0x465   : > { %7799 = vmatpush2.bf16.msra.mxu0 %v9876_v48  ;;  %7840 = vmatpush2.bf16.msra.mxu1 %v10004_v20 }
 0x466   : > { %7800 = vmatprep.subr.bf16.mxu0 %v9869_v50  ;;  %7841 = vmatprep.subr.bf16.mxu1 %v9997_v51 }
 0x469   : > { %7801 = vmatpush2.bf16.msra.mxu0 %v9868_v55  ;;  %7842 = vmatpush2.bf16.msra.mxu1 %v9996_v56 }
 0x46a   : > { %7802 = vmatprep.subr.bf16.mxu0 %v9861_v28  ;;  %7843 = vmatprep.subr.bf16.mxu1 %v9989_v57 }
 0x46d   : > { %7803 = vmatpush2.bf16.msra.mxu0 %v9860_v0  ;;  %7844 = vmatpush2.bf16.msra.mxu1 %v9988_v1 }
 0x46e   : > { %7804 = vmatprep.subr.bf16.mxu0 %v9853_v63  ;;  %7845 = vmatprep.subr.bf16.mxu1 %v9981_v3 }
 0x471   : > { %7805 = vmatpush2.bf16.msra.mxu0 %v9852_v4  ;;  %7846 = vmatpush2.bf16.msra.mxu1 %v9980_v2 }
 0x474   : > { %v7562_v10 = vpop.f32.mrf.mxu0  ;;  %7807 = vmatmul.mubr.bf16.vlgmr.msra.gmra.mxu0 %v11091_v44  ;;  %v7603_v34 = vpop.f32.mrf.mxu1  ;;  %7848 = vmatmul.mubr.bf16.vlgmr.msra.gmra.mxu1 %v11095_v47 }
 0x475   : > { %v7604_v12 = vadd.f32 %v7603_v34, %v7562_v10 }
 0x476   : > { %v7564_v13 = vpop.f32.mrf.mxu0  ;;  %v7605_v6 = vpop.f32.mrf.mxu1 }
 0x477   : > { %v7606_v61 = vadd.f32 %v7605_v6, %v7564_v13 }
 0x478   : > { %v7566_v15 = vpop.f32.mrf.mxu0  ;;  %v7607_v19 = vpop.f32.mrf.mxu1 }
 0x47a   : > { %v7567_v16 = vpop.f32.mrf.mxu0  ;;  %v7608_v22 = vpop.f32.mrf.mxu1 }
 0x4b4   : > { %v7644_v24 = vpop.f32.mrf.mxu0  ;;  %v7685_v14 = vpop.f32.mrf.mxu1 }
 0x4b5   : > { %v7645_v11 = vadd.f32 %v7644_v24, %v7604_v12 }
 0x4b6   : > { %v7646_v8 = vpop.f32.mrf.mxu0  ;;  %v7687_v26 = vpop.f32.mrf.mxu1 }
 0x4b7   : > { %v7686_v25 = vadd.f32 %v7685_v14, %v7645_v11  ;;  %v7647_v18 = vadd.f32 %v7646_v8, %v7606_v61 }
 0x4b8   : > { %v7648_v29 = vpop.f32.mrf.mxu0  ;;  %v7689_v32 = vpop.f32.mrf.mxu1 }
 0x4b9   : > { %v7688_v44 = vadd.f32 %v7687_v26, %v7647_v18 }
 0x4ba   : > { %v7649_v23 = vpop.f32.mrf.mxu0  ;;  %v7690_v47 = vpop.f32.mrf.mxu1 }
 0x4f4   : > { %v7726_v33 = vpop.f32.mrf.mxu0  ;;  %v7767_v35 = vpop.f32.mrf.mxu1 }
 0x4f5   : > { %v7727_v36 = vadd.f32 %v7726_v33, %v7686_v25 }
 0x4f6   : > { %v7728_v43 = vpop.f32.mrf.mxu0  ;;  %v7769_v39 = vpop.f32.mrf.mxu1 }
 0x4f7   : > { %v7768_v37 = vadd.f32 %v7767_v35, %v7727_v36  ;;  %v7729_v53 = vadd.f32 %v7728_v43, %v7688_v44 }
 0x4f8   : > { %v7730_v40 = vpop.f32.mrf.mxu0  ;;  %v7771_v30 = vpop.f32.mrf.mxu1 }
 0x4f9   : > { %v7770_v46 = vadd.f32 %v7769_v39, %v7729_v53 }
 0x4fa   : > { %v7731_v42 = vpop.f32.mrf.mxu0  ;;  %v7772_v45 = vpop.f32.mrf.mxu1 }
 0x534   : > { %v7808_v21 = vpop.f32.mrf.mxu0  ;;  %v7849_v48 = vpop.f32.mrf.mxu1 }
 0x535   : > { %v7809_v49 = vadd.f32 %v7808_v21, %v7768_v37 }
 0x536   : > { %v7810_v20 = vpop.f32.mrf.mxu0  ;;  %v7851_v52 = vpop.f32.mrf.mxu1  ;;  %7859 = sbr.rel (%p10038_p1) target bundleno = 1343 (0x53f), region = 64 }
 0x537   : > { %v7850_v50 = vadd.f32 %v7849_v48, %v7809_v49  ;;  %v7811_v51 = vadd.f32 %v7810_v20, %v7770_v46 }
 0x538   : > { %v7812_v58 = vpop.f32.mrf.mxu0  ;;  %v7853_v54 = vpop.f32.mrf.mxu1 }
 0x539   : > { %v7852_v41 = vadd.f32 %v7851_v52, %v7811_v51 }
 0x53a   : > { %v7813_v55 = vpop.f32.mrf.mxu0  ;;  %v7854_v56 = vpop.f32.mrf.mxu1 }
 0x53b   : > { %7860 = vst [vmem:[#allocation2 + $0x30] sm:$0xff] %v11324_v5  ;;  %7861 = vst [vmem:[#allocation2] sm:$0xff] %v11333_v9 }
 0x53c   : > { %7862 = vst [vmem:[#allocation2 + $0x18] sm:$0xff] %v11618_v27  ;;  %7863 = vst [vmem:[#allocation2 + $0x10] sm:$0xff] %v11627_v38 }
 0x53d   : > { %7864 = vst [vmem:[#allocation2 + $0x8] sm:$0xff] %v11912_v7  ;;  %7865 = vst [vmem:[#allocation2 + $0x20] sm:$0xff] %v11921_v17 }
 0x53e   : > { %7866 = vst [vmem:[#allocation2 + $0x28] sm:$0xff] %v7850_v50  ;;  %7867 = vst [vmem:[#allocation2 + $0x38] sm:$0xff] %v7852_v41 }
 0x53f PF: > { %p10039_p4 = scmp.le.s32.totalorder %s10562_s21, 0 }
 0x541   : > { %7871 = sbr.rel (%p10039_p4) target bundleno = 1357 (0x54d), region = 68 }
 0x546   : > { %v7872_v28 = vld [vmem:[#allocation2 + $0x30] sm:$0xff]  ;;  %v7873_v57 = vld [vmem:[#allocation2] sm:$0xff]  ;;  %v7874_v60 = vld [vmem:[#allocation2 + $0x18] sm:$0xff] }
 0x547   : > { %v7880_v31 = vadd.f32 %v7872_v28, %v11324_v5  ;;  %v7881_v59 = vadd.f32 %v7873_v57, %v11333_v9  ;;  %v7882_v62 = vadd.f32 %v7874_v60, %v11618_v27  ;;  %v7875_v0 = vld [vmem:[#allocation2 + $0x10] sm:$0xff]  ;;  %v7876_v1 = vld [vmem:[#allocation2 + $0x8] sm:$0xff]  ;;  %v7877_v63 = vld [vmem:[#allocation2 + $0x20] sm:$0xff] }
 0x548   : > { %v7883_v3 = vadd.f32 %v7875_v0, %v11627_v38  ;;  %v7884_v4 = vadd.f32 %v7876_v1, %v11912_v7  ;;  %v7885_v2 = vadd.f32 %v7877_v63, %v11921_v17  ;;  %v7878_v10 = vld [vmem:[#allocation2 + $0x28] sm:$0xff]  ;;  %v7879_v34 = vld [vmem:[#allocation2 + $0x38] sm:$0xff] }
 0x549   : > { %7888 = vst [vmem:[#allocation2 + $0x30] sm:$0xff] %v7880_v31  ;;  %7889 = vst [vmem:[#allocation2] sm:$0xff] %v7881_v59  ;;  %v7886_v12 = vadd.f32 %v7878_v10, %v7850_v50  ;;  %v7887_v5 = vadd.f32 %v7879_v34, %v7852_v41 }
 0x54a   : > { %7890 = vst [vmem:[#allocation2 + $0x18] sm:$0xff] %v7882_v62  ;;  %7891 = vst [vmem:[#allocation2 + $0x10] sm:$0xff] %v7883_v3 }
 0x54b   : > { %7892 = vst [vmem:[#allocation2 + $0x8] sm:$0xff] %v7884_v4  ;;  %7893 = vst [vmem:[#allocation2 + $0x20] sm:$0xff] %v7885_v2 }
 0x54c   : > { %7894 = vst [vmem:[#allocation2 + $0x28] sm:$0xff] %v7886_v12  ;;  %7895 = vst [vmem:[#allocation2 + $0x38] sm:$0xff] %v7887_v5 }
 0x54d PF: > { %p10040_p5 = scmp.ne.s32.totalorder %s10562_s21, 1 }
 0x54f   : > { %7899 = sbr.rel (%p10040_p5) target bundleno = 1667 (0x683), region = 72 }
 0x554   : > { %v10294_v9 = vld [vmem:[#allocation10 + $0x78] sm:$0xff]   ;;  %v10298_v17 = vld [vmem:[#allocation10 + $0x70] sm:$0xff]   ;;  %v10302_v15 = vld [vmem:[#allocation10 + $0x68] sm:$0xff]  }
 0x555   : > { %v10295_v27 = vld [vmem:[#allocation10 + $0xf8] sm:$0xff]   ;;  %10111 = vmatprep.subr.bf16.mxu0 %v10294_v9  ;;  %v10299_v13 = vld [vmem:[#allocation10 + $0xf0] sm:$0xff]   ;;  %v10303_v19 = vld [vmem:[#allocation10 + $0xe8] sm:$0xff]  }
 0x556   : > { %v10296_v38 = vld [vmem:[#allocation10 + $0x38] sm:$0xff]   ;;  %10133 = vmatprep.subr.bf16.mxu1 %v10295_v27  ;;  %v10300_v6 = vld [vmem:[#allocation10 + $0x30] sm:$0xff]   ;;  %v10304_v16 = vld [vmem:[#allocation10 + $0x28] sm:$0xff]  }
 0x557   : > { %v10297_v7 = vld [vmem:[#allocation10 + $0xb8] sm:$0xff]   ;;  %10112 = vmatpush3.bf16.msra.mxu0 %v10296_v38  ;;  %v10301_v61 = vld [vmem:[#allocation10 + $0xb0] sm:$0xff]   ;;  %v10305_v22 = vld [vmem:[#allocation10 + $0xa8] sm:$0xff]  }
 0x558   : > { %10134 = vmatpush3.bf16.msra.mxu1 %v10297_v7  ;;  %10113 = vmatprep.subr.bf16.mxu0 %v10298_v17  ;;  %v10306_v24 = vld [vmem:[#allocation10 + $0x60] sm:$0xff]   ;;  %v10310_v25 = vld [vmem:[#allocation10 + $0x58] sm:$0xff]   ;;  %v10314_v44 = vld [vmem:[#allocation10 + $0x50] sm:$0xff]  }
 0x559   : > { %10135 = vmatprep.subr.bf16.mxu1 %v10299_v13  ;;  %v10307_v11 = vld [vmem:[#allocation10 + $0xe0] sm:$0xff]   ;;  %v10311_v18 = vld [vmem:[#allocation10 + $0xd8] sm:$0xff]   ;;  %v10315_v32 = vld [vmem:[#allocation10 + $0xd0] sm:$0xff]  }
 0x55a   : > { %v10308_v14 = vld [vmem:[#allocation10 + $0x20] sm:$0xff]   ;;  %v10312_v26 = vld [vmem:[#allocation10 + $0x18] sm:$0xff]   ;;  %v10316_v23 = vld [vmem:[#allocation10 + $0x10] sm:$0xff]  }
 0x55b   : > { %10114 = vmatpush3.bf16.msra.mxu0 %v10300_v6  ;;  %v10309_v8 = vld [vmem:[#allocation10 + $0xa0] sm:$0xff]   ;;  %v10313_v29 = vld [vmem:[#allocation10 + $0x98] sm:$0xff]   ;;  %v10317_v47 = vld [vmem:[#allocation10 + $0x90] sm:$0xff]  }
 0x55c   : > { %10136 = vmatpush3.bf16.msra.mxu1 %v10301_v61  ;;  %10115 = vmatprep.subr.bf16.mxu0 %v10302_v15  ;;  %v10318_v33 = vld [vmem:[#allocation10 + $0x48] sm:$0xff]   ;;  %v10322_v37 = vld [vmem:[#allocation10 + $0x40] sm:$0xff]   ;;  %v11988_v42 = vld [vmem:[#allocation2] sm:$0xff] }
 0x55d   : > { %10137 = vmatprep.subr.bf16.mxu1 %v10303_v19  ;;  %v10319_v36 = vld [vmem:[#allocation10 + $0xc8] sm:$0xff]   ;;  %v10323_v39 = vld [vmem:[#allocation10 + $0xc0] sm:$0xff]   ;;  %v7914_v45 = vrot.slane %v11988_v42, 4  ;;  %v7965_v53 = vmul.f32 %v11988_v42, %v11988_v42  ;;  %v10326_v48 = vld [vmem:[#allocation10 + $0x178] sm:$0xff]  }
 0x55e   : > { %v10320_v35 = vld [vmem:[#allocation10 + $0x8] sm:$0xff]   ;;  %v10324_v40 = vld [vmem:[#allocation10] sm:$0xff]   ;;  %v10327_v51 = vld [vmem:[#allocation10 + $0x1f8] sm:$0xff]  }
 0x55f   : > { %10116 = vmatpush3.bf16.msra.mxu0 %v10304_v16  ;;  %v10321_v43 = vld [vmem:[#allocation10 + $0x88] sm:$0xff]   ;;  %v10325_v30 = vld [vmem:[#allocation10 + $0x80] sm:$0xff]   ;;  %v7915_v20 = vadd.f32 %v7914_v45, %v11988_v42  ;;  %v7978_v50 = vrot.slane %v7965_v53, 4 }
 0x560   : > { %10138 = vmatpush3.bf16.msra.mxu1 %v10305_v22  ;;  %10117 = vmatprep.subr.bf16.mxu0 %v10306_v24  ;;  %v11993_v21 = vld [vmem:[#allocation2 + $0x10] sm:$0xff]  ;;  %v12001_v58 = vld [vmem:[#allocation2 + $0x18] sm:$0xff] }
 0x561   : > { %10139 = vmatprep.subr.bf16.mxu1 %v10307_v11  ;;  %v7926_v46 = vrot.slane %v11993_v21, 4  ;;  %v7967_v49 = vmul.f32 %v11993_v21, %v11993_v21  ;;  %v11999_v52 = vld [vmem:[#allocation2 + $0x30] sm:$0xff]  ;;  %v7916_v28 = vrot.slane %v7915_v20, 2  ;;  %v7979_v57 = vadd.f32 %v7978_v50, %v7965_v53 }
 0x562   : > { %v7908_v55 = vrot.slane %v11999_v52, 4  ;;  %v7964_v56 = vmul.f32 %v11999_v52, %v11999_v52  ;;  %v7920_v60 = vrot.slane %v12001_v58, 4  ;;  %v7966_v31 = vmul.f32 %v12001_v58, %v12001_v58 }
 0x563   : > { %10118 = vmatpush3.bf16.msra.mxu0 %v10308_v14  ;;  %v7927_v41 = vadd.f32 %v7926_v46, %v11993_v21  ;;  %v7990_v54 = vrot.slane %v7967_v49, 4  ;;  %v7917_v63 = vadd.f32 %v7916_v28, %v7915_v20  ;;  %v7980_v3 = vrot.slane %v7979_v57, 2 }
 0x564   : > { %10140 = vmatpush3.bf16.msra.mxu1 %v10309_v8  ;;  %10119 = vmatprep.subr.bf16.mxu0 %v10310_v25  ;;  %v7909_v0 = vadd.f32 %v7908_v55, %v11999_v52  ;;  %v7972_v1 = vrot.slane %v7964_v56, 4  ;;  %v7921_v4 = vadd.f32 %v7920_v60, %v12001_v58  ;;  %v7984_v2 = vrot.slane %v7966_v31, 4 }
 0x565   : > { %10141 = vmatprep.subr.bf16.mxu1 %v10311_v18  ;;  %v7928_v59 = vrot.slane %v7927_v41, 2  ;;  %v7991_v62 = vadd.f32 %v7990_v54, %v7967_v49  ;;  %v7918_v9 = vrot.slane %v7917_v63, 1  ;;  %v7981_v27 = vadd.f32 %v7980_v3, %v7979_v57 }
 0x566   : > { %v7910_v12 = vrot.slane %v7909_v0, 2  ;;  %v7973_v5 = vadd.f32 %v7972_v1, %v7964_v56  ;;  %v7922_v38 = vrot.slane %v7921_v4, 2  ;;  %v7985_v7 = vadd.f32 %v7984_v2, %v7966_v31 }
 0x567   : > { %10120 = vmatpush3.bf16.msra.mxu0 %v10312_v26  ;;  %v7929_v10 = vadd.f32 %v7928_v59, %v7927_v41  ;;  %v7992_v34 = vrot.slane %v7991_v62, 2  ;;  %v7919_v15 = vadd.f32 %v7918_v9, %v7917_v63  ;;  %v7982_v19 = vrot.slane %v7981_v27, 1  ;;  %v12023_v63 = vld [vmem:[#allocation8] sm:$0xff] }
 0x568   : > { %10142 = vmatpush3.bf16.msra.mxu1 %v10313_v29  ;;  %10121 = vmatprep.subr.bf16.mxu0 %v10314_v44  ;;  %v7911_v6 = vadd.f32 %v7910_v12, %v7909_v0  ;;  %v7974_v61 = vrot.slane %v7973_v5, 2  ;;  %v7923_v16 = vadd.f32 %v7922_v38, %v7921_v4  ;;  %v7986_v22 = vrot.slane %v7985_v7, 2 }
 0x569   : > { %10143 = vmatprep.subr.bf16.mxu1 %v10315_v32  ;;  %v7930_v17 = vrot.slane %v7929_v10, 1  ;;  %v7993_v13 = vadd.f32 %v7992_v34, %v7991_v62  ;;  %v7957_v25 = vmul.f32 0.125, %v7919_v15  ;;  %v7983_v18 = vadd.f32 %v7982_v19, %v7981_v27  ;;  %v12019_v62 = vld [vmem:[#allocation7] sm:$0xff] }
 0x56a   : > { %v7912_v14 = vrot.slane %v7911_v6, 1  ;;  %v7975_v8 = vadd.f32 %v7974_v61, %v7973_v5  ;;  %v7924_v26 = vrot.slane %v7923_v16, 1  ;;  %v7987_v29 = vadd.f32 %v7986_v22, %v7985_v7  ;;  %v12039_v19 = vld [vmem:[#allocation2 + $0x20] sm:$0xff] }
 0x56b   : > { %10122 = vmatpush3.bf16.msra.mxu0 %v10316_v23  ;;  %v7931_v24 = vadd.f32 %v7930_v17, %v7929_v10  ;;  %v7994_v11 = vrot.slane %v7993_v13, 1  ;;  %v8078_v54 = vlaneseq  ;;  %v8045_v1 = vsub.f32 %v11988_v42, %v7957_v25 }
 0x56c   : > { %10144 = vmatpush3.bf16.msra.mxu1 %v10317_v47  ;;  %10123 = vmatprep.subr.bf16.mxu0 %v10318_v33  ;;  %v7913_v23 = vadd.f32 %v7912_v14, %v7911_v6  ;;  %v7976_v47 = vrot.slane %v7975_v8, 1  ;;  %v8021_v33 = vmul.f32 0.125, %v7983_v18  ;;  %v7988_v53 = vrot.slane %v7987_v29, 1 }
 0x56d   : > { %10145 = vmatprep.subr.bf16.mxu1 %v10319_v36  ;;  %v7959_v44 = vmul.f32 0.125, %v7931_v24  ;;  %v7995_v32 = vadd.f32 %v7994_v11, %v7993_v13  ;;  %v8029_v36 = vmul.f32 %v7957_v25, %v7957_v25  ;;  %v12016_v60 = vshrl.u32 %v8078_v54, 7 }
 0x56e   : > { %v7989_v50 = vadd.f32 %v7988_v53, %v7987_v29  ;;  %v7938_v24 = vrot.slane %v12039_v19, 4  ;;  %v7969_v11 = vmul.f32 %v12039_v19, %v12039_v19 }
 0x56f   : > { %10124 = vmatpush3.bf16.msra.mxu0 %v10320_v35  ;;  %v7925_v35 = vadd.f32 %v7924_v26, %v7923_v16  ;;  %v8084_v59 = vsub.s32 1, %v12016_v60  ;;  %v8092_v0 = vsub.s32 3, %v12016_v60  ;;  %v8047_v3 = vsub.f32 %v11993_v21, %v7959_v44  ;;  %v12041_v16 = vld [vmem:[#allocation2 + $0x38] sm:$0xff] }
 0x570   : > { %10146 = vmatpush3.bf16.msra.mxu1 %v10321_v43  ;;  %10125 = vmatprep.subr.bf16.mxu0 %v10322_v37  ;;  %v8023_v43 = vmul.f32 0.125, %v7995_v32  ;;  %v8031_v37 = vmul.f32 %v7959_v44, %v7959_v44  ;;  %v8022_v56 = vmul.f32 0.125, %v7989_v50  ;;  %v8080_v4 = vsub.s32 0, %v12016_v60 }
 0x571   : > { %10147 = vmatprep.subr.bf16.mxu1 %v10323_v39  ;;  %v7956_v39 = vmul.f32 0.125, %v7913_v23  ;;  %v12012_v45 = vmul.f32 0.125, %v7925_v35  ;;  %v8085_v2 = vrot.slane %v12019_v62, %v8084_v59  ;;  %v8088_v10 = vsub.s32 2, %v12016_v60 }
 0x572   : > { %v8039_v46 = vsub.f32 %v8023_v43, %v8031_v37  ;;  %v8093_v12 = vrot.slane %v12019_v62, %v8092_v0  ;;  %v8135_v27 = vrot.slane %v12023_v63, %v8084_v59  ;;  %v8143_v7 = vrot.slane %v12023_v63, %v8092_v0 }
 0x573   : > { %10126 = vmatpush3.bf16.msra.mxu0 %v10324_v40  ;;  %v8037_v40 = vsub.f32 %v8021_v33, %v8029_v36  ;;  %v8028_v49 = vmul.f32 %v7956_v39, %v7956_v39  ;;  %v8044_v38 = vsub.f32 %v11999_v52, %v7956_v39  ;;  %v8081_v21 = vrot.slane %v12019_v62, %v8080_v4 }
 0x574   : > { %10148 = vmatpush3.bf16.msra.mxu1 %v10325_v30  ;;  %10155 = vmatprep.subr.bf16.mxu0 %v10326_v48  ;;  %v7977_v30 = vadd.f32 %v7976_v47, %v7975_v8  ;;  %v8055_v41 = vadd.f32 1e-05, %v8039_v46  ;;  %v8131_v17 = vrot.slane %v12023_v63, %v8080_v4  ;;  %v8046_v6 = vsub.f32 %v12001_v58, %v12012_v45  ;;  %v12047_v8 = vld [vmem:[#allocation2 + $0x8] sm:$0xff] }
 0x575   : > { %10177 = vmatprep.subr.bf16.mxu1 %v10327_v51  ;;  %v8053_v48 = vadd.f32 1e-05, %v8037_v40  ;;  %v8030_v51 = vmul.f32 %v12012_v45, %v12012_v45  ;;  %v8089_v61 = vrot.slane %v12019_v62, %v8088_v10  ;;  %v8139_v15 = vrot.slane %v12023_v63, %v8088_v10 }
 0x576   : > { %v8020_v20 = vmul.f32 0.125, %v7977_v30  ;;  %v7950_v14 = vrot.slane %v12041_v16, 4  ;;  %v7971_v18 = vmul.f32 %v12041_v16, %v12041_v16  ;;  %v7932_v26 = vrot.slane %v12047_v8, 4 }
 0x577   : > { %10358 = vrsqrt.f32 %v8053_v48  ;;  %v8038_v57 = vsub.f32 %v8022_v56, %v8030_v51  ;;  %v7939_v32 = vadd.f32 %v7938_v24, %v12039_v19  ;;  %v8002_v23 = vrot.slane %v7969_v11, 4  ;;  %v10334_v24 = vld [vmem:[#allocation10 + $0x168] sm:$0xff]  }
 0x578   : > { %v8036_v55 = vsub.f32 %v8020_v20, %v8028_v49  ;;  %10360 = vrsqrt.f32 %v8055_v41  ;;  %v7951_v47 = vadd.f32 %v7950_v14, %v12041_v16  ;;  %v8014_v43 = vrot.slane %v7971_v18, 4 }
 0x579   : > { %v8054_v31 = vadd.f32 1e-05, %v8038_v57  ;;  %v7940_v39 = vrot.slane %v7939_v32, 2  ;;  %v8003_v40 = vadd.f32 %v8002_v23, %v7969_v11  ;;  %v7933_v56 = vadd.f32 %v7932_v26, %v12047_v8 }
 0x57a   : > { %v8052_v28 = vadd.f32 1e-05, %v8036_v55  ;;  %v7952_v30 = vrot.slane %v7951_v47, 2  ;;  %v8015_v49 = vadd.f32 %v8014_v43, %v7971_v18  ;;  %v7968_v0 = vmul.f32 %v12047_v8, %v12047_v8  ;;  %v10333_v18 = vld [vmem:[#allocation10 + $0x1b0] sm:$0xff]  }
 0x57b   : > { %v7941_v20 = vadd.f32 %v7940_v39, %v7939_v32  ;;  %v8004_v50 = vrot.slane %v8003_v40, 2  ;;  %v10335_v32 = vld [vmem:[#allocation10 + $0x1e8] sm:$0xff]   ;;  %v10338_v39 = vld [vmem:[#allocation10 + $0x160] sm:$0xff]  }
 0x57c   : > { %10362 = vrsqrt.f32 %v8052_v28  ;;  %v7953_v51 = vadd.f32 %v7952_v30, %v7951_v47  ;;  %v8016_v55 = vrot.slane %v8015_v49, 2  ;;  %v10328_v28 = vld [vmem:[#allocation10 + $0x138] sm:$0xff]  }
 0x57d   : > { %10364 = vrsqrt.f32 %v8054_v31  ;;  %v7942_v57 = vrot.slane %v7941_v20, 1  ;;  %v8005_v31 = vadd.f32 %v8004_v50, %v8003_v40 }
 0x57e   : > { %v7954_v59 = vrot.slane %v7953_v51, 1  ;;  %v8017_v10 = vadd.f32 %v8016_v55, %v8015_v49 }
 0x584   : > { %v10359_v34 = vpop.eup %10358 }
 0x585   : > { %v10361_v5 = vpop.eup %10360  ;;  %v8069_v9 = vmul.f32 %v10359_v34, %v8045_v1  ;;  %v12057_v1 = vld [vmem:[#allocation2 + $0x28] sm:$0xff]  ;;  %v7934_v34 = vrot.slane %v7933_v56, 2 }
 0x586   : > { %v8071_v42 = vmul.f32 %v10361_v5, %v8047_v3  ;;  %v7943_v5 = vadd.f32 %v7942_v57, %v7941_v20  ;;  %v10339_v20 = vld [vmem:[#allocation10 + $0x1e0] sm:$0xff]  }
 0x587   : > { %v8119_v13 = vmul.f32 %v8085_v2, %v8069_v9  ;;  %v10330_v2 = vld [vmem:[#allocation10 + $0x170] sm:$0xff]   ;;  %v8006_v9 = vrot.slane %v8005_v31, 1 }
 0x588   : > { %v8121_v22 = vmul.f32 %v8093_v12, %v8071_v42  ;;  %v10329_v12 = vld [vmem:[#allocation10 + $0x1b8] sm:$0xff]  }
 0x589   : > { %v10363_v52 = vpop.eup %10362  ;;  %v8169_v58 = vadd.f32 %v8135_v27, %v8119_v13  ;;  %v7955_v27 = vadd.f32 %v7954_v59, %v7953_v51  ;;  %v7944_v13 = vrot.slane %v12057_v1, 4 }
 0x58a   : > { %v8068_v25 = vmul.f32 %v10363_v52, %v8044_v38  ;;  %v10365_v29 = vpop.eup %10364  ;;  %v8171_v44 = vadd.f32 %v8143_v7, %v8121_v22  ;;  %v7996_v38 = vrot.slane %v7968_v0, 4  ;;  %v10331_v7 = vld [vmem:[#allocation10 + $0x1f0] sm:$0xff]  }
 0x58b   : > { %v8177_v33 = vmax.f32 %v8169_v58, 0.0  ;;  %v8070_v35 = vmul.f32 %v10365_v29, %v8046_v6  ;;  %v10332_v6 = vld [vmem:[#allocation10 + $0x130] sm:$0xff]   ;;  %v12062_v52 = vmul.f32 0.125, %v7955_v27  ;;  %v7945_v58 = vadd.f32 %v7944_v13, %v12057_v1 }
 0x58c   : > { %v8118_v36 = vmul.f32 %v8081_v21, %v8068_v25  ;;  %v8179_v37 = vmax.f32 %v8171_v44, 0.0  ;;  %v8018_v21 = vrot.slane %v8017_v10, 1  ;;  %v7997_v22 = vadd.f32 %v7996_v38, %v7968_v0 }
 0x58d   : > { %v8185_v45 = vpack.c.bf16 %v8177_v33, %v8177_v33  ;;  %v8120_v46 = vmul.f32 %v8089_v61, %v8070_v35  ;;  %v12060_v61 = vmul.f32 0.125, %v7943_v5  ;;  %v7970_v25 = vmul.f32 %v12057_v1, %v12057_v1 }
 0x58e   : > { %v8168_v53 = vadd.f32 %v8131_v17, %v8118_v36  ;;  %v8187_v48 = vpack.c.bf16 %v8179_v37, %v8179_v37  ;;  %v7935_v17 = vadd.f32 %v7934_v34, %v7933_v56  ;;  %v8019_v11 = vadd.f32 %v8018_v21, %v8017_v10  ;;  %v10336_v36 = vld [vmem:[#allocation10 + $0x128] sm:$0xff]   ;;  %v10342_v56 = vld [vmem:[#allocation10 + $0x158] sm:$0xff]   ;;  %v10348_v21 = vld [vmem:[#allocation10 + $0x110] sm:$0xff]  }
 0x58f   : > { %8736 = vmatprep.mubr.bf16.mxu0 %v8185_v45  ;;  %v8170_v54 = vadd.f32 %v8139_v15, %v8120_v46  ;;  %v8007_v15 = vadd.f32 %v8006_v9, %v8005_v31  ;;  %v8033_v29 = vmul.f32 %v12060_v61, %v12060_v61  ;;  %v8035_v44 = vmul.f32 %v12062_v52, %v12062_v52  ;;  %v10341_v31 = vld [vmem:[#allocation10 + $0x1a0] sm:$0xff]   ;;  %v10345_v9 = vld [vmem:[#allocation10 + $0x198] sm:$0xff]  }
 0x590   : > { %v8176_v41 = vmax.f32 %v8168_v53, 0.0  ;;  %8776 = vmatprep.mubr.bf16.mxu1 %v8187_v48  ;;  %v7936_v14 = vrot.slane %v7935_v17, 1  ;;  %v8027_v23 = vmul.f32 0.125, %v8019_v11  ;;  %v7998_v33 = vrot.slane %v7997_v22, 2  ;;  %v10337_v53 = vld [vmem:[#allocation10 + $0x1a8] sm:$0xff]  }
 0x591   : > { %v8178_v4 = vmax.f32 %v8170_v54, 0.0  ;;  %v8025_v26 = vmul.f32 0.125, %v8007_v15  ;;  %v7946_v43 = vrot.slane %v7945_v58, 2  ;;  %v8008_v37 = vrot.slane %v7970_v25, 4 }
 0x592   : > { %v8184_v3 = vpack.c.bf16 %v8176_v41, %v8176_v41  ;;  %v7937_v47 = vadd.f32 %v7936_v14, %v7935_v17  ;;  %v8043_v40 = vsub.f32 %v8027_v23, %v8035_v44  ;;  %v7999_v45 = vadd.f32 %v7998_v33, %v7997_v22  ;;  %v10340_v41 = vld [vmem:[#allocation10 + $0x120] sm:$0xff]   ;;  %v10349_v22 = vld [vmem:[#allocation10 + $0x190] sm:$0xff]   ;;  %v10351_v14 = vld [vmem:[#allocation10 + $0x1c8] sm:$0xff]  }
 0x593   : > { %v8186_v42 = vpack.c.bf16 %v8178_v4, %v8178_v4  ;;  %v8041_v35 = vsub.f32 %v8025_v26, %v8033_v29  ;;  %v7947_v49 = vadd.f32 %v7946_v43, %v7945_v58  ;;  %v8009_v48 = vadd.f32 %v8008_v37, %v7970_v25  ;;  %v10352_v25 = vld [vmem:[#allocation10 + $0x108] sm:$0xff]   ;;  %v10354_v44 = vld [vmem:[#allocation10 + $0x140] sm:$0xff]  }
 0x594   : > { %8737 = vmatmul.mubr.bf16.vlgmr.msra.gmra.mxu0 %v8184_v3  ;;  %v12071_v30 = vmul.f32 0.125, %v7937_v47  ;;  %v8059_v50 = vadd.f32 1e-05, %v8043_v40  ;;  %v8000_v51 = vrot.slane %v7999_v45, 1  ;;  %v10343_v3 = vld [vmem:[#allocation10 + $0x1d8] sm:$0xff]   ;;  %v8100_v17 = vsub.s32 5, %v12016_v60 }
 0x595   : > { %10156 = vmatpush3.bf16.msra.mxu0 %v10328_v28  ;;  %8777 = vmatmul.mubr.bf16.vlgmr.msra.gmra.mxu1 %v8186_v42  ;;  %v8057_v46 = vadd.f32 1e-05, %v8041_v35  ;;  %v7948_v54 = vrot.slane %v7947_v49, 1  ;;  %v8010_v55 = vrot.slane %v8009_v48, 2  ;;  %v10347_v42 = vld [vmem:[#allocation10 + $0x1d0] sm:$0xff]   ;;  %v8108_v15 = vsub.s32 7, %v12016_v60 }
 0x596   : > { %10157 = vmatprep.subr.bf16.mxu0 %v10330_v2  ;;  %10178 = vmatpush3.bf16.msra.mxu1 %v10329_v12  ;;  %v8001_v28 = vadd.f32 %v8000_v51, %v7999_v45  ;;  %v8032_v57 = vmul.f32 %v12071_v30, %v12071_v30  ;;  %v10344_v2 = vld [vmem:[#allocation10 + $0x118] sm:$0xff]   ;;  %v10346_v12 = vld [vmem:[#allocation10 + $0x150] sm:$0xff]   ;;  %v8051_v58 = vsub.f32 %v12041_v16, %v12062_v52  ;;  %v10353_v47 = vld [vmem:[#allocation10 + $0x188] sm:$0xff]   ;;  %v8096_v37 = vsub.s32 4, %v12016_v60 }
 0x597   : > { %10179 = vmatprep.subr.bf16.mxu1 %v10331_v7  ;;  %10366 = vrsqrt.f32 %v8057_v46  ;;  %v7949_v59 = vadd.f32 %v7948_v54, %v7947_v49  ;;  %v8011_v0 = vadd.f32 %v8010_v55, %v8009_v48  ;;  %v10355_v33 = vld [vmem:[#allocation10 + $0x1c0] sm:$0xff]   ;;  %v8159_v52 = vrot.slane %v12023_v63, %v8108_v15 }
 0x598   : > { %10368 = vrsqrt.f32 %v8059_v50  ;;  %v8024_v4 = vmul.f32 0.125, %v8001_v28  ;;  %v8097_v48 = vrot.slane %v12019_v62, %v8096_v37  ;;  %v8104_v51 = vsub.s32 6, %v12016_v60 }
 0x599   : > { %10158 = vmatpush3.bf16.msra.mxu0 %v10332_v6  ;;  %v12075_v10 = vmul.f32 0.125, %v7949_v59  ;;  %v8012_v34 = vrot.slane %v8011_v0, 1  ;;  %v10350_v6 = vld [vmem:[#allocation10 + $0x148] sm:$0xff]   ;;  %v8147_v55 = vrot.slane %v12023_v63, %v8096_v37 }
 0x59a   : > { %10159 = vmatprep.subr.bf16.mxu0 %v10334_v24  ;;  %10180 = vmatpush3.bf16.msra.mxu1 %v10333_v18  ;;  %v8040_v5 = vsub.f32 %v8024_v4, %v8032_v57  ;;  %v8049_v24 = vsub.f32 %v12039_v19, %v12060_v61  ;;  %v8101_v18 = vrot.slane %v12019_v62, %v8100_v17 }
 0x59b   : > { %10181 = vmatprep.subr.bf16.mxu1 %v10335_v32  ;;  %v8013_v27 = vadd.f32 %v8012_v34, %v8011_v0  ;;  %v8034_v38 = vmul.f32 %v12075_v10, %v12075_v10  ;;  %v8109_v32 = vrot.slane %v12019_v62, %v8108_v15  ;;  %v8151_v61 = vrot.slane %v12023_v63, %v8100_v17 }
 0x59c   : > { %v8056_v7 = vadd.f32 1e-05, %v8040_v5  ;;  %v8155_v59 = vrot.slane %v12023_v63, %v8104_v51 }
 0x59d   : > { %10160 = vmatpush3.bf16.msra.mxu0 %v10336_v36  ;;  %v8026_v13 = vmul.f32 0.125, %v8013_v27  ;;  %v10356_v36 = vld [vmem:[#allocation10 + $0x100] sm:$0xff]  }
 0x59e   : > { %10161 = vmatprep.subr.bf16.mxu0 %v10338_v39  ;;  %10182 = vmatpush3.bf16.msra.mxu1 %v10337_v53  ;;  %10370 = vrsqrt.f32 %v8056_v7  ;;  %v10357_v39 = vld [vmem:[#allocation10 + $0x180] sm:$0xff]   ;;  %v8048_v53 = vsub.f32 %v12047_v8, %v12071_v30  ;;  %v8105_v30 = vrot.slane %v12019_v62, %v8104_v51 }
 0x59f   : > { %10183 = vmatprep.subr.bf16.mxu1 %v10339_v20  ;;  %v8042_v11 = vsub.f32 %v8026_v13, %v8034_v38 }
 0x5a1   : > { %10162 = vmatpush3.bf16.msra.mxu0 %v10340_v41  ;;  %v8058_v26 = vadd.f32 1e-05, %v8042_v11 }
 0x5a2   : > { %10163 = vmatprep.subr.bf16.mxu0 %v10342_v56  ;;  %10184 = vmatpush3.bf16.msra.mxu1 %v10341_v31  ;;  %v8050_v56 = vsub.f32 %v12057_v1, %v12075_v10 }
 0x5a3   : > { %10185 = vmatprep.subr.bf16.mxu1 %v10343_v3  ;;  %10372 = vrsqrt.f32 %v8058_v26 }
 0x5a4   : > { %v10367_v29 = vpop.eup %10366 }
 0x5a5   : > { %10164 = vmatpush3.bf16.msra.mxu0 %v10344_v2  ;;  %v10369_v23 = vpop.eup %10368  ;;  %v8073_v19 = vmul.f32 %v10367_v29, %v8049_v24 }
 0x5a6   : > { %10165 = vmatprep.subr.bf16.mxu0 %v10346_v12  ;;  %10186 = vmatpush3.bf16.msra.mxu1 %v10345_v9  ;;  %v8075_v16 = vmul.f32 %v10369_v23, %v8051_v58 }
 0x5a7   : > { %10187 = vmatprep.subr.bf16.mxu1 %v10347_v42  ;;  %v8123_v35 = vmul.f32 %v8101_v18, %v8073_v19 }
 0x5a8   : > { %v8125_v43 = vmul.f32 %v8109_v32, %v8075_v16 }
 0x5a9   : > { %10166 = vmatpush3.bf16.msra.mxu0 %v10348_v21  ;;  %v8173_v40 = vadd.f32 %v8151_v61, %v8123_v35 }
 0x5aa   : > { %10167 = vmatprep.subr.bf16.mxu0 %v10350_v6  ;;  %10188 = vmatpush3.bf16.msra.mxu1 %v10349_v22  ;;  %v8175_v45 = vadd.f32 %v8159_v52, %v8125_v43 }
 0x5ab   : > { %10189 = vmatprep.subr.bf16.mxu1 %v10351_v14  ;;  %v8181_v46 = vmax.f32 %v8173_v40, 0.0  ;;  %v10371_v20 = vpop.eup %10370 }
 0x5ac   : > { %v8183_v49 = vmax.f32 %v8175_v45, 0.0  ;;  %v8072_v54 = vmul.f32 %v10371_v20, %v8048_v53 }
 0x5ad   : > { %10168 = vmatpush3.bf16.msra.mxu0 %v10352_v25  ;;  %v8189_v50 = vpack.c.bf16 %v8181_v46, %v8181_v46 }
 0x5ae   : > { %10169 = vmatprep.subr.bf16.mxu0 %v10354_v44  ;;  %10190 = vmatpush3.bf16.msra.mxu1 %v10353_v47  ;;  %v8191_v41 = vpack.c.bf16 %v8183_v49, %v8183_v49  ;;  %v8122_v8 = vmul.f32 %v8097_v48, %v8072_v54 }
 0x5af   : > { %10191 = vmatprep.subr.bf16.mxu1 %v10355_v33  ;;  %8816 = vmatprep.mubr.bf16.mxu0 %v8189_v50 }
 0x5b0   : > { %8856 = vmatprep.mubr.bf16.mxu1 %v8191_v41  ;;  %v10373_v28 = vpop.eup %10372  ;;  %v8172_v57 = vadd.f32 %v8147_v55, %v8122_v8 }
 0x5b1   : > { %10170 = vmatpush3.bf16.msra.mxu0 %v10356_v36  ;;  %v8074_v31 = vmul.f32 %v10373_v28, %v8050_v56 }
 0x5b2   : > { %10192 = vmatpush3.bf16.msra.mxu1 %v10357_v39  ;;  %v8180_v0 = vmax.f32 %v8172_v57, 0.0 }
 0x5b3   : > { %v8124_v3 = vmul.f32 %v8105_v30, %v8074_v31 }
 0x5b4   : > { %v8188_v60 = vpack.c.bf16 %v8180_v0, %v8180_v0 }
 0x5b5   : > { %v8174_v4 = vadd.f32 %v8155_v59, %v8124_v3 }
 0x5b6   : > { %8817 = vmatmul.mubr.bf16.vlgmr.msra.gmra.mxu0 %v8188_v60 }
 0x5b7   : > { %v8182_v2 = vmax.f32 %v8174_v4, 0.0 }
 0x5b9   : > { %v8190_v34 = vpack.c.bf16 %v8182_v2, %v8182_v2 }
 0x5bb   : > { %8857 = vmatmul.mubr.bf16.vlgmr.msra.gmra.mxu1 %v8190_v34 }
 0x654   : > { %v10127_v12 = vpop.f32.mrf.mxu0 }
 0x655   : > { %v10149_v5 = vpop.f32.mrf.mxu1 }
 0x656   : > { %v10128_v1 = vpop.f32.mrf.mxu0 }
 0x657   : > { %v10150_v10 = vpop.f32.mrf.mxu1  ;;  %v10129_v42 = vadd.f32 %v10128_v1, %v10127_v12 }
 0x658   : > { %v10130_v9 = vpop.f32.mrf.mxu0  ;;  %v10151_v7 = vadd.f32 %v10150_v10, %v10149_v5 }
 0x659   : > { %v10152_v27 = vpop.f32.mrf.mxu1 }
 0x65a   : > { %v10131_v62 = vpop.f32.mrf.mxu0  ;;  %v8779_v13 = vadd.f32 %v10151_v7, %v10129_v42 }
 0x65b   : > { %v10153_v38 = vpop.f32.mrf.mxu1 }
 0x676   : > { %v10171_v21 = vpop.f32.mrf.mxu0 }
 0x678   : > { %v10172_v63 = vpop.f32.mrf.mxu0 }
 0x679   : > { %v10173_v17 = vadd.f32 %v10172_v63, %v10171_v21 }
 0x67a   : > { %v10174_v6 = vpop.f32.mrf.mxu0 }
 0x67b   : > { %v10193_v15 = vpop.f32.mrf.mxu1  ;;  %v8819_v22 = vadd.f32 %v10173_v17, %v8779_v13 }
 0x67c   : > { %v10175_v24 = vpop.f32.mrf.mxu0 }
 0x67d   : > { %v10194_v11 = vpop.f32.mrf.mxu1 }
 0x67e   : > { %v10195_v14 = vadd.f32 %v10194_v11, %v10193_v15 }
 0x67f   : > { %v10196_v58 = vpop.f32.mrf.mxu1 }
 0x680   : > { %v8859_v25 = vadd.f32 %v10195_v14, %v8819_v22 }
 0x681   : > { %v10197_v18 = vpop.f32.mrf.mxu1 }
 0x682   : > { %8864 = vst [vmem:[%s12125_s5] sm:$0xff] %v8859_v25 }
 0x683 PF: > { %s22_s23 = sadd.s32 1, %s10570_s23   ;;  %s12140_s18 = smov %s10554_s19 }
 0x684   : > { %p19_p8 = scmp.ge.s32.totalorder %s22_s23, 4   ;;  %s12141_s19 = smov %s10558_s20 }
 0x685   : > { %s12142_s20 = smov %s10716_s13  ;;  %s12143_s21 = smov %s10566_s22 }
 0x686   : > { %s12144_s22 = smov %s12146_s6  ;;  %21 = sbr.rel (!%p19_p8) target bundleno = 7 (0x7), region = 120 }
 0x68b   :  { %8884 = vsyncpa [#allocation4], 1 }
 0x68c   :  { %8886 = vsyncpa [#allocation4 + $0x1], 1 }
 0x68d   :  { %8887 = vsyncpa [#allocation6], 1 }
 0x68e   :  { %8889 = vsyncpa [#allocation6 + $0x1], 1 }
 0x68f   :  { %8890 = vsyncpa [#allocation9], 1 }

</bundles_post_ra>
